<compile_context>
chip_gen: v7x
topology: tpu7x:2x2x1
jax: 0.10.0
libtpu: 0.0.40
codegen_flags: <defaults>
</compile_context>

<pallas_src>
import jax
import jax.numpy as jnp
from jax.experimental import pallas as pl
from jax.experimental.pallas import tpu as pltpu

_SQRT_2_OVER_PI = 0.7978845608028654  # sqrt(2 / pi)


def _gelu_tanh_f32(h):
    # 0.5*h*(1 + tanh(c*(h + 0.044715*h^3))) factored as
    # 0.5*h*(1 + tanh(c*h*(1 + 0.044715*h*h)))   (one fewer VPU multiply; the
    # tanh lands on the EUP).  Kept in f32: exact on v5e (no bf16 VPU/EUP) and
    # the GELU is not the contended slot at these tile sizes on v6e/v7x.
    return 0.5 * h * (1.0 + jnp.tanh(
        jnp.float32(_SQRT_2_OVER_PI) * h * (1.0 + 0.044715 * (h * h))))


def _ffn_resident_kernel(x_ref, w1_ref, b1_ref, w2_ref, b2_ref, o_ref):
    """Weights VMEM-resident: one grid step = full FFN for one token tile."""
    # x_ref: (TM, E)  w1_ref: (E, H)  b1_ref: (1, H)  w2_ref: (H, E)  b2_ref: (1, E)
    h = jnp.dot(x_ref[...], w1_ref[...], preferred_element_type=jnp.float32)
    h = h + b1_ref[...].astype(jnp.float32)
    g = _gelu_tanh_f32(h)
    y = jnp.dot(g.astype(w2_ref.dtype), w2_ref[...],
                preferred_element_type=jnp.float32)
    o_ref[...] = (y + b2_ref[...].astype(jnp.float32)).astype(o_ref.dtype)


def _ffn_tiled_kernel(x_ref, w1_ref, b1_ref, w2_ref, b2_ref, o_ref, acc_ref):
    """Hidden-dim tiled fallback: hk is the trailing reduction grid axis."""
    # x_ref: (TM, E)  w1_ref: (E, TH)  b1_ref: (1, TH)  w2_ref: (TH, E)
    # b2_ref: (1, E)  o_ref: (TM, E)   acc_ref: (TM, E) f32 scratch
    hk = pl.program_id(1)
    last = pl.num_programs(1) - 1

    h = jnp.dot(x_ref[...], w1_ref[...], preferred_element_type=jnp.float32)
    h = h + b1_ref[...].astype(jnp.float32)
    g = _gelu_tanh_f32(h)
    part = jnp.dot(g.astype(w2_ref.dtype), w2_ref[...],
                   preferred_element_type=jnp.float32)

    @pl.when(hk == 0)
    def _init():
        acc_ref[...] = jnp.zeros_like(acc_ref)

    @pl.when(hk < last)
    def _accumulate():
        acc_ref[...] += part

    @pl.when(hk == last)
    def _finalize():
        # Fold the final partial + b2 straight into the output write: saves one
        # full (TM, E) f32 accumulator read-modify-write per output tile.
        o_ref[...] = (acc_ref[...] + part + b2_ref[...].astype(jnp.float32)
                      ).astype(o_ref.dtype)


def _round_up(a: int, b: int) -> int:
    return (a + b - 1) // b * b


def _cdiv(a: int, b: int) -> int:
    return (a + b - 1) // b


def _vmem_bytes_resident(tm, E, H, w_isize, x_isize, o_isize):
    io_tiles = 2 * tm * E * (x_isize + o_isize)               # double-buffered x / out
    weights = 2 * ((E * H + H * E) * w_isize + (H + E) * 4)   # w1, w2, biases (buffered)
    interm = tm * H * (4 + w_isize)                           # h (f32) + g (compute dtype)
    return io_tiles + weights + interm


def _vmem_bytes_tiled(tm, th, E, w_isize, x_isize, o_isize):
    io_tiles = 2 * tm * E * (x_isize + o_isize)
    weights = 2 * ((E * th + th * E) * w_isize + (th + E) * 4)
    acc = tm * E * 4
    interm = tm * th * (4 + w_isize)
    return io_tiles + weights + acc + interm


def feed_forward(x, w1, b1, w2, b2, *, block_m=None, block_h=None,
                 compute_dtype=jnp.bfloat16, weights_resident=None):
    """GPT FeedForward: Linear(E->4E) -> tanh-GELU -> Linear(4E->E).

    x: (B, T, E); w1: (E, H); b1: (H,); w2: (H, E); b2: (E,).
    compute_dtype: MXU operand dtype (bf16 default; accumulation is always f32).
      Store w1/w2 in this dtype (param init) to avoid a per-call cast copy.
    weights_resident: None = auto (resident whenever they fit VMEM),
      True/False to force a path.
    """
    B, T, E = x.shape
    H = w1.shape[1]
    M = B * T
    out_dtype = x.dtype

    w_isize = jnp.dtype(compute_dtype).itemsize
    x_isize = jnp.dtype(compute_dtype).itemsize
    o_isize = jnp.dtype(out_dtype).itemsize

    # --- generation-aware VMEM budget (v7x: 64 MiB/TC, v5e/v6e: 128 MiB) -----
    try:
        phys_vmem = int(pltpu.get_tpu_info().vmem_capacity_bytes)
    except Exception:
        phys_vmem = 64 * 1024 * 1024                       # conservative fallback
    budget = min(100 * 1024 * 1024, int(phys_vmem * 0.8))  # compiler scratch headroom

    # --- token-tile size ------------------------------------------------------
    m_pad8 = _round_up(M, 8)
    tm = _round_up(min(block_m if block_m is not None else 1024, m_pad8), 8)
    # Keep >= 2 token tiles when there is enough work so the "parallel" axis can
    # be sharded across both v7x TensorCores (near-free on 1-TC v5e/v6e).
    if m_pad8 >= 16 and _cdiv(m_pad8, tm) < 2:
        tm = _round_up(_cdiv(m_pad8, 2), 8)

    # --- resident-weights fast path vs hidden-dim-tiled fallback --------------
    weights_fixed = 2 * ((E * H + H * E) * w_isize + (H + E) * 4)
    if weights_resident is None:
        resident = weights_fixed <= int(0.6 * budget)
    else:
        resident = bool(weights_resident) and weights_fixed <= int(0.9 * budget)

    th = None
    if resident:
        while (tm > 8 and
               _vmem_bytes_resident(tm, E, H, w_isize, x_isize, o_isize) > budget):
            tm = max(8, _round_up(tm // 2, 8))
    else:
        if block_h is not None:
            th = max(128, _round_up(block_h, 128))
        else:
            for cand in (1024, 512, 256):
                if H % cand == 0:
                    th = cand
                    break
            else:
                th = 512    # pad H up to a 512 multiple rather than dropping to 128
        while (_vmem_bytes_tiled(tm, th, E, w_isize, x_isize, o_isize) > budget
               and (tm > 8 or th > 128)):
            if tm > 8 and (tm >= th or th <= 128):
                tm = max(8, _round_up(tm // 2, 8))
            else:
                th = max(128, _round_up(th // 2, 128))

    m_pad = _round_up(M, tm)
    n_m_tiles = m_pad // tm

    # --- operands (weights are only cast if not already in compute_dtype) -----
    x2d = x.reshape(M, E)
    if x2d.dtype != compute_dtype:
        x2d = x2d.astype(compute_dtype)
    if m_pad != M:
        x2d = jnp.pad(x2d, ((0, m_pad - M), (0, 0)))
    w1c = w1 if w1.dtype == compute_dtype else w1.astype(compute_dtype)
    w2c = w2 if w2.dtype == compute_dtype else w2.astype(compute_dtype)
    b1_2d = b1.reshape(1, H).astype(jnp.float32)
    b2_2d = b2.reshape(1, E).astype(jnp.float32)

    vmem_limit = budget
    weight_passes = 1 if resident else n_m_tiles
    cost = pl.CostEstimate(
        flops=4 * M * H * E,                    # two matmuls: 2*M*E*H FLOPs each
        transcendentals=M * H,                  # one tanh per hidden activation
        bytes_accessed=(M * E * x_isize
                        + weight_passes * (E * H + H * E) * w_isize
                        + (H + E) * 4
                        + M * E * o_isize))

    if resident:
        out2d = pl.pallas_call(
            _ffn_resident_kernel,
            out_shape=jax.ShapeDtypeStruct((m_pad, E), out_dtype),
            grid_spec=pltpu.PrefetchScalarGridSpec(
                num_scalar_prefetch=0,
                grid=(n_m_tiles,),
                in_specs=[
                    pl.BlockSpec((tm, E), lambda i: (i, 0)),   # x token tile
                    pl.BlockSpec((E, H), lambda i: (0, 0)),    # w1 (VMEM-resident)
                    pl.BlockSpec((1, H), lambda i: (0, 0)),    # b1 (resident)
                    pl.BlockSpec((H, E), lambda i: (0, 0)),    # w2 (resident)
                    pl.BlockSpec((1, E), lambda i: (0, 0)),    # b2 (resident)
                ],
                out_specs=pl.BlockSpec((tm, E), lambda i: (i, 0)),
            ),
            compiler_params=pltpu.CompilerParams(
                dimension_semantics=("parallel",),
                vmem_limit_bytes=vmem_limit),
            cost_estimate=cost,
        )(x2d, w1c, b1_2d, w2c, b2_2d)
    else:
        H_pad = _round_up(H, th)
        if H_pad != H:
            # Zero-pad the hidden dim: padded w2 rows are zero, so the padded
            # hidden columns contribute nothing to the output.
            w1c = jnp.pad(w1c, ((0, 0), (0, H_pad - H)))
            b1_2d = jnp.pad(b1_2d, ((0, 0), (0, H_pad - H)))
            w2c = jnp.pad(w2c, ((0, H_pad - H), (0, 0)))
        out2d = pl.pallas_call(
            _ffn_tiled_kernel,
            out_shape=jax.ShapeDtypeStruct((m_pad, E), out_dtype),
            grid_spec=pltpu.PrefetchScalarGridSpec(
                num_scalar_prefetch=0,
                grid=(n_m_tiles, H_pad // th),
                in_specs=[
                    pl.BlockSpec((tm, E), lambda i, hk: (i, 0)),   # x token tile
                    pl.BlockSpec((E, th), lambda i, hk: (0, hk)),  # w1 column slab
                    pl.BlockSpec((1, th), lambda i, hk: (0, hk)),  # b1 chunk
                    pl.BlockSpec((th, E), lambda i, hk: (hk, 0)),  # w2 row slab
                    pl.BlockSpec((1, E), lambda i, hk: (0, 0)),    # b2 (resident)
                ],
                out_specs=pl.BlockSpec((tm, E), lambda i, hk: (i, 0)),
                scratch_shapes=[pltpu.VMEM((tm, E), jnp.float32)],
            ),
            compiler_params=pltpu.CompilerParams(
                dimension_semantics=("parallel", "arbitrary"),
                vmem_limit_bytes=vmem_limit),
            cost_estimate=cost,
        )(x2d, w1c, b1_2d, w2c, b2_2d)

    return out2d[:M].reshape(B, T, E)


def _reference_ffn(x, w1, b1, w2, b2):
    hp = jax.lax.Precision.HIGHEST
    h = jnp.einsum("bte,eh->bth", x, w1, precision=hp) + b1
    c = jnp.sqrt(2.0 / jnp.pi)
    g = 0.5 * h * (1.0 + jnp.tanh(c * (h + 0.044715 * h ** 3)))
    return jnp.einsum("bth,he->bte", g, w2, precision=hp) + b2


if __name__ == "__main__":
    # Shapes implied by the reference module: x = torch.rand(2, 4, 768), emb_dim=768.
    B, T, E = 2, 4, 768
    H = 4 * E

    key = jax.random.PRNGKey(0)
    kx, kw1, kb1, kw2, kb2 = jax.random.split(key, 5)

    x = jax.random.uniform(kx, (B, T, E), dtype=jnp.float32)
    w1 = jax.random.normal(kw1, (E, H), dtype=jnp.float32) * 0.02
    b1 = jax.random.normal(kb1, (H,), dtype=jnp.float32) * 0.02
    w2 = jax.random.normal(kw2, (H, E), dtype=jnp.float32) * 0.02
    b2 = jax.random.normal(kb2, (E,), dtype=jnp.float32) * 0.02

    ref = _reference_ffn(x, w1, b1, w2, b2)

    # Correctness check of the hidden-dim-tiled fallback path with f32 MXU
    # operands (matches the PyTorch module's f32 semantics).
    out_f32 = feed_forward(x, w1, b1, w2, b2, compute_dtype=jnp.float32,
                           weights_resident=False)
    jax.block_until_ready(out_f32)
    assert out_f32.shape == (B, T, E)
    assert jnp.allclose(out_f32, ref, atol=2e-3, rtol=2e-3), \
        float(jnp.max(jnp.abs(out_f32 - ref)))

    # Default fast path: weights stored in bf16 once (as at param init, so no
    # per-call cast copy), both matmuls on the MXU in bf16 with f32
    # accumulation, weight matrices VMEM-resident (streamed from HBM once).
    w1_bf16 = w1.astype(jnp.bfloat16)
    w2_bf16 = w2.astype(jnp.bfloat16)
    out = feed_forward(x, w1_bf16, b1, w2_bf16, b2)
    jax.block_until_ready(out)
    assert out.shape == (B, T, E)
    assert jnp.allclose(out, ref, atol=5e-2, rtol=5e-2), \
        float(jnp.max(jnp.abs(out - ref)))

    print("KERNEL_OK")
</pallas_src>

<mosaic_0001>
module attributes {stable_mosaic.version = 11 : i64} {
  func.func @_ffn_tiled_kernel(%arg0: i32, %arg1: i32, %arg2: memref<8x768xf32, #tpu.memory_space<vmem>>, %arg3: memref<768x1024xf32, #tpu.memory_space<vmem>>, %arg4: memref<1x1024xf32, #tpu.memory_space<vmem>>, %arg5: memref<1024x768xf32, #tpu.memory_space<vmem>>, %arg6: memref<1x768xf32, #tpu.memory_space<vmem>>, %arg7: memref<8x768xf32, #tpu.memory_space<vmem>>, %arg8: memref<8x768xf32, #tpu.memory_space<vmem>>) attributes {dimension_semantics = [#tpu.dimension_semantics<parallel>, #tpu.dimension_semantics<arbitrary>], iteration_bounds = array<i64: 1, 3>, scalar_prefetch = 0 : i64, scratch_operands = 1 : i64, tpu.core_type = #tpu.core_type<tc>, window_params = [{transform_indices = @transform_0, window_bounds = array<i64: 8, 768>}, {transform_indices = @transform_1, window_bounds = array<i64: 768, 1024>}, {transform_indices = @transform_2, window_bounds = array<i64: 1, 1024>}, {transform_indices = @transform_3, window_bounds = array<i64: 1024, 768>}, {pipeline_mode = #tpu.pipeline_mode<synchronous>, transform_indices = @transform_4, window_bounds = array<i64: 1, 768>}, {transform_indices = @transform_5, window_bounds = array<i64: 8, 768>}]} {
    %c0 = arith.constant 0 : index
    %c0_0 = arith.constant 0 : index
    %0 = vector.load %arg2[%c0, %c0_0] : memref<8x768xf32, #tpu.memory_space<vmem>>, vector<8x768xf32>
    %c0_1 = arith.constant 0 : index
    %c0_2 = arith.constant 0 : index
    %1 = vector.load %arg3[%c0_1, %c0_2] : memref<768x1024xf32, #tpu.memory_space<vmem>>, vector<768x1024xf32>
    %cst = arith.constant dense<0.000000e+00> : vector<8x1024xf32>
    %2 = tpu.matmul %0, %1, %cst {dimension_numbers = #tpu.dot_dimension_numbers<[1], [0], [0], [1], [0, 0, 1, 1], [], []>} : vector<8x768xf32>, vector<768x1024xf32>, vector<8x1024xf32> -> vector<8x1024xf32>
    %c0_3 = arith.constant 0 : index
    %c0_4 = arith.constant 0 : index
    %3 = vector.load %arg4[%c0_3, %c0_4] : memref<1x1024xf32, #tpu.memory_space<vmem>>, vector<1x1024xf32>
    %4 = vector.broadcast %3 : vector<1x1024xf32> to vector<8x1024xf32>
    %5 = arith.addf %2, %4 : vector<8x1024xf32>
    %cst_5 = arith.constant 5.000000e-01 : f32
    %6 = vector.broadcast %cst_5 : f32 to vector<8x1024xf32>
    %7 = arith.mulf %6, %5 : vector<8x1024xf32>
    %cst_6 = arith.constant 0.797884583 : f32
    %8 = vector.broadcast %cst_6 : f32 to vector<8x1024xf32>
    %9 = arith.mulf %8, %5 : vector<8x1024xf32>
    %10 = arith.mulf %5, %5 : vector<8x1024xf32>
    %cst_7 = arith.constant 4.471500e-02 : f32
    %11 = vector.broadcast %cst_7 : f32 to vector<8x1024xf32>
    %12 = arith.mulf %11, %10 : vector<8x1024xf32>
    %cst_8 = arith.constant 1.000000e+00 : f32
    %13 = vector.broadcast %cst_8 : f32 to vector<8x1024xf32>
    %14 = arith.addf %13, %12 : vector<8x1024xf32>
    %15 = arith.mulf %9, %14 : vector<8x1024xf32>
    %16 = math.tanh %15 : vector<8x1024xf32>
    %cst_9 = arith.constant 1.000000e+00 : f32
    %17 = vector.broadcast %cst_9 : f32 to vector<8x1024xf32>
    %18 = arith.addf %17, %16 : vector<8x1024xf32>
    %19 = arith.mulf %7, %18 : vector<8x1024xf32>
    %c0_10 = arith.constant 0 : index
    %c0_11 = arith.constant 0 : index
    %20 = vector.load %arg5[%c0_10, %c0_11] : memref<1024x768xf32, #tpu.memory_space<vmem>>, vector<1024x768xf32>
    %cst_12 = arith.constant dense<0.000000e+00> : vector<8x768xf32>
    %21 = tpu.matmul %19, %20, %cst_12 {dimension_numbers = #tpu.dot_dimension_numbers<[1], [0], [0], [1], [0, 0, 1, 1], [], []>} : vector<8x1024xf32>, vector<1024x768xf32>, vector<8x768xf32> -> vector<8x768xf32>
    %c0_i32 = arith.constant 0 : i32
    %22 = arith.cmpi eq, %arg1, %c0_i32 : i32
    %23 = arith.extui %22 : i1 to i32
    %c0_i32_13 = arith.constant 0 : i32
    %24 = arith.cmpi ne, %23, %c0_i32_13 : i32
    scf.if %24 {
      %cst_17 = arith.constant 0.000000e+00 : f32
      %31 = vector.broadcast %cst_17 : f32 to vector<8x768xf32>
      %c0_18 = arith.constant 0 : index
      %c0_19 = arith.constant 0 : index
      %32 = vector.load %arg8[%c0_18, %c0_19] : memref<8x768xf32, #tpu.memory_space<vmem>>, vector<8x768xf32>
      tpu.vector_store %arg8[%c0_18, %c0_19], %31 {strides = array<i32>} : memref<8x768xf32, #tpu.memory_space<vmem>>, vector<8x768xf32>,
    } else {
    }
    %c2_i32 = arith.constant 2 : i32
    %25 = arith.cmpi slt, %arg1, %c2_i32 : i32
    %26 = arith.extui %25 : i1 to i32
    %c0_i32_14 = arith.constant 0 : i32
    %27 = arith.cmpi ne, %26, %c0_i32_14 : i32
    scf.if %27 {
      %c0_17 = arith.constant 0 : index
      %c0_18 = arith.constant 0 : index
      %31 = vector.load %arg8[%c0_17, %c0_18] : memref<8x768xf32, #tpu.memory_space<vmem>>, vector<8x768xf32>
      %32 = arith.addf %31, %21 : vector<8x768xf32>
      %c0_19 = arith.constant 0 : index
      %c0_20 = arith.constant 0 : index
      %33 = vector.load %arg8[%c0_19, %c0_20] : memref<8x768xf32, #tpu.memory_space<vmem>>, vector<8x768xf32>
      tpu.vector_store %arg8[%c0_19, %c0_20], %32 {strides = array<i32>} : memref<8x768xf32, #tpu.memory_space<vmem>>, vector<8x768xf32>,
    } else {
    }
    %c2_i32_15 = arith.constant 2 : i32
    %28 = arith.cmpi eq, %arg1, %c2_i32_15 : i32
    %29 = arith.extui %28 : i1 to i32
    %c0_i32_16 = arith.constant 0 : i32
    %30 = arith.cmpi ne, %29, %c0_i32_16 : i32
    scf.if %30 {
      %c0_17 = arith.constant 0 : index
      %c0_18 = arith.constant 0 : index
      %31 = vector.load %arg8[%c0_17, %c0_18] : memref<8x768xf32, #tpu.memory_space<vmem>>, vector<8x768xf32>
      %32 = arith.addf %31, %21 : vector<8x768xf32>
      %c0_19 = arith.constant 0 : index
      %c0_20 = arith.constant 0 : index
      %33 = vector.load %arg6[%c0_19, %c0_20] : memref<1x768xf32, #tpu.memory_space<vmem>>, vector<1x768xf32>
      %34 = vector.broadcast %33 : vector<1x768xf32> to vector<8x768xf32>
      %35 = arith.addf %32, %34 : vector<8x768xf32>
      %c0_21 = arith.constant 0 : index
      %c0_22 = arith.constant 0 : index
      %36 = vector.load %arg7[%c0_21, %c0_22] : memref<8x768xf32, #tpu.memory_space<vmem>>, vector<8x768xf32>
      tpu.vector_store %arg7[%c0_21, %c0_22], %35 {strides = array<i32>} : memref<8x768xf32, #tpu.memory_space<vmem>>, vector<8x768xf32>,
    } else {
    }
    return
  }
  func.func @transform_0(%arg0: i32, %arg1: i32) -> (i32, i32) {
    %c0_i32 = arith.constant 0 : i32
    %c0_i32_0 = arith.constant 0 : i32
    return %arg0, %c0_i32 : i32, i32
  }
  func.func @transform_1(%arg0: i32, %arg1: i32) -> (i32, i32) {
    %c0_i32 = arith.constant 0 : i32
    %c0_i32_0 = arith.constant 0 : i32
    return %c0_i32, %arg1 : i32, i32
  }
  func.func @transform_2(%arg0: i32, %arg1: i32) -> (i32, i32) {
    %c0_i32 = arith.constant 0 : i32
    %c0_i32_0 = arith.constant 0 : i32
    return %c0_i32, %arg1 : i32, i32
  }
  func.func @transform_3(%arg0: i32, %arg1: i32) -> (i32, i32) {
    %c0_i32 = arith.constant 0 : i32
    %c0_i32_0 = arith.constant 0 : i32
    return %arg1, %c0_i32 : i32, i32
  }
  func.func @transform_4(%arg0: i32, %arg1: i32) -> (i32, i32) {
    %c0_i32 = arith.constant 0 : i32
    %c0_i32_0 = arith.constant 0 : i32
    %c0_i32_1 = arith.constant 0 : i32
    return %c0_i32, %c0_i32_0 : i32, i32
  }
  func.func @transform_5(%arg0: i32, %arg1: i32) -> (i32, i32) {
    %c0_i32 = arith.constant 0 : i32
    %c0_i32_0 = arith.constant 0 : i32
    return %arg0, %c0_i32 : i32, i32
  }
}

</mosaic_0001>

<bundles_post_ra>
// kernel: tpu_custom_call.1
= control target key start
LH: loop header
LB: loop body
LE: loop exit
PB: predicated region body
PF: predicated region fallthrough
CT: control target
= control target key end

     0   :  { %s7967_s0 = inlined_call_operand.hbm [shape: f32[8,768], index: 0, kind: input, shape index: {}]   ;;  %s7968_s1 = inlined_call_operand.hbm [shape: f32[768,3072], index: 1, kind: input, shape index: {}]   ;;  %s7969_s2 = inlined_call_operand.hbm [shape: f32[1,3072], index: 2, kind: input, shape index: {}]   ;;  %s7970_s3 = inlined_call_operand.hbm [shape: f32[3072,768], index: 3, kind: input, shape index: {}]   ;;  %s7971_s4 = inlined_call_operand.hbm [shape: f32[1,768], index: 4, kind: input, shape index: {}]   ;;  %s7972_s5 = inlined_call_operand.hbm [shape: f32[8,768], index: 5, kind: output, shape index: {}]  }
   0x1   :  { %7987 = sst [smem:[#allocation21_spill]] %s7968_s1 }
   0x2   :  { %7988 = sst [smem:[#allocation22_spill]] %s7971_s4 }
   0x3   :  { %7989 = sst [smem:[#allocation23_spill]] %s7972_s5 }
   0x4   :  { %10 = vsyncpa [#allocation4], 0 }
   0x5   :  { %11 = vsyncpa [#allocation7], 0 }
   0x6   :  { %13 = vsyncpa [#allocation7 + $0x1], 0 }
   0x7   :  { %14 = vsyncpa [#allocation10], 0 }
   0x8   :  { %16 = vsyncpa [#allocation10 + $0x1], 0 }
   0x9   :  { %17 = vsyncpa [#allocation5], 0  ;;  %s5967_s18 = smov 0   ;;  %s5969_s19 = smov 0  }
   0xa   :  { %s5971_s20 = smov 0   ;;  %s5973_s21 = smov 0  }
   0xb   :  { %s5975_s22 = smov 0   ;;  %s5977_s23 = smov 0  }
   0xc LB: > { %7990 = sst [smem:[#allocation18_spill]] %s5915_s21  ;;  %s5996_s24 = sadd.s32 4294967295, %s5923_s23   ;;  %s5923_s23 = sphi %s5977_s23, %s23_s23   ;;  %s5919_s22 = sphi %s5975_s22, %s8024_s22   ;;  %s5915_s21 = sphi %s5973_s21, %s8023_s21   ;;  %s5911_s20 = sphi %s5971_s20, %s8022_s20   ;;  %s5907_s19 = sphi %s5969_s19, %s8021_s19   ;;  %s5903_s18 = sphi %s5967_s18, %s8020_s18  }
   0xd   : > { %s68_s25 = sadd.s32 1, %s5911_s20  ;;  %p75_p0 = scmp.ne.s32.totalorder %s5911_s20, %s5907_s19 }
   0xe   : > { %p76_p1 = scmp.eq.s32.totalorder %s5923_s23, 0  ;;  %p81_p2 = scmp.ne.s32.totalorder %s5907_s19, %s5903_s18 }
   0xf   : > { %p7973_p3 = scmp.eq.s32.totalorder %s5996_s24, 0  ;;  %p3950_p5 = scmp.ge.s32.totalorder %s5923_s23, 1 }
  0x10   : > { %p77_p4 = por %p76_p1, %p75_p0  ;;  %p191_p7 = scmp.lt.s32.totalorder %s5923_s23, 4 }
  0x11   : > { %p6007_p6 = por %p7973_p3, %p81_p2  ;;  %s5925_s28 = smov [#allocation11]  }
  0x12   : > { %p6012_p8 = pnand %p3950_p5, %p191_p7  ;;  %s218_s29 = sshll.u32 %s5925_s28, 4  ;;  %s219_s29 = int_to_ptr.vmem [resolvable:$true] %s218_s29 }
  0x13   : > { %s7991_s26 = scalar_select %p6007_p6, 1, 0 }
  0x14   : > { %s7992_s27 = scalar_select %p6012_p8, 1, 0 }
  0x15   : > { %p5575_p9 = pneg %p6012_p8  ;;  %p5594_p10 = scmp.lt.s32.totalorder %s5923_s23, 3 }
  0x16   : > { %s7977_s30 = sand.u32 1, %s5923_s23   ;;  %s7995_s4 = sld [smem:[#allocation22_spill]] }
  0x17   : > { %p6022_p11 = pnand %p5575_p9, %p7973_p3  ;;  %p6026_p12 = pnand %p5594_p10, %p77_p4 }
  0x19   : > { %s7993_s6 = scalar_select %p6022_p11, 1, 0 }
  0x1a   : > { %s7994_s7 = scalar_select %p6026_p12, 1, 0 }
  0x1b   : > { %p7978_p0 = pneg %p6022_p11 }
  0x1c   : > { %s5685_s10 = scalar_lea.hbm %s7995_s4, 96 }
  0x1d   : > { %p5686_p13 = scmp.ne.s32.totalorder %s7995_s4, %s5685_s10  ;;  %p5692_p4 = scmp.lt.u32.totalorder %s5685_s10, %s7995_s4 }
  0x1f   : > { %p5688_p1 = pnand %p7978_p0, %p5686_p13 }
  0x21   : > { %p5689_p2 = pneg %p5688_p1 }
  0x23   : > { %p5694_p5 = pnand %p5692_p4, %p5689_p2 }
  0x25   : > { %5697 = shalt.err (!%p5694_p5)
}
  0x26   : > { %s5698_s15 = scalar_lea.vmem %s219_s29, 96  ;;  %p5706_p3 = scmp.lt.s32.totalorder %s219_s29, %s219_s29 }
  0x27   : > { %p5699_p7 = scmp.ne.s32.totalorder %s219_s29, %s5698_s15  ;;  %p5707_p6 = scmp.lt.s32.totalorder %s5698_s15, %s5698_s15 }
  0x29   : > { %p5701_p9 = pnand %p5699_p7, %p7978_p0  ;;  %p5708_p8 = por %p5707_p6, %p5706_p3 }
  0x2b   : > { %p5702_p10 = pneg %p5701_p9 }
  0x2d   : > { %p5709_p12 = pnand %p5708_p8, %p5702_p10 }
  0x2f   : > { %5712 = shalt.err (!%p5709_p12)
}
  0x30   : > { %5581 = dma.hbm_to_vmem [thread:$0]  (!%p6022_p11), %s7995_s4, 96, %s219_s29, [#allocation10]  }
  0x31   : > { %s32_s18 = sadd.s32 1, %s5919_s22  ;;  %s7981_s28 = sand.u32 1, %s5911_s20  }
  0x32   : > { %p33_p3 = scmp.ge.s32.totalorder %s32_s18, 3  ;;  %s6056_s8 = smul.u32 6144, %s7981_s28 }
  0x33   : > { %s3973_s9 = sshll.u32 %s5919_s22, 10  ;;  %s7997_s1 = sld [smem:[#allocation21_spill]] }
  0x34   : > { %s8026_s18 = smov (%p33_p3, %s32_s18), 0  ;;  %s233_s13 = scalar_lea.vmem [#allocation6], %s6056_s8 }
  0x35   : > { %7996 = sst [smem:[#allocation19_spill]] %s8026_s18  ;;  %s65_s29 = ssub.s32 %s5919_s22, %s8026_s18 }
  0x36   : > { %s240_s14 = sshll.u32 %s233_s13, 4  ;;  %p66_p6 = scmp.eq.s32.totalorder %s65_s29, 0  ;;  %s6069_s14 = int_to_ptr.vmem [resolvable:$true] %s240_s14 }
  0x37   : > { %s6078_s16 = scalar_lea.sflag [#allocation7], %s7977_s30  ;;  %p7999_p12 = scmp.ne.s32.totalorder %s7994_s7, 0 }
  0x38   : > { %s6074_s15 = scalar_select %p66_p6, %s5911_s20, %s68_s25  }
  0x39   : > { %s6064_s12 = scalar_lea.hbm %s7997_s1, %s3973_s9  ;;  %p6084_p13 = pneg %p7999_p12 }
  0x3a   : > { %7998 = sst [smem:[#allocation20_spill]] %s6074_s15  ;;  %s5713_s17 = scalar_lea.hbm %s6064_s12, 98304 }
  0x3b   : > { %p5714_p8 = scmp.ne.s32.totalorder %s6064_s12, %s5713_s17  ;;  %s5718_s29 = scalar_lea.hbm %s7997_s1, 294912 }
  0x3c   : > { %s8000_s9 = scalar_select %p6084_p13, 1, 0 }
  0x3d   : > { %p5716_p1 = pnand %p6084_p13, %p5714_p8  ;;  %p5719_p4 = scmp.lt.u32.totalorder %s6064_s12, %s7997_s1 }
  0x3e   : > { %p5720_p5 = scmp.lt.u32.totalorder %s5718_s29, %s5713_s17  ;;  %p5722_p9 = scmp.lt.u32.totalorder %s5713_s17, %s6064_s12 }
  0x3f   : > { %p5717_p2 = pneg %p5716_p1 }
  0x40   : > { %p5721_p7 = por %p5720_p5, %p5719_p4 }
  0x42   : > { %p5723_p10 = por %p5722_p9, %p5721_p7 }
  0x44   : > { %p5724_p3 = pnand %p5723_p10, %p5717_p2 }
  0x46   : > { %5727 = shalt.err (!%p5724_p3)
}
  0x47   : > { %s5728_s30 = scalar_lea.vmem %s6069_s14, 98304  ;;  %s5926_s10 = smov [#allocation6]  }
  0x48   : > { %p5729_p6 = scmp.ne.s32.totalorder %s6069_s14, %s5728_s30  ;;  %s5733_s11 = sshll.u32 %s5926_s10, 4  ;;  %s5734_s11 = int_to_ptr.vmem [resolvable:$false] %s5733_s11 }
  0x49   : > { %s5735_s25 = scalar_lea.vmem %s5734_s11, 196608  ;;  %p5736_p0 = scmp.lt.s32.totalorder %s6069_s14, %s5734_s11 }
  0x4a   : > { %p5731_p8 = pnand %p5729_p6, %p6084_p13  ;;  %p5737_p11 = scmp.lt.s32.totalorder %s5735_s25, %s5728_s30 }
  0x4c   : > { %p5732_p1 = pneg %p5731_p8  ;;  %p5738_p4 = por %p5737_p11, %p5736_p0 }
  0x4e   : > { %p5739_p5 = pnand %p5738_p4, %p5732_p1 }
  0x50   : > { %5742 = shalt.err (!%p5739_p5)
}
  0x51   : > { %s5927_s17 = smov 3072   ;;  %s5928_s29 = smov 1024  }
  0x52   : > { %s5929_s13 = smov 64   ;;  %s5930_s28 = smov [#allocation3]  }
  0x53   : > { %5585 = dma.hbm_to_vmem [thread:$0]  (!%p7999_p12), %s6064_s12, 98304, %s6069_s14, %s6078_s16, %s5927_s17, %s5928_s29, %s5929_s13  }
  0x54   : > { %s207_s10 = sshll.u32 %s5930_s28, 4  ;;  %s8001_s1 = sand.u32 1, %s5911_s20   ;;  %s208_s10 = int_to_ptr.vmem [resolvable:$true] %s207_s10 }
  0x55   : > { %s3956_s11 = sshll.u32 %s8001_s1, 3  ;;  %s5743_s4 = scalar_lea.hbm %s7967_s0, 768 }
  0x56   : > { %p5744_p11 = scmp.ne.s32.totalorder %s7967_s0, %s5743_s4  ;;  %p8002_p0 = scmp.ne.s32.totalorder %s7993_s6, 0 }
  0x57   : > { %p5750_p10 = scmp.lt.u32.totalorder %s5743_s4, %s7967_s0 }
  0x58   : > { %p8003_p2 = pneg %p8002_p0 }
  0x5a   : > { %p5746_p7 = pnand %p5744_p11, %p8003_p2 }
  0x5c   : > { %p5747_p9 = pneg %p5746_p7 }
  0x5e   : > { %p5752_p3 = pnand %p5750_p10, %p5747_p9 }
  0x60   : > { %5755 = shalt.err (!%p5752_p3)
}
  0x61   : > { %s5756_s28 = scalar_lea.vmem %s208_s10, 768  ;;  %p8004_p8 = pmov %p8003_p2 }
  0x62   : > { %p5757_p6 = scmp.ne.s32.totalorder %s208_s10, %s5756_s28  ;;  %p5764_p5 = scmp.lt.s32.totalorder %s208_s10, %s208_s10 }
  0x63   : > { %p5765_p12 = scmp.lt.s32.totalorder %s5756_s28, %s5756_s28 }
  0x64   : > { %p5759_p1 = pnand %p5757_p6, %p8004_p8 }
  0x65   : > { %p5766_p13 = por %p5765_p12, %p5764_p5 }
  0x66   : > { %p5760_p4 = pneg %p5759_p1 }
  0x68   : > { %p5767_p2 = pnand %p5766_p13, %p5760_p4 }
  0x6a   : > { %5770 = shalt.err (!%p5767_p2)
}
  0x6b   : > { %5578 = dma.hbm_to_vmem [thread:$0]  (!%p8002_p0), %s7967_s0, 768, %s208_s10, [#allocation4]  }
  0x6c   : > { %s3974_s4 = sshll.u32 %s5919_s22, 7  ;;  %s254_s14 = scalar_lea.vmem [#allocation8], %s3956_s11 }
  0x6d   : > { %s6134_s12 = scalar_lea.hbm %s7969_s2, %s3974_s4  ;;  %s262_s15 = sshll.u32 %s254_s14, 4  ;;  %s263_s15 = int_to_ptr.vmem [resolvable:$true] %s262_s15 }
  0x6e   : > { %s5771_s6 = scalar_lea.hbm %s6134_s12, 128  ;;  %p8005_p13 = scmp.ne.s32.totalorder %s8000_s9, 0 }
  0x6f   : > { %p5772_p12 = scmp.ne.s32.totalorder %s6134_s12, %s5771_s6  ;;  %s5776_s13 = scalar_lea.hbm %s7969_s2, 384 }
  0x70   : > { %p5777_p0 = scmp.lt.u32.totalorder %s6134_s12, %s7969_s2  ;;  %p5778_p9 = scmp.lt.u32.totalorder %s5776_s13, %s5771_s6 }
  0x71   : > { %p5774_p11 = pnand %p5772_p12, %p8005_p13  ;;  %p5780_p3 = scmp.lt.u32.totalorder %s5771_s6, %s6134_s12 }
  0x72   : > { %p5779_p10 = por %p5778_p9, %p5777_p0 }
  0x73   : > { %p5775_p7 = pneg %p5774_p11 }
  0x74   : > { %p5781_p6 = por %p5780_p3, %p5779_p10 }
  0x76   : > { %p5782_p8 = pnand %p5781_p6, %p5775_p7 }
  0x78   : > { %5785 = shalt.err (!%p5782_p8)
}
  0x79   : > { %s5786_s11 = scalar_lea.vmem %s263_s15, 128  ;;  %s5931_s25 = smov [#allocation8]  }
  0x7a   : > { %p5787_p1 = scmp.ne.s32.totalorder %s263_s15, %s5786_s11  ;;  %s5791_s28 = sshll.u32 %s5931_s25, 4  ;;  %s5792_s28 = int_to_ptr.vmem [resolvable:$false] %s5791_s28 }
  0x7b   : > { %s5793_s1 = scalar_lea.vmem %s5792_s28, 256  ;;  %p5794_p2 = scmp.lt.s32.totalorder %s263_s15, %s5792_s28 }
  0x7c   : > { %p5789_p4 = pnand %p5787_p1, %p8005_p13  ;;  %p5795_p12 = scmp.lt.s32.totalorder %s5793_s1, %s5786_s11 }
  0x7e   : > { %p5790_p5 = pneg %p5789_p4  ;;  %p5796_p11 = por %p5795_p12, %p5794_p2 }
  0x80   : > { %p5797_p0 = pnand %p5796_p11, %p5790_p5 }
  0x82   : > { %5800 = shalt.err (!%p5797_p0)
}
  0x83   : > { %p8006_p9 = scmp.ne.s32.totalorder %s7994_s7, 0  ;;  %s5555_s18 = smul.u32 98304, %s5919_s22 }
  0x84   : > { %s273_s4 = scalar_lea.vmem [#allocation9], %s6056_s8  ;;  %s8007_s17 = sand.u32 1, %s5923_s23  }
  0x85   : > { %5588 = dma.hbm_to_vmem [thread:$0]  (!%p8006_p9), %s6134_s12, 128, %s263_s15, %s6078_s16  }
  0x86   : > { %s281_s5 = sshll.u32 %s273_s4, 4  ;;  %s6159_s6 = scalar_lea.hbm %s7970_s3, %s5555_s18  ;;  %s6161_s5 = int_to_ptr.vmem [resolvable:$true] %s281_s5 }
  0x87   : > { %s6165_s29 = scalar_lea.sflag [#allocation10], %s8007_s17  ;;  %s5801_s13 = scalar_lea.hbm %s6159_s6, 98304 }
  0x88   : > { %p5802_p7 = scmp.ne.s32.totalorder %s6159_s6, %s5801_s13  ;;  %s5806_s12 = scalar_lea.hbm %s7970_s3, 294912 }
  0x89   : > { %p5807_p6 = scmp.lt.u32.totalorder %s6159_s6, %s7970_s3  ;;  %p5808_p8 = scmp.lt.u32.totalorder %s5806_s12, %s5801_s13 }
  0x8a   : > { %p5804_p10 = pnand %p5802_p7, %p8005_p13  ;;  %p5810_p4 = scmp.lt.u32.totalorder %s5801_s13, %s6159_s6 }
  0x8b   : > { %p5809_p1 = por %p5808_p8, %p5807_p6 }
  0x8c   : > { %p5805_p3 = pneg %p5804_p10 }
  0x8d   : > { %p5811_p5 = por %p5810_p4, %p5809_p1 }
  0x8f   : > { %p5812_p2 = pnand %p5811_p5, %p5805_p3 }
  0x91   : > { %5815 = shalt.err (!%p5812_p2)
}
  0x92   : > { %s5816_s30 = scalar_lea.vmem %s6161_s5, 98304  ;;  %s5932_s11 = smov [#allocation9]  }
  0x93   : > { %p5817_p12 = scmp.ne.s32.totalorder %s6161_s5, %s5816_s30  ;;  %s5821_s25 = sshll.u32 %s5932_s11, 4  ;;  %s5822_s25 = int_to_ptr.vmem [resolvable:$false] %s5821_s25 }
  0x94   : > { %s5823_s28 = scalar_lea.vmem %s5822_s25, 196608  ;;  %p5824_p7 = scmp.lt.s32.totalorder %s6161_s5, %s5822_s25 }
  0x95   : > { %p5819_p11 = pnand %p5817_p12, %p8005_p13  ;;  %p5825_p10 = scmp.lt.s32.totalorder %s5823_s28, %s5816_s30 }
  0x97   : > { %p5820_p0 = pneg %p5819_p11  ;;  %p5826_p6 = por %p5825_p10, %p5824_p7 }
  0x99   : > { %p5827_p8 = pnand %p5826_p6, %p5820_p0 }
  0x9b   : > { %5830 = shalt.err (!%p5827_p8)
}
  0x9c   : > { %s5933_s1 = smov 768   ;;  %s5934_s18 = smov 48  }
  0x9d   : > { %5591 = dma.hbm_to_vmem [thread:$0]  (!%p8006_p9), %s6159_s6, 98304, %s6161_s5, %s6165_s29, %s5933_s1, %s5933_s1, %s5934_s18  }
  0x9e   : > { %p8008_p13 = scmp.ne.s32.totalorder %s7992_s27, 0 }
  0x9f   : > { %p8009_p3 = scmp.eq.s32.totalorder (!%p8008_p13), %s5996_s24, 0 }
  0xa0   : > { %293 = sbr.rel (%p8008_p13) target bundleno = 1465 (0x5b9), region = 40 }
  0xa7   : > { %5882 = dma.done.wait (%p8009_p3), [#allocation4], 768   ;;  %p8010_p1 = pmov %p8009_p3 }
  0xa8   : > { %s299_s9 = sand.u32 1, %s5996_s24   ;;  %s301_s4 = sand.u32 1, %s5907_s19  }
  0xa9   : > { %5884 = vsyncadd (%p8010_p1), [#allocation4], 4294966528  ;;  %s5556_s21 = smul.u32 6144, %s301_s4  ;;  %s300_s14 = scalar_lea.sflag [#allocation7], %s299_s9 }
  0xaa   : > { %p8011_p4 = scmp.ne.s32.totalorder %s7991_s26, 0 }
  0xab   : > { %s6197_s17 = scalar_lea.vmem [#allocation6], %s5556_s21 }
  0xac   : > { %5886 = dma.done.wait (%p8011_p4), %s300_s14, 98432  }
  0xad   : > { %5888 = vsyncadd (%p8011_p4), %s300_s14, 4294868864  ;;  %s3964_s27 = sshll.u32 %s301_s4, 3  ;;  %s318_s5 = scalar_lea.sflag [#allocation10], %s299_s9 }
  0xae   : > { %s6203_s7 = scalar_lea.vmem [#allocation8], %s3964_s27  ;;  %s6205_s6 = scalar_lea.vmem [#allocation9], %s5556_s21 }
  0xaf   : > { %5890 = dma.done.wait (%p8011_p4), %s318_s5, 98304  }
  0xb0   : > { %5892 = vsyncadd (%p8011_p4), %s318_s5, 4294868992  ;;  %p8012_p9 = pmov %p8010_p1 }
  0xb1   : > { %p8013_p5 = pmov %p8010_p1 }
  0xb2   : > { %5894 = dma.done.wait (%p8012_p9), [#allocation10], 96  }
  0xb3   : > { %5896 = vsyncadd (%p8013_p5), [#allocation10], 4294967200  ;;  %v367_v0 = vld [vmem:[%s6197_s17 + $0x8] sm:$0xff]  ;;  %v366_v2 = vld [vmem:[%s6197_s17] sm:$0xff]  ;;  %s8014_s26 = sld [smem:[#allocation18_spill]] }
  0xb4   : > { %v375_v1 = vld [vmem:[%s6197_s17 + $0x48] sm:$0xff]  ;;  %v374_v4 = vld [vmem:[%s6197_s17 + $0x40] sm:$0xff] }
  0xb5   : > { %v3975_v3 = vpack.c.bf16 %v375_v1, %v367_v0  ;;  %v383_v5 = vld [vmem:[%s6197_s17 + $0x88] sm:$0xff]  ;;  %v3977_v7 = vpack.c.bf16 %v374_v4, %v366_v2  ;;  %v382_v9 = vld [vmem:[%s6197_s17 + $0x80] sm:$0xff] }
  0xb6   : > { %v391_v6 = vld [vmem:[%s6197_s17 + $0xc8] sm:$0xff]  ;;  %v390_v10 = vld [vmem:[%s6197_s17 + $0xc0] sm:$0xff] }
  0xb7   : > { %v3979_v8 = vpack.c.bf16 %v391_v6, %v383_v5  ;;  %v399_v11 = vld [vmem:[%s6197_s17 + $0x108] sm:$0xff]  ;;  %3976 = vmatprep.subr.bf16.mxu1 %v3975_v3  ;;  %v3981_v13 = vpack.c.bf16 %v390_v10, %v382_v9  ;;  %v398_v15 = vld [vmem:[%s6197_s17 + $0x100] sm:$0xff] }
  0xb8   : > { %v407_v12 = vld [vmem:[%s6197_s17 + $0x148] sm:$0xff]  ;;  %3978 = vmatpush1.bf16.msra.mxu1 %v3977_v7  ;;  %v406_v16 = vld [vmem:[%s6197_s17 + $0x140] sm:$0xff] }
  0xb9   : > { %3980 = vmatprep.subr.bf16.mxu1 %v3979_v8  ;;  %v3983_v14 = vpack.c.bf16 %v407_v12, %v399_v11  ;;  %v415_v17 = vld [vmem:[%s6197_s17 + $0x188] sm:$0xff]  ;;  %v3985_v19 = vpack.c.bf16 %v406_v16, %v398_v15  ;;  %v414_v21 = vld [vmem:[%s6197_s17 + $0x180] sm:$0xff]  ;;  %p3966_p2 = scmp.ne.s32.totalorder %s8014_s26, 0 }
  0xba   : > { %v423_v18 = vld [vmem:[%s6197_s17 + $0x1c8] sm:$0xff]  ;;  %v422_v22 = vld [vmem:[%s6197_s17 + $0x1c0] sm:$0xff] }
  0xbb   : > { %v3987_v20 = vpack.c.bf16 %v423_v18, %v415_v17  ;;  %v431_v23 = vld [vmem:[%s6197_s17 + $0x208] sm:$0xff]  ;;  %v3989_v25 = vpack.c.bf16 %v422_v22, %v414_v21  ;;  %v430_v27 = vld [vmem:[%s6197_s17 + $0x200] sm:$0xff] }
  0xbc   : > { %3982 = vmatpush1.bf16.msra.mxu1 %v3981_v13  ;;  %v439_v24 = vld [vmem:[%s6197_s17 + $0x248] sm:$0xff]  ;;  %v438_v28 = vld [vmem:[%s6197_s17 + $0x240] sm:$0xff] }
  0xbd   : > { %3984 = vmatprep.subr.bf16.mxu1 %v3983_v14  ;;  %v3991_v26 = vpack.c.bf16 %v439_v24, %v431_v23  ;;  %v447_v29 = vld [vmem:[%s6197_s17 + $0x288] sm:$0xff]  ;;  %v3993_v31 = vpack.c.bf16 %v438_v28, %v430_v27  ;;  %v878_v34 = vld [vmem:[%s6197_s17 + $0x1000] sm:$0xff]  ;;  %v6269_v14 = vld [vmem:[#allocation3 + $0x8] sm:$0xff] }
  0xbe   : > { %v455_v30 = vld [vmem:[%s6197_s17 + $0x2c8] sm:$0xff]  ;;  %v446_v36 = vld [vmem:[%s6197_s17 + $0x280] sm:$0xff]  ;;  %1240 = vmatprep.mubr.f32.mxu1 %v6269_v14 }
  0xbf   : > { %v879_v32 = vld [vmem:[%s6197_s17 + $0x1008] sm:$0xff]  ;;  %v3995_v35 = vpack.c.bf16 %v455_v30, %v447_v29  ;;  %v454_v37 = vld [vmem:[%s6197_s17 + $0x2c0] sm:$0xff] }
  0xc0   : > { %3986 = vmatpush1.bf16.msra.mxu1 %v3985_v19  ;;  %v887_v33 = vld [vmem:[%s6197_s17 + $0x1048] sm:$0xff]  ;;  %v886_v39 = vld [vmem:[%s6197_s17 + $0x1040] sm:$0xff]  ;;  %v3997_v47 = vpack.c.bf16 %v454_v37, %v446_v36 }
  0xc1   : > { %3988 = vmatprep.subr.bf16.mxu1 %v3987_v20  ;;  %v4103_v38 = vpack.c.bf16 %v887_v33, %v879_v32  ;;  %v463_v40 = vld [vmem:[%s6197_s17 + $0x308] sm:$0xff]  ;;  %v4105_v42 = vpack.c.bf16 %v886_v39, %v878_v34  ;;  %v894_v45 = vld [vmem:[%s6197_s17 + $0x1080] sm:$0xff] }
  0xc2   : > { %v471_v41 = vld [vmem:[%s6197_s17 + $0x348] sm:$0xff]  ;;  %v902_v46 = vld [vmem:[%s6197_s17 + $0x10c0] sm:$0xff] }
  0xc3   : > { %v895_v43 = vld [vmem:[%s6197_s17 + $0x1088] sm:$0xff]  ;;  %4104 = vmatprep.subr.bf16.mxu0 %v4103_v38  ;;  %v462_v48 = vld [vmem:[%s6197_s17 + $0x300] sm:$0xff]  ;;  %v4109_v51 = vpack.c.bf16 %v902_v46, %v894_v45  ;;  %v3999_v52 = vpack.c.bf16 %v471_v41, %v463_v40 }
  0xc4   : > { %3990 = vmatpush1.bf16.msra.mxu1 %v3989_v25  ;;  %v903_v44 = vld [vmem:[%s6197_s17 + $0x10c8] sm:$0xff]  ;;  %v470_v49 = vld [vmem:[%s6197_s17 + $0x340] sm:$0xff]  ;;  %4106 = vmatpush1.bf16.msra.mxu0 %v4105_v42 }
  0xc5   : > { %3992 = vmatprep.subr.bf16.mxu1 %v3991_v26  ;;  %v4107_v50 = vpack.c.bf16 %v903_v44, %v895_v43  ;;  %v479_v53 = vld [vmem:[%s6197_s17 + $0x388] sm:$0xff]  ;;  %v910_v58 = vld [vmem:[%s6197_s17 + $0x1100] sm:$0xff]  ;;  %v4001_v60 = vpack.c.bf16 %v470_v49, %v462_v48 }
  0xc6   : > { %v911_v54 = vld [vmem:[%s6197_s17 + $0x1108] sm:$0xff]  ;;  %v918_v59 = vld [vmem:[%s6197_s17 + $0x1140] sm:$0xff] }
  0xc7   : > { %v919_v55 = vld [vmem:[%s6197_s17 + $0x1148] sm:$0xff]  ;;  %4108 = vmatprep.subr.bf16.mxu0 %v4107_v50  ;;  %v478_v61 = vld [vmem:[%s6197_s17 + $0x380] sm:$0xff]  ;;  %v4113_v62 = vpack.c.bf16 %v918_v59, %v910_v58 }
  0xc8   : > { %3994 = vmatpush1.bf16.msra.mxu1 %v3993_v31  ;;  %v487_v56 = vld [vmem:[%s6197_s17 + $0x3c8] sm:$0xff]  ;;  %v4111_v57 = vpack.c.bf16 %v919_v55, %v911_v54  ;;  %4110 = vmatpush1.bf16.msra.mxu0 %v4109_v51  ;;  %v486_v2 = vld [vmem:[%s6197_s17 + $0x3c0] sm:$0xff] }
  0xc9   : > { %3996 = vmatprep.subr.bf16.mxu1 %v3995_v35  ;;  %v927_v63 = vld [vmem:[%s6197_s17 + $0x1188] sm:$0xff]  ;;  %v4003_v1 = vpack.c.bf16 %v487_v56, %v479_v53  ;;  %v926_v4 = vld [vmem:[%s6197_s17 + $0x1180] sm:$0xff]  ;;  %v4005_v10 = vpack.c.bf16 %v486_v2, %v478_v61 }
  0xca   : > { %v935_v0 = vld [vmem:[%s6197_s17 + $0x11c8] sm:$0xff]  ;;  %4112 = vmatprep.subr.bf16.mxu0 %v4111_v57  ;;  %v934_v5 = vld [vmem:[%s6197_s17 + $0x11c0] sm:$0xff] }
  0xcb   : > { %v4115_v3 = vpack.c.bf16 %v935_v0, %v927_v63  ;;  %v495_v6 = vld [vmem:[%s6197_s17 + $0x408] sm:$0xff]  ;;  %v494_v11 = vld [vmem:[%s6197_s17 + $0x400] sm:$0xff]  ;;  %v4117_v13 = vpack.c.bf16 %v934_v5, %v926_v4 }
  0xcc   : > { %3998 = vmatpush1.bf16.msra.mxu1 %v3997_v47  ;;  %v503_v7 = vld [vmem:[%s6197_s17 + $0x448] sm:$0xff]  ;;  %v502_v12 = vld [vmem:[%s6197_s17 + $0x440] sm:$0xff]  ;;  %4114 = vmatpush1.bf16.msra.mxu0 %v4113_v62 }
  0xcd   : > { %4000 = vmatprep.subr.bf16.mxu1 %v3999_v52  ;;  %v943_v8 = vld [vmem:[%s6197_s17 + $0x1208] sm:$0xff]  ;;  %v4007_v15 = vpack.c.bf16 %v503_v7, %v495_v6  ;;  %4116 = vmatprep.subr.bf16.mxu0 %v4115_v3  ;;  %v942_v18 = vld [vmem:[%s6197_s17 + $0x1200] sm:$0xff]  ;;  %v4009_v23 = vpack.c.bf16 %v502_v12, %v494_v11 }
  0xce   : > { %v951_v9 = vld [vmem:[%s6197_s17 + $0x1248] sm:$0xff]  ;;  %v950_v19 = vld [vmem:[%s6197_s17 + $0x1240] sm:$0xff] }
  0xcf   : > { %v511_v16 = vld [vmem:[%s6197_s17 + $0x488] sm:$0xff]  ;;  %v4119_v17 = vpack.c.bf16 %v951_v9, %v943_v8  ;;  %v510_v24 = vld [vmem:[%s6197_s17 + $0x480] sm:$0xff]  ;;  %v4121_v26 = vpack.c.bf16 %v950_v19, %v942_v18 }
  0xd0   : > { %4002 = vmatpush1.bf16.msra.mxu1 %v4001_v60  ;;  %v519_v20 = vld [vmem:[%s6197_s17 + $0x4c8] sm:$0xff]  ;;  %v518_v25 = vld [vmem:[%s6197_s17 + $0x4c0] sm:$0xff]  ;;  %4118 = vmatpush1.bf16.msra.mxu0 %v4117_v13 }
  0xd1   : > { %4004 = vmatprep.subr.bf16.mxu1 %v4003_v1  ;;  %v959_v21 = vld [vmem:[%s6197_s17 + $0x1288] sm:$0xff]  ;;  %v4011_v27 = vpack.c.bf16 %v519_v20, %v511_v16  ;;  %4120 = vmatprep.subr.bf16.mxu0 %v4119_v17  ;;  %v958_v30 = vld [vmem:[%s6197_s17 + $0x1280] sm:$0xff]  ;;  %v4013_v35 = vpack.c.bf16 %v518_v25, %v510_v24 }
  0xd2   : > { %v967_v22 = vld [vmem:[%s6197_s17 + $0x12c8] sm:$0xff]  ;;  %v966_v31 = vld [vmem:[%s6197_s17 + $0x12c0] sm:$0xff] }
  0xd3   : > { %v527_v28 = vld [vmem:[%s6197_s17 + $0x508] sm:$0xff]  ;;  %v4123_v29 = vpack.c.bf16 %v967_v22, %v959_v21  ;;  %v526_v36 = vld [vmem:[%s6197_s17 + $0x500] sm:$0xff]  ;;  %v4125_v38 = vpack.c.bf16 %v966_v31, %v958_v30 }
  0xd4   : > { %4006 = vmatpush1.bf16.msra.mxu1 %v4005_v10  ;;  %v535_v32 = vld [vmem:[%s6197_s17 + $0x548] sm:$0xff]  ;;  %v534_v37 = vld [vmem:[%s6197_s17 + $0x540] sm:$0xff]  ;;  %4122 = vmatpush1.bf16.msra.mxu0 %v4121_v26 }
  0xd5   : > { %4008 = vmatprep.subr.bf16.mxu1 %v4007_v15  ;;  %v975_v33 = vld [vmem:[%s6197_s17 + $0x1308] sm:$0xff]  ;;  %v4015_v39 = vpack.c.bf16 %v535_v32, %v527_v28  ;;  %4124 = vmatprep.subr.bf16.mxu0 %v4123_v29  ;;  %v974_v42 = vld [vmem:[%s6197_s17 + $0x1300] sm:$0xff]  ;;  %v4017_v47 = vpack.c.bf16 %v534_v37, %v526_v36 }
  0xd6   : > { %v983_v34 = vld [vmem:[%s6197_s17 + $0x1348] sm:$0xff]  ;;  %v982_v43 = vld [vmem:[%s6197_s17 + $0x1340] sm:$0xff] }
  0xd7   : > { %v543_v40 = vld [vmem:[%s6197_s17 + $0x588] sm:$0xff]  ;;  %v4127_v41 = vpack.c.bf16 %v983_v34, %v975_v33  ;;  %v542_v48 = vld [vmem:[%s6197_s17 + $0x580] sm:$0xff]  ;;  %v4129_v50 = vpack.c.bf16 %v982_v43, %v974_v42 }
  0xd8   : > { %4010 = vmatpush1.bf16.msra.mxu1 %v4009_v23  ;;  %v551_v44 = vld [vmem:[%s6197_s17 + $0x5c8] sm:$0xff]  ;;  %v550_v49 = vld [vmem:[%s6197_s17 + $0x5c0] sm:$0xff]  ;;  %4126 = vmatpush1.bf16.msra.mxu0 %v4125_v38 }
  0xd9   : > { %4012 = vmatprep.subr.bf16.mxu1 %v4011_v27  ;;  %v991_v45 = vld [vmem:[%s6197_s17 + $0x1388] sm:$0xff]  ;;  %v4019_v51 = vpack.c.bf16 %v551_v44, %v543_v40  ;;  %4128 = vmatprep.subr.bf16.mxu0 %v4127_v41  ;;  %v990_v54 = vld [vmem:[%s6197_s17 + $0x1380] sm:$0xff]  ;;  %v4021_v59 = vpack.c.bf16 %v550_v49, %v542_v48  ;;  %v365_v44 = vld [vmem:[#allocation3 + $0x28] sm:$0xff] }
  0xda   : > { %v999_v46 = vld [vmem:[%s6197_s17 + $0x13c8] sm:$0xff]  ;;  %v998_v55 = vld [vmem:[%s6197_s17 + $0x13c0] sm:$0xff]  ;;  %1382 = vmatprep.mubr.f32.mxu0 %v365_v44 }
  0xdb   : > { %v559_v52 = vld [vmem:[%s6197_s17 + $0x608] sm:$0xff]  ;;  %v4131_v53 = vpack.c.bf16 %v999_v46, %v991_v45  ;;  %v558_v60 = vld [vmem:[%s6197_s17 + $0x600] sm:$0xff]  ;;  %v4133_v62 = vpack.c.bf16 %v998_v55, %v990_v54 }
  0xdc   : > { %4014 = vmatpush1.bf16.msra.mxu1 %v4013_v35  ;;  %v567_v56 = vld [vmem:[%s6197_s17 + $0x648] sm:$0xff]  ;;  %v566_v61 = vld [vmem:[%s6197_s17 + $0x640] sm:$0xff]  ;;  %4130 = vmatpush1.bf16.msra.mxu0 %v4129_v50 }
  0xdd   : > { %4016 = vmatprep.subr.bf16.mxu1 %v4015_v39  ;;  %v1007_v57 = vld [vmem:[%s6197_s17 + $0x1408] sm:$0xff]  ;;  %v4023_v63 = vpack.c.bf16 %v567_v56, %v559_v52  ;;  %4132 = vmatprep.subr.bf16.mxu0 %v4131_v53  ;;  %v1006_v2 = vld [vmem:[%s6197_s17 + $0x1400] sm:$0xff]  ;;  %v4025_v7 = vpack.c.bf16 %v566_v61, %v558_v60 }
  0xde   : > { %v1015_v58 = vld [vmem:[%s6197_s17 + $0x1448] sm:$0xff]  ;;  %v1014_v3 = vld [vmem:[%s6197_s17 + $0x1440] sm:$0xff] }
  0xdf   : > { %v575_v0 = vld [vmem:[%s6197_s17 + $0x688] sm:$0xff]  ;;  %v4135_v1 = vpack.c.bf16 %v1015_v58, %v1007_v57  ;;  %v574_v8 = vld [vmem:[%s6197_s17 + $0x680] sm:$0xff]  ;;  %v4137_v10 = vpack.c.bf16 %v1014_v3, %v1006_v2  ;;  %v6342_v57 = vld [vmem:[#allocation3] sm:$0xff] }
  0xe0   : > { %4018 = vmatpush1.bf16.msra.mxu1 %v4017_v47  ;;  %v583_v4 = vld [vmem:[%s6197_s17 + $0x6c8] sm:$0xff]  ;;  %v582_v9 = vld [vmem:[%s6197_s17 + $0x6c0] sm:$0xff]  ;;  %4134 = vmatpush1.bf16.msra.mxu0 %v4133_v62 }
  0xe1   : > { %4020 = vmatprep.subr.bf16.mxu1 %v4019_v51  ;;  %v1023_v5 = vld [vmem:[%s6197_s17 + $0x1488] sm:$0xff]  ;;  %v4027_v11 = vpack.c.bf16 %v583_v4, %v575_v0  ;;  %4136 = vmatprep.subr.bf16.mxu0 %v4135_v1  ;;  %v1022_v15 = vld [vmem:[%s6197_s17 + $0x1480] sm:$0xff]  ;;  %v4029_v20 = vpack.c.bf16 %v582_v9, %v574_v8 }
  0xe2   : > { %v1031_v6 = vld [vmem:[%s6197_s17 + $0x14c8] sm:$0xff]  ;;  %v1030_v16 = vld [vmem:[%s6197_s17 + $0x14c0] sm:$0xff] }
  0xe3   : > { %v591_v12 = vld [vmem:[%s6197_s17 + $0x708] sm:$0xff]  ;;  %v4139_v13 = vpack.c.bf16 %v1031_v6, %v1023_v5  ;;  %v590_v21 = vld [vmem:[%s6197_s17 + $0x700] sm:$0xff]  ;;  %v4141_v23 = vpack.c.bf16 %v1030_v16, %v1022_v15 }
  0xe4   : > { %4022 = vmatpush1.bf16.msra.mxu1 %v4021_v59  ;;  %v599_v17 = vld [vmem:[%s6197_s17 + $0x748] sm:$0xff]  ;;  %v598_v22 = vld [vmem:[%s6197_s17 + $0x740] sm:$0xff]  ;;  %4138 = vmatpush1.bf16.msra.mxu0 %v4137_v10 }
  0xe5   : > { %4024 = vmatprep.subr.bf16.mxu1 %v4023_v63  ;;  %v1039_v18 = vld [vmem:[%s6197_s17 + $0x1508] sm:$0xff]  ;;  %v4031_v24 = vpack.c.bf16 %v599_v17, %v591_v12  ;;  %4140 = vmatprep.subr.bf16.mxu0 %v4139_v13  ;;  %v1038_v27 = vld [vmem:[%s6197_s17 + $0x1500] sm:$0xff]  ;;  %v4033_v32 = vpack.c.bf16 %v598_v22, %v590_v21 }
  0xe6   : > { %v1047_v19 = vld [vmem:[%s6197_s17 + $0x1548] sm:$0xff]  ;;  %v1046_v28 = vld [vmem:[%s6197_s17 + $0x1540] sm:$0xff] }
  0xe7   : > { %v607_v25 = vld [vmem:[%s6197_s17 + $0x788] sm:$0xff]  ;;  %v4143_v26 = vpack.c.bf16 %v1047_v19, %v1039_v18  ;;  %v606_v33 = vld [vmem:[%s6197_s17 + $0x780] sm:$0xff]  ;;  %v4145_v35 = vpack.c.bf16 %v1046_v28, %v1038_v27 }
  0xe8   : > { %4026 = vmatpush1.bf16.msra.mxu1 %v4025_v7  ;;  %v615_v29 = vld [vmem:[%s6197_s17 + $0x7c8] sm:$0xff]  ;;  %v614_v34 = vld [vmem:[%s6197_s17 + $0x7c0] sm:$0xff]  ;;  %4142 = vmatpush1.bf16.msra.mxu0 %v4141_v23 }
  0xe9   : > { %4028 = vmatprep.subr.bf16.mxu1 %v4027_v11  ;;  %v1055_v30 = vld [vmem:[%s6197_s17 + $0x1588] sm:$0xff]  ;;  %v4035_v36 = vpack.c.bf16 %v615_v29, %v607_v25  ;;  %4144 = vmatprep.subr.bf16.mxu0 %v4143_v26  ;;  %v1054_v39 = vld [vmem:[%s6197_s17 + $0x1580] sm:$0xff]  ;;  %v4037_v45 = vpack.c.bf16 %v614_v34, %v606_v33 }
  0xea   : > { %v1063_v31 = vld [vmem:[%s6197_s17 + $0x15c8] sm:$0xff]  ;;  %v1062_v40 = vld [vmem:[%s6197_s17 + $0x15c0] sm:$0xff] }
  0xeb   : > { %v623_v37 = vld [vmem:[%s6197_s17 + $0x808] sm:$0xff]  ;;  %v4147_v38 = vpack.c.bf16 %v1063_v31, %v1055_v30  ;;  %v622_v46 = vld [vmem:[%s6197_s17 + $0x800] sm:$0xff]  ;;  %v4149_v48 = vpack.c.bf16 %v1062_v40, %v1054_v39 }
  0xec   : > { %4030 = vmatpush1.bf16.msra.mxu1 %v4029_v20  ;;  %v631_v41 = vld [vmem:[%s6197_s17 + $0x848] sm:$0xff]  ;;  %v630_v47 = vld [vmem:[%s6197_s17 + $0x840] sm:$0xff]  ;;  %4146 = vmatpush1.bf16.msra.mxu0 %v4145_v35 }
  0xed   : > { %4032 = vmatprep.subr.bf16.mxu1 %v4031_v24  ;;  %v1071_v42 = vld [vmem:[%s6197_s17 + $0x1608] sm:$0xff]  ;;  %v4039_v49 = vpack.c.bf16 %v631_v41, %v623_v37  ;;  %4148 = vmatprep.subr.bf16.mxu0 %v4147_v38  ;;  %v1070_v52 = vld [vmem:[%s6197_s17 + $0x1600] sm:$0xff]  ;;  %v4041_v58 = vpack.c.bf16 %v630_v47, %v622_v46  ;;  %v364_v47 = vld [vmem:[#allocation3 + $0x20] sm:$0xff] }
  0xee   : > { %v1079_v43 = vld [vmem:[%s6197_s17 + $0x1648] sm:$0xff]  ;;  %v1078_v53 = vld [vmem:[%s6197_s17 + $0x1640] sm:$0xff] }
  0xef   : > { %v639_v50 = vld [vmem:[%s6197_s17 + $0x888] sm:$0xff]  ;;  %v4151_v51 = vpack.c.bf16 %v1079_v43, %v1071_v42  ;;  %v638_v59 = vld [vmem:[%s6197_s17 + $0x880] sm:$0xff]  ;;  %v4153_v61 = vpack.c.bf16 %v1078_v53, %v1070_v52 }
  0xf0   : > { %4034 = vmatpush1.bf16.msra.mxu1 %v4033_v32  ;;  %v647_v54 = vld [vmem:[%s6197_s17 + $0x8c8] sm:$0xff]  ;;  %v646_v60 = vld [vmem:[%s6197_s17 + $0x8c0] sm:$0xff]  ;;  %4150 = vmatpush1.bf16.msra.mxu0 %v4149_v48 }
  0xf1   : > { %4036 = vmatprep.subr.bf16.mxu1 %v4035_v36  ;;  %v1087_v55 = vld [vmem:[%s6197_s17 + $0x1688] sm:$0xff]  ;;  %v4043_v62 = vpack.c.bf16 %v647_v54, %v639_v50  ;;  %4152 = vmatprep.subr.bf16.mxu0 %v4151_v51  ;;  %v1086_v1 = vld [vmem:[%s6197_s17 + $0x1680] sm:$0xff]  ;;  %v4045_v6 = vpack.c.bf16 %v646_v60, %v638_v59 }
  0xf2   : > { %v1095_v56 = vld [vmem:[%s6197_s17 + $0x16c8] sm:$0xff]  ;;  %v1094_v2 = vld [vmem:[%s6197_s17 + $0x16c0] sm:$0xff] }
  0xf3   : > { %v655_v63 = vld [vmem:[%s6197_s17 + $0x908] sm:$0xff]  ;;  %v4155_v0 = vpack.c.bf16 %v1095_v56, %v1087_v55  ;;  %v654_v7 = vld [vmem:[%s6197_s17 + $0x900] sm:$0xff]  ;;  %v4157_v9 = vpack.c.bf16 %v1094_v2, %v1086_v1 }
  0xf4   : > { %4038 = vmatpush1.bf16.msra.mxu1 %v4037_v45  ;;  %v663_v3 = vld [vmem:[%s6197_s17 + $0x948] sm:$0xff]  ;;  %v662_v8 = vld [vmem:[%s6197_s17 + $0x940] sm:$0xff]  ;;  %4154 = vmatpush1.bf16.msra.mxu0 %v4153_v61 }
  0xf5   : > { %4040 = vmatprep.subr.bf16.mxu1 %v4039_v49  ;;  %v1103_v4 = vld [vmem:[%s6197_s17 + $0x1708] sm:$0xff]  ;;  %v4047_v10 = vpack.c.bf16 %v663_v3, %v655_v63  ;;  %4156 = vmatprep.subr.bf16.mxu0 %v4155_v0  ;;  %v1102_v13 = vld [vmem:[%s6197_s17 + $0x1700] sm:$0xff]  ;;  %v4049_v19 = vpack.c.bf16 %v662_v8, %v654_v7 }
  0xf6   : > { %v1111_v5 = vld [vmem:[%s6197_s17 + $0x1748] sm:$0xff]  ;;  %v1110_v15 = vld [vmem:[%s6197_s17 + $0x1740] sm:$0xff] }
  0xf7   : > { %1241 = vmatmul.mubr.f32.vlgmr.msra.gmra.mrb[0].mxu1 %v6342_v57  ;;  %v671_v11 = vld [vmem:[%s6197_s17 + $0x988] sm:$0xff]  ;;  %v4159_v12 = vpack.c.bf16 %v1111_v5, %v1103_v4  ;;  %v670_v20 = vld [vmem:[%s6197_s17 + $0x980] sm:$0xff]  ;;  %v4161_v22 = vpack.c.bf16 %v1110_v15, %v1102_v13 }
  0xf8   : > { %4042 = vmatpush1.bf16.msra.mxu1 %v4041_v58  ;;  %v679_v16 = vld [vmem:[%s6197_s17 + $0x9c8] sm:$0xff]  ;;  %v678_v21 = vld [vmem:[%s6197_s17 + $0x9c0] sm:$0xff]  ;;  %4158 = vmatpush1.bf16.msra.mxu0 %v4157_v9 }
  0xf9   : > { %4044 = vmatprep.subr.bf16.mxu1 %v4043_v62  ;;  %v1119_v17 = vld [vmem:[%s6197_s17 + $0x1788] sm:$0xff]  ;;  %v4051_v24 = vpack.c.bf16 %v679_v16, %v671_v11  ;;  %4160 = vmatprep.subr.bf16.mxu0 %v4159_v12  ;;  %v1118_v27 = vld [vmem:[%s6197_s17 + $0x1780] sm:$0xff]  ;;  %v4053_v32 = vpack.c.bf16 %v678_v21, %v670_v20 }
  0xfa   : > { %v1127_v18 = vld [vmem:[%s6197_s17 + $0x17c8] sm:$0xff]  ;;  %v1126_v28 = vld [vmem:[%s6197_s17 + $0x17c0] sm:$0xff] }
  0xfb   : > { %v6363_v23 = vld [vmem:[#allocation3 + $0x18] sm:$0xff]  ;;  %v4163_v26 = vpack.c.bf16 %v1127_v18, %v1119_v17  ;;  %v686_v33 = vld [vmem:[%s6197_s17 + $0xa00] sm:$0xff]  ;;  %v4165_v35 = vpack.c.bf16 %v1126_v28, %v1118_v27 }
  0xfc   : > { %4046 = vmatpush1.bf16.msra.mxu1 %v4045_v6  ;;  %v687_v25 = vld [vmem:[%s6197_s17 + $0xa08] sm:$0xff]  ;;  %1311 = vmatprep.mubr.f32.mxu1 %v6363_v23  ;;  %v694_v34 = vld [vmem:[%s6197_s17 + $0xa40] sm:$0xff] }
  0xfd   : > { %4048 = vmatprep.subr.bf16.mxu1 %v4047_v10  ;;  %v695_v29 = vld [vmem:[%s6197_s17 + $0xa48] sm:$0xff]  ;;  %4162 = vmatpush1.bf16.msra.mxu0 %v4161_v22  ;;  %v370_v39 = vld [vmem:[%s6197_s17 + $0x20] sm:$0xff]  ;;  %v4057_v44 = vpack.c.bf16 %v694_v34, %v686_v33 }
  0xfe   : > { %v371_v30 = vld [vmem:[%s6197_s17 + $0x28] sm:$0xff]  ;;  %v4055_v36 = vpack.c.bf16 %v695_v29, %v687_v25  ;;  %4164 = vmatprep.subr.bf16.mxu0 %v4163_v26  ;;  %v378_v40 = vld [vmem:[%s6197_s17 + $0x60] sm:$0xff] }
  0xff   : > { %v379_v31 = vld [vmem:[%s6197_s17 + $0x68] sm:$0xff]  ;;  %v702_v45 = vld [vmem:[%s6197_s17 + $0xa80] sm:$0xff]  ;;  %v4361_v48 = vpack.c.bf16 %v378_v40, %v370_v39 }
 0x100   : > { %4050 = vmatpush1.bf16.msra.mxu1 %v4049_v19  ;;  %v703_v37 = vld [vmem:[%s6197_s17 + $0xa88] sm:$0xff]  ;;  %v4359_v38 = vpack.c.bf16 %v379_v31, %v371_v30  ;;  %v710_v46 = vld [vmem:[%s6197_s17 + $0xac0] sm:$0xff] }
 0x101   : > { %4052 = vmatprep.subr.bf16.mxu1 %v4051_v24  ;;  %v711_v41 = vld [vmem:[%s6197_s17 + $0xac8] sm:$0xff]  ;;  %4166 = vmatpush1.bf16.msra.mxu0 %v4165_v35  ;;  %v386_v52 = vld [vmem:[%s6197_s17 + $0xa0] sm:$0xff]  ;;  %v4061_v58 = vpack.c.bf16 %v710_v46, %v702_v45 }
 0x102   : > { %v387_v42 = vld [vmem:[%s6197_s17 + $0xa8] sm:$0xff]  ;;  %v4059_v49 = vpack.c.bf16 %v711_v41, %v703_v37  ;;  %4360 = vmatprep.subr.bf16.mxu0 %v4359_v38  ;;  %v394_v53 = vld [vmem:[%s6197_s17 + $0xe0] sm:$0xff] }
 0x103   : > { %v395_v43 = vld [vmem:[%s6197_s17 + $0xe8] sm:$0xff]  ;;  %v718_v59 = vld [vmem:[%s6197_s17 + $0xb00] sm:$0xff]  ;;  %v4365_v61 = vpack.c.bf16 %v394_v53, %v386_v52 }
 0x104   : > { %4054 = vmatpush1.bf16.msra.mxu1 %v4053_v32  ;;  %v719_v50 = vld [vmem:[%s6197_s17 + $0xb08] sm:$0xff]  ;;  %v4363_v51 = vpack.c.bf16 %v395_v43, %v387_v42  ;;  %1383 = vmatmul.mubr.f32.vlgmr.msra.gmra.mrb[0].mxu0 %v364_v47  ;;  %v726_v60 = vld [vmem:[%s6197_s17 + $0xb40] sm:$0xff] }
 0x105   : > { %4056 = vmatprep.subr.bf16.mxu1 %v4055_v36  ;;  %v727_v54 = vld [vmem:[%s6197_s17 + $0xb48] sm:$0xff]  ;;  %4362 = vmatpush1.bf16.msra.mxu0 %v4361_v48  ;;  %v402_v1 = vld [vmem:[%s6197_s17 + $0x120] sm:$0xff]  ;;  %v4065_v6 = vpack.c.bf16 %v726_v60, %v718_v59 }
 0x106   : > { %v403_v55 = vld [vmem:[%s6197_s17 + $0x128] sm:$0xff]  ;;  %v4063_v62 = vpack.c.bf16 %v727_v54, %v719_v50  ;;  %4364 = vmatprep.subr.bf16.mxu0 %v4363_v51  ;;  %v410_v2 = vld [vmem:[%s6197_s17 + $0x160] sm:$0xff]  ;;  %1666 = vmatprep.mubr.f32.mxu0 %v6269_v14 }
 0x107   : > { %v411_v56 = vld [vmem:[%s6197_s17 + $0x168] sm:$0xff]  ;;  %v734_v7 = vld [vmem:[%s6197_s17 + $0xb80] sm:$0xff]  ;;  %v4369_v9 = vpack.c.bf16 %v410_v2, %v402_v1 }
 0x108   : > { %4058 = vmatpush1.bf16.msra.mxu1 %v4057_v44  ;;  %v735_v63 = vld [vmem:[%s6197_s17 + $0xb88] sm:$0xff]  ;;  %v4367_v0 = vpack.c.bf16 %v411_v56, %v403_v55  ;;  %v742_v8 = vld [vmem:[%s6197_s17 + $0xbc0] sm:$0xff] }
 0x109   : > { %4060 = vmatprep.subr.bf16.mxu1 %v4059_v49  ;;  %v743_v3 = vld [vmem:[%s6197_s17 + $0xbc8] sm:$0xff]  ;;  %4366 = vmatpush1.bf16.msra.mxu0 %v4365_v61  ;;  %v418_v13 = vld [vmem:[%s6197_s17 + $0x1a0] sm:$0xff]  ;;  %v4069_v19 = vpack.c.bf16 %v742_v8, %v734_v7 }
 0x10a   : > { %v419_v4 = vld [vmem:[%s6197_s17 + $0x1a8] sm:$0xff]  ;;  %v4067_v10 = vpack.c.bf16 %v743_v3, %v735_v63  ;;  %4368 = vmatprep.subr.bf16.mxu0 %v4367_v0  ;;  %v426_v15 = vld [vmem:[%s6197_s17 + $0x1e0] sm:$0xff] }
 0x10b   : > { %v427_v5 = vld [vmem:[%s6197_s17 + $0x1e8] sm:$0xff]  ;;  %v750_v20 = vld [vmem:[%s6197_s17 + $0xc00] sm:$0xff]  ;;  %v4373_v22 = vpack.c.bf16 %v426_v15, %v418_v13 }
 0x10c   : > { %4062 = vmatpush1.bf16.msra.mxu1 %v4061_v58  ;;  %v751_v11 = vld [vmem:[%s6197_s17 + $0xc08] sm:$0xff]  ;;  %v4371_v12 = vpack.c.bf16 %v427_v5, %v419_v4  ;;  %v758_v21 = vld [vmem:[%s6197_s17 + $0xc40] sm:$0xff] }
 0x10d   : > { %4064 = vmatprep.subr.bf16.mxu1 %v4063_v62  ;;  %v759_v16 = vld [vmem:[%s6197_s17 + $0xc48] sm:$0xff]  ;;  %4370 = vmatpush1.bf16.msra.mxu0 %v4369_v9  ;;  %v434_v27 = vld [vmem:[%s6197_s17 + $0x220] sm:$0xff]  ;;  %v4073_v32 = vpack.c.bf16 %v758_v21, %v750_v20 }
 0x10e   : > { %v435_v17 = vld [vmem:[%s6197_s17 + $0x228] sm:$0xff]  ;;  %v4071_v24 = vpack.c.bf16 %v759_v16, %v751_v11  ;;  %4372 = vmatprep.subr.bf16.mxu0 %v4371_v12  ;;  %v442_v28 = vld [vmem:[%s6197_s17 + $0x260] sm:$0xff] }
 0x10f   : > { %v443_v18 = vld [vmem:[%s6197_s17 + $0x268] sm:$0xff]  ;;  %v766_v33 = vld [vmem:[%s6197_s17 + $0xc80] sm:$0xff]  ;;  %v4377_v35 = vpack.c.bf16 %v442_v28, %v434_v27 }
 0x110   : > { %4066 = vmatpush1.bf16.msra.mxu1 %v4065_v6  ;;  %v767_v25 = vld [vmem:[%s6197_s17 + $0xc88] sm:$0xff]  ;;  %v4375_v26 = vpack.c.bf16 %v443_v18, %v435_v17  ;;  %v774_v34 = vld [vmem:[%s6197_s17 + $0xcc0] sm:$0xff] }
 0x111   : > { %4068 = vmatprep.subr.bf16.mxu1 %v4067_v10  ;;  %v775_v29 = vld [vmem:[%s6197_s17 + $0xcc8] sm:$0xff]  ;;  %4374 = vmatpush1.bf16.msra.mxu0 %v4373_v22  ;;  %v450_v39 = vld [vmem:[%s6197_s17 + $0x2a0] sm:$0xff]  ;;  %v4077_v44 = vpack.c.bf16 %v774_v34, %v766_v33 }
 0x112   : > { %v451_v30 = vld [vmem:[%s6197_s17 + $0x2a8] sm:$0xff]  ;;  %v4075_v36 = vpack.c.bf16 %v775_v29, %v767_v25  ;;  %4376 = vmatprep.subr.bf16.mxu0 %v4375_v26  ;;  %v458_v40 = vld [vmem:[%s6197_s17 + $0x2e0] sm:$0xff] }
 0x113   : > { %v459_v31 = vld [vmem:[%s6197_s17 + $0x2e8] sm:$0xff]  ;;  %v782_v45 = vld [vmem:[%s6197_s17 + $0xd00] sm:$0xff]  ;;  %v4381_v47 = vpack.c.bf16 %v458_v40, %v450_v39 }
 0x114   : > { %4070 = vmatpush1.bf16.msra.mxu1 %v4069_v19  ;;  %v783_v37 = vld [vmem:[%s6197_s17 + $0xd08] sm:$0xff]  ;;  %v4379_v38 = vpack.c.bf16 %v459_v31, %v451_v30  ;;  %v790_v46 = vld [vmem:[%s6197_s17 + $0xd40] sm:$0xff] }
 0x115   : > { %4072 = vmatprep.subr.bf16.mxu1 %v4071_v24  ;;  %v791_v41 = vld [vmem:[%s6197_s17 + $0xd48] sm:$0xff]  ;;  %4378 = vmatpush1.bf16.msra.mxu0 %v4377_v35  ;;  %v466_v51 = vld [vmem:[%s6197_s17 + $0x320] sm:$0xff]  ;;  %v4081_v56 = vpack.c.bf16 %v790_v46, %v782_v45 }
 0x116   : > { %v467_v42 = vld [vmem:[%s6197_s17 + $0x328] sm:$0xff]  ;;  %v4079_v48 = vpack.c.bf16 %v791_v41, %v783_v37  ;;  %4380 = vmatprep.subr.bf16.mxu0 %v4379_v38  ;;  %v474_v52 = vld [vmem:[%s6197_s17 + $0x360] sm:$0xff] }
 0x117   : > { %v475_v43 = vld [vmem:[%s6197_s17 + $0x368] sm:$0xff]  ;;  %v798_v58 = vld [vmem:[%s6197_s17 + $0xd80] sm:$0xff]  ;;  %v4385_v60 = vpack.c.bf16 %v474_v52, %v466_v51  ;;  %v377_v52 = vld [vmem:[%s6197_s17 + $0x58] sm:$0xff] }
 0x118   : > { %4074 = vmatpush1.bf16.msra.mxu1 %v4073_v32  ;;  %v799_v49 = vld [vmem:[%s6197_s17 + $0xd88] sm:$0xff]  ;;  %v4383_v50 = vpack.c.bf16 %v475_v43, %v467_v42  ;;  %v806_v59 = vld [vmem:[%s6197_s17 + $0xdc0] sm:$0xff] }
 0x119   : > { %4076 = vmatprep.subr.bf16.mxu1 %v4075_v36  ;;  %v807_v53 = vld [vmem:[%s6197_s17 + $0xdc8] sm:$0xff]  ;;  %4382 = vmatpush1.bf16.msra.mxu0 %v4381_v47  ;;  %v482_v0 = vld [vmem:[%s6197_s17 + $0x3a0] sm:$0xff]  ;;  %v4085_v5 = vpack.c.bf16 %v806_v59, %v798_v58  ;;  %v376_v58 = vld [vmem:[%s6197_s17 + $0x50] sm:$0xff] }
 0x11a   : > { %v483_v54 = vld [vmem:[%s6197_s17 + $0x3a8] sm:$0xff]  ;;  %v4083_v61 = vpack.c.bf16 %v807_v53, %v799_v49  ;;  %4384 = vmatprep.subr.bf16.mxu0 %v4383_v50  ;;  %v490_v1 = vld [vmem:[%s6197_s17 + $0x3e0] sm:$0xff] }
 0x11b   : > { %v491_v55 = vld [vmem:[%s6197_s17 + $0x3e8] sm:$0xff]  ;;  %v814_v6 = vld [vmem:[%s6197_s17 + $0xe00] sm:$0xff]  ;;  %v4389_v8 = vpack.c.bf16 %v490_v1, %v482_v0  ;;  %v393_v1 = vld [vmem:[%s6197_s17 + $0xd8] sm:$0xff] }
 0x11c   : > { %4078 = vmatpush1.bf16.msra.mxu1 %v4077_v44  ;;  %v815_v62 = vld [vmem:[%s6197_s17 + $0xe08] sm:$0xff]  ;;  %v4387_v63 = vpack.c.bf16 %v491_v55, %v483_v54  ;;  %v822_v7 = vld [vmem:[%s6197_s17 + $0xe40] sm:$0xff] }
 0x11d   : > { %4080 = vmatprep.subr.bf16.mxu1 %v4079_v48  ;;  %v823_v2 = vld [vmem:[%s6197_s17 + $0xe48] sm:$0xff]  ;;  %4386 = vmatpush1.bf16.msra.mxu0 %v4385_v60  ;;  %v498_v12 = vld [vmem:[%s6197_s17 + $0x420] sm:$0xff]  ;;  %v4089_v18 = vpack.c.bf16 %v822_v7, %v814_v6  ;;  %v369_v48 = vld [vmem:[%s6197_s17 + $0x18] sm:$0xff] }
 0x11e   : > { %v499_v3 = vld [vmem:[%s6197_s17 + $0x428] sm:$0xff]  ;;  %v4087_v9 = vpack.c.bf16 %v823_v2, %v815_v62  ;;  %4388 = vmatprep.subr.bf16.mxu0 %v4387_v63  ;;  %v506_v13 = vld [vmem:[%s6197_s17 + $0x460] sm:$0xff]  ;;  %v4167_v60 = vpack.c.bf16 %v377_v52, %v369_v48  ;;  %v384_v6 = vld [vmem:[%s6197_s17 + $0x90] sm:$0xff] }
 0x11f   : > { %v507_v4 = vld [vmem:[%s6197_s17 + $0x468] sm:$0xff]  ;;  %v830_v19 = vld [vmem:[%s6197_s17 + $0xe80] sm:$0xff]  ;;  %v4393_v21 = vpack.c.bf16 %v506_v13, %v498_v12  ;;  %v392_v7 = vld [vmem:[%s6197_s17 + $0xd0] sm:$0xff] }
 0x120   : > { %4082 = vmatpush1.bf16.msra.mxu1 %v4081_v56  ;;  %v831_v10 = vld [vmem:[%s6197_s17 + $0xe88] sm:$0xff]  ;;  %v4391_v11 = vpack.c.bf16 %v507_v4, %v499_v3  ;;  %v838_v20 = vld [vmem:[%s6197_s17 + $0xec0] sm:$0xff]  ;;  %v368_v56 = vld [vmem:[%s6197_s17 + $0x10] sm:$0xff] }
 0x121   : > { %4084 = vmatprep.subr.bf16.mxu1 %v4083_v61  ;;  %v839_v15 = vld [vmem:[%s6197_s17 + $0xec8] sm:$0xff]  ;;  %4390 = vmatpush1.bf16.msra.mxu0 %v4389_v8  ;;  %v514_v26 = vld [vmem:[%s6197_s17 + $0x4a0] sm:$0xff]  ;;  %v4093_v31 = vpack.c.bf16 %v838_v20, %v830_v19  ;;  %v385_v61 = vld [vmem:[%s6197_s17 + $0x98] sm:$0xff] }
 0x122   : > { %v515_v16 = vld [vmem:[%s6197_s17 + $0x4a8] sm:$0xff]  ;;  %v4091_v22 = vpack.c.bf16 %v839_v15, %v831_v10  ;;  %4392 = vmatprep.subr.bf16.mxu0 %v4391_v11  ;;  %v522_v27 = vld [vmem:[%s6197_s17 + $0x4e0] sm:$0xff]  ;;  %v401_v10 = vld [vmem:[%s6197_s17 + $0x118] sm:$0xff] }
 0x123   : > { %v523_v17 = vld [vmem:[%s6197_s17 + $0x4e8] sm:$0xff]  ;;  %v846_v32 = vld [vmem:[%s6197_s17 + $0xf00] sm:$0xff]  ;;  %v4397_v34 = vpack.c.bf16 %v522_v27, %v514_v26  ;;  %v409_v15 = vld [vmem:[%s6197_s17 + $0x158] sm:$0xff] }
 0x124   : > { %4086 = vmatpush1.bf16.msra.mxu1 %v4085_v5  ;;  %v847_v24 = vld [vmem:[%s6197_s17 + $0xf08] sm:$0xff]  ;;  %v4395_v25 = vpack.c.bf16 %v523_v17, %v515_v16  ;;  %v854_v33 = vld [vmem:[%s6197_s17 + $0xf40] sm:$0xff]  ;;  %v4169_v5 = vpack.c.bf16 %v376_v58, %v368_v56  ;;  %v400_v19 = vld [vmem:[%s6197_s17 + $0x110] sm:$0xff] }
 0x125   : > { %4088 = vmatprep.subr.bf16.mxu1 %v4087_v9  ;;  %v855_v28 = vld [vmem:[%s6197_s17 + $0xf48] sm:$0xff]  ;;  %4394 = vmatpush1.bf16.msra.mxu0 %v4393_v21  ;;  %v530_v38 = vld [vmem:[%s6197_s17 + $0x520] sm:$0xff]  ;;  %v4097_v43 = vpack.c.bf16 %v854_v33, %v846_v32  ;;  %v4171_v9 = vpack.c.bf16 %v393_v1, %v385_v61  ;;  %v408_v20 = vld [vmem:[%s6197_s17 + $0x150] sm:$0xff] }
 0x126   : > { %v531_v29 = vld [vmem:[%s6197_s17 + $0x528] sm:$0xff]  ;;  %v4095_v35 = vpack.c.bf16 %v855_v28, %v847_v24  ;;  %4396 = vmatprep.subr.bf16.mxu0 %v4395_v25  ;;  %v538_v39 = vld [vmem:[%s6197_s17 + $0x560] sm:$0xff]  ;;  %v417_v24 = vld [vmem:[%s6197_s17 + $0x198] sm:$0xff] }
 0x127   : > { %v539_v30 = vld [vmem:[%s6197_s17 + $0x568] sm:$0xff]  ;;  %v862_v44 = vld [vmem:[%s6197_s17 + $0xf80] sm:$0xff]  ;;  %v4401_v46 = vpack.c.bf16 %v538_v39, %v530_v38  ;;  %v425_v28 = vld [vmem:[%s6197_s17 + $0x1d8] sm:$0xff] }
 0x128   : > { %4090 = vmatpush1.bf16.msra.mxu1 %v4089_v18  ;;  %v863_v36 = vld [vmem:[%s6197_s17 + $0xf88] sm:$0xff]  ;;  %v4399_v37 = vpack.c.bf16 %v539_v30, %v531_v29  ;;  %v870_v45 = vld [vmem:[%s6197_s17 + $0xfc0] sm:$0xff]  ;;  %v4173_v18 = vpack.c.bf16 %v392_v7, %v384_v6  ;;  %v416_v32 = vld [vmem:[%s6197_s17 + $0x190] sm:$0xff] }
 0x129   : > { %4092 = vmatprep.subr.bf16.mxu1 %v4091_v22  ;;  %v871_v40 = vld [vmem:[%s6197_s17 + $0xfc8] sm:$0xff]  ;;  %4398 = vmatpush1.bf16.msra.mxu0 %v4397_v34  ;;  %v546_v50 = vld [vmem:[%s6197_s17 + $0x5a0] sm:$0xff]  ;;  %v4101_v55 = vpack.c.bf16 %v870_v45, %v862_v44  ;;  %v4175_v22 = vpack.c.bf16 %v409_v15, %v401_v10  ;;  %v424_v33 = vld [vmem:[%s6197_s17 + $0x1d0] sm:$0xff] }
 0x12a   : > { %v547_v41 = vld [vmem:[%s6197_s17 + $0x5a8] sm:$0xff]  ;;  %v4099_v47 = vpack.c.bf16 %v871_v40, %v863_v36  ;;  %4400 = vmatprep.subr.bf16.mxu0 %v4399_v37  ;;  %v554_v51 = vld [vmem:[%s6197_s17 + $0x5e0] sm:$0xff]  ;;  %v433_v36 = vld [vmem:[%s6197_s17 + $0x218] sm:$0xff] }
 0x12b   : > { %v555_v42 = vld [vmem:[%s6197_s17 + $0x5e8] sm:$0xff]  ;;  %v4405_v59 = vpack.c.bf16 %v554_v51, %v546_v50  ;;  %v562_v63 = vld [vmem:[%s6197_s17 + $0x620] sm:$0xff]  ;;  %v440_v44 = vld [vmem:[%s6197_s17 + $0x250] sm:$0xff] }
 0x12c   : > { %4094 = vmatpush1.bf16.msra.mxu1 %v4093_v31  ;;  %v4403_v49 = vpack.c.bf16 %v555_v42, %v547_v41  ;;  %v563_v53 = vld [vmem:[%s6197_s17 + $0x628] sm:$0xff]  ;;  %v570_v0 = vld [vmem:[%s6197_s17 + $0x660] sm:$0xff]  ;;  %v4177_v31 = vpack.c.bf16 %v408_v20, %v400_v19  ;;  %v4181_v42 = vpack.c.bf16 %v424_v33, %v416_v32  ;;  %v457_v51 = vld [vmem:[%s6197_s17 + $0x2d8] sm:$0xff] }
 0x12d   : > { %4096 = vmatprep.subr.bf16.mxu1 %v4095_v35  ;;  %v571_v54 = vld [vmem:[%s6197_s17 + $0x668] sm:$0xff]  ;;  %4402 = vmatpush1.bf16.msra.mxu0 %v4401_v46  ;;  %v6477_v4 = vld [vmem:[#allocation3 + $0x10] sm:$0xff]  ;;  %v4409_v8 = vpack.c.bf16 %v570_v0, %v562_v63  ;;  %v4179_v35 = vpack.c.bf16 %v425_v28, %v417_v24  ;;  %v456_v56 = vld [vmem:[%s6197_s17 + $0x2d0] sm:$0xff] }
 0x12e   : > { %4404 = vmatprep.subr.bf16.mxu0 %v4403_v49  ;;  %v4407_v62 = vpack.c.bf16 %v571_v54, %v563_v53  ;;  %v579_v2 = vld [vmem:[%s6197_s17 + $0x6a8] sm:$0xff]  ;;  %v578_v12 = vld [vmem:[%s6197_s17 + $0x6a0] sm:$0xff]  ;;  %v473_v0 = vld [vmem:[%s6197_s17 + $0x358] sm:$0xff] }
 0x12f   : > { %v587_v3 = vld [vmem:[%s6197_s17 + $0x6e8] sm:$0xff]  ;;  %v586_v13 = vld [vmem:[%s6197_s17 + $0x6e0] sm:$0xff]  ;;  %v472_v6 = vld [vmem:[%s6197_s17 + $0x350] sm:$0xff] }
 0x130   : > { %4098 = vmatpush1.bf16.msra.mxu1 %v4097_v43  ;;  %v4411_v11 = vpack.c.bf16 %v587_v3, %v579_v2  ;;  %v595_v16 = vld [vmem:[%s6197_s17 + $0x728] sm:$0xff]  ;;  %v4413_v21 = vpack.c.bf16 %v586_v13, %v578_v12  ;;  %v594_v26 = vld [vmem:[%s6197_s17 + $0x720] sm:$0xff]  ;;  %v432_v43 = vld [vmem:[%s6197_s17 + $0x210] sm:$0xff] }
 0x131   : > { %4100 = vmatprep.subr.bf16.mxu1 %v4099_v47  ;;  %4406 = vmatpush1.bf16.msra.mxu0 %v4405_v59  ;;  %v603_v17 = vld [vmem:[%s6197_s17 + $0x768] sm:$0xff]  ;;  %v602_v27 = vld [vmem:[%s6197_s17 + $0x760] sm:$0xff]  ;;  %v449_v47 = vld [vmem:[%s6197_s17 + $0x298] sm:$0xff]  ;;  %v4185_v54 = vpack.c.bf16 %v440_v44, %v432_v43 }
 0x132   : > { %4408 = vmatprep.subr.bf16.mxu0 %v4407_v62  ;;  %v4415_v25 = vpack.c.bf16 %v603_v17, %v595_v16  ;;  %v611_v29 = vld [vmem:[%s6197_s17 + $0x7a8] sm:$0xff]  ;;  %v4417_v34 = vpack.c.bf16 %v602_v27, %v594_v26  ;;  %v610_v38 = vld [vmem:[%s6197_s17 + $0x7a0] sm:$0xff]  ;;  %v4187_v59 = vpack.c.bf16 %v457_v51, %v449_v47  ;;  %v489_v13 = vld [vmem:[%s6197_s17 + $0x3d8] sm:$0xff] }
 0x133   : > { %v619_v30 = vld [vmem:[%s6197_s17 + $0x7e8] sm:$0xff]  ;;  %v618_v39 = vld [vmem:[%s6197_s17 + $0x7e0] sm:$0xff]  ;;  %v480_v17 = vld [vmem:[%s6197_s17 + $0x390] sm:$0xff] }
 0x134   : > { %4102 = vmatpush1.bf16.msra.mxu1 %v4101_v55  ;;  %v4419_v37 = vpack.c.bf16 %v619_v30, %v611_v29  ;;  %v627_v40 = vld [vmem:[%s6197_s17 + $0x828] sm:$0xff]  ;;  %v4421_v45 = vpack.c.bf16 %v618_v39, %v610_v38  ;;  %v626_v49 = vld [vmem:[%s6197_s17 + $0x820] sm:$0xff]  ;;  %v448_v55 = vld [vmem:[%s6197_s17 + $0x290] sm:$0xff] }
 0x135   : > { %4168 = vmatprep.subr.bf16.mxu1 %v4167_v60  ;;  %4410 = vmatpush1.bf16.msra.mxu0 %v4409_v8  ;;  %v635_v41 = vld [vmem:[%s6197_s17 + $0x868] sm:$0xff]  ;;  %v634_v50 = vld [vmem:[%s6197_s17 + $0x860] sm:$0xff]  ;;  %v465_v60 = vld [vmem:[%s6197_s17 + $0x318] sm:$0xff]  ;;  %v4189_v3 = vpack.c.bf16 %v456_v56, %v448_v55 }
 0x136   : > { %4412 = vmatprep.subr.bf16.mxu0 %v4411_v11  ;;  %v4423_v48 = vpack.c.bf16 %v635_v41, %v627_v40  ;;  %v643_v52 = vld [vmem:[%s6197_s17 + $0x8a8] sm:$0xff]  ;;  %v4425_v58 = vpack.c.bf16 %v634_v50, %v626_v49  ;;  %v642_v62 = vld [vmem:[%s6197_s17 + $0x8a0] sm:$0xff]  ;;  %v4191_v8 = vpack.c.bf16 %v473_v0, %v465_v60  ;;  %v496_v29 = vld [vmem:[%s6197_s17 + $0x410] sm:$0xff] }
 0x137   : > { %1312 = vmatmul.mubr.f32.vlgmr.msra.gmra.mrb[0].mxu1 %v6477_v4  ;;  %v651_v53 = vld [vmem:[%s6197_s17 + $0x8e8] sm:$0xff]  ;;  %v650_v63 = vld [vmem:[%s6197_s17 + $0x8e0] sm:$0xff]  ;;  %v504_v30 = vld [vmem:[%s6197_s17 + $0x450] sm:$0xff] }
 0x138   : > { %4170 = vmatpush1.bf16.msra.mxu1 %v4169_v5  ;;  %1453 = vmatprep.mubr.f32.mxu1 %v6269_v14  ;;  %v441_v14 = vld [vmem:[%s6197_s17 + $0x258] sm:$0xff]  ;;  %v4427_v61 = vpack.c.bf16 %v651_v53, %v643_v52  ;;  %v659_v1 = vld [vmem:[%s6197_s17 + $0x928] sm:$0xff]  ;;  %v464_v5 = vld [vmem:[%s6197_s17 + $0x310] sm:$0xff]  ;;  %v4429_v7 = vpack.c.bf16 %v650_v63, %v642_v62 }
 0x139   : > { %4172 = vmatprep.subr.bf16.mxu1 %v4171_v9  ;;  %4414 = vmatpush1.bf16.msra.mxu0 %v4413_v21  ;;  %v4183_v46 = vpack.c.bf16 %v441_v14, %v433_v36  ;;  %v667_v2 = vld [vmem:[%s6197_s17 + $0x968] sm:$0xff]  ;;  %v481_v9 = vld [vmem:[%s6197_s17 + $0x398] sm:$0xff]  ;;  %v658_v11 = vld [vmem:[%s6197_s17 + $0x920] sm:$0xff]  ;;  %v4193_v16 = vpack.c.bf16 %v472_v6, %v464_v5  ;;  %v4201_v14 = vpack.c.bf16 %v504_v30, %v496_v29 }
 0x13a   : > { %4416 = vmatprep.subr.bf16.mxu0 %v4415_v25  ;;  %v4431_v10 = vpack.c.bf16 %v667_v2, %v659_v1  ;;  %v666_v12 = vld [vmem:[%s6197_s17 + $0x960] sm:$0xff]  ;;  %v683_v15 = vld [vmem:[%s6197_s17 + $0x9e8] sm:$0xff]  ;;  %v4195_v20 = vpack.c.bf16 %v489_v13, %v481_v9  ;;  %v497_v21 = vld [vmem:[%s6197_s17 + $0x418] sm:$0xff] }
 0x13b   : > { %v4433_v19 = vpack.c.bf16 %v666_v12, %v658_v11  ;;  %v674_v24 = vld [vmem:[%s6197_s17 + $0x9a0] sm:$0xff]  ;;  %v691_v26 = vld [vmem:[%s6197_s17 + $0xa28] sm:$0xff]  ;;  %v513_v33 = vld [vmem:[%s6197_s17 + $0x498] sm:$0xff] }
 0x13c   : > { %4174 = vmatpush1.bf16.msra.mxu1 %v4173_v18  ;;  %v488_v18 = vld [vmem:[%s6197_s17 + $0x3d0] sm:$0xff]  ;;  %v682_v25 = vld [vmem:[%s6197_s17 + $0x9e0] sm:$0xff]  ;;  %v699_v27 = vld [vmem:[%s6197_s17 + $0xa68] sm:$0xff] }
 0x13d   : > { %4176 = vmatprep.subr.bf16.mxu1 %v4175_v22  ;;  %4418 = vmatpush1.bf16.msra.mxu0 %v4417_v34  ;;  %v4197_v28 = vpack.c.bf16 %v488_v18, %v480_v17  ;;  %v4439_v34 = vpack.c.bf16 %v699_v27, %v691_v26  ;;  %v698_v36 = vld [vmem:[%s6197_s17 + $0xa60] sm:$0xff]  ;;  %v707_v38 = vld [vmem:[%s6197_s17 + $0xaa8] sm:$0xff]  ;;  %v512_v40 = vld [vmem:[%s6197_s17 + $0x490] sm:$0xff] }
 0x13e   : > { %4420 = vmatprep.subr.bf16.mxu0 %v4419_v37  ;;  %v521_v37 = vld [vmem:[%s6197_s17 + $0x4d8] sm:$0xff]  ;;  %v715_v39 = vld [vmem:[%s6197_s17 + $0xae8] sm:$0xff]  ;;  %v520_v41 = vld [vmem:[%s6197_s17 + $0x4d0] sm:$0xff] }
 0x13f   : > { %v4203_v43 = vpack.c.bf16 %v521_v37, %v513_v33  ;;  %v529_v44 = vld [vmem:[%s6197_s17 + $0x518] sm:$0xff]  ;;  %v714_v47 = vld [vmem:[%s6197_s17 + $0xae0] sm:$0xff]  ;;  %v723_v49 = vld [vmem:[%s6197_s17 + $0xb28] sm:$0xff]  ;;  %v4205_v51 = vpack.c.bf16 %v520_v41, %v512_v40 }
 0x140   : > { %4178 = vmatpush1.bf16.msra.mxu1 %v4177_v31  ;;  %v4437_v31 = vpack.c.bf16 %v682_v25, %v674_v24  ;;  %v731_v50 = vld [vmem:[%s6197_s17 + $0xb68] sm:$0xff]  ;;  %v528_v52 = vld [vmem:[%s6197_s17 + $0x510] sm:$0xff]  ;;  %v545_v56 = vld [vmem:[%s6197_s17 + $0x598] sm:$0xff] }
 0x141   : > { %4180 = vmatprep.subr.bf16.mxu1 %v4179_v35  ;;  %4422 = vmatpush1.bf16.msra.mxu0 %v4421_v45  ;;  %v690_v35 = vld [vmem:[%s6197_s17 + $0xa20] sm:$0xff]  ;;  %v4443_v45 = vpack.c.bf16 %v715_v39, %v707_v38  ;;  %v536_v53 = vld [vmem:[%s6197_s17 + $0x550] sm:$0xff]  ;;  %v739_v62 = vld [vmem:[%s6197_s17 + $0xba8] sm:$0xff] }
 0x142   : > { %4424 = vmatprep.subr.bf16.mxu0 %v4423_v48  ;;  %v537_v48 = vld [vmem:[%s6197_s17 + $0x558] sm:$0xff]  ;;  %v730_v60 = vld [vmem:[%s6197_s17 + $0xb60] sm:$0xff]  ;;  %v747_v63 = vld [vmem:[%s6197_s17 + $0xbe8] sm:$0xff]  ;;  %v4209_v0 = vpack.c.bf16 %v536_v53, %v528_v52 }
 0x143   : > { %v4207_v55 = vpack.c.bf16 %v537_v48, %v529_v44  ;;  %v544_v1 = vld [vmem:[%s6197_s17 + $0x590] sm:$0xff]  ;;  %v561_v6 = vld [vmem:[%s6197_s17 + $0x618] sm:$0xff]  ;;  %v746_v9 = vld [vmem:[%s6197_s17 + $0xbe0] sm:$0xff] }
 0x144   : > { %4182 = vmatpush1.bf16.msra.mxu1 %v4181_v42  ;;  %1667 = vmatmul.mubr.f32.vlgmr.msra.gmra.mrb[2].mxu0 %v6342_v57  ;;  %v675_v57 = vld [vmem:[%s6197_s17 + $0x9a8] sm:$0xff]  ;;  %v4441_v42 = vpack.c.bf16 %v698_v36, %v690_v35  ;;  %v552_v2 = vld [vmem:[%s6197_s17 + $0x5d0] sm:$0xff]  ;;  %v577_v18 = vld [vmem:[%s6197_s17 + $0x698] sm:$0xff] }
 0x145   : > { %4184 = vmatprep.subr.bf16.mxu1 %v4183_v46  ;;  %4426 = vmatpush1.bf16.msra.mxu0 %v4425_v58  ;;  %v4435_v22 = vpack.c.bf16 %v683_v15, %v675_v57  ;;  %v706_v46 = vld [vmem:[%s6197_s17 + $0xaa0] sm:$0xff]  ;;  %v4447_v58 = vpack.c.bf16 %v731_v50, %v723_v49  ;;  %v755_v11 = vld [vmem:[%s6197_s17 + $0xc28] sm:$0xff]  ;;  %v4213_v13 = vpack.c.bf16 %v552_v2, %v544_v1  ;;  %v560_v57 = vld [vmem:[%s6197_s17 + $0x610] sm:$0xff] }
 0x146   : > { %4428 = vmatprep.subr.bf16.mxu0 %v4427_v61  ;;  %1737 = vmatprep.mubr.f32.mxu0 %v6363_v23  ;;  %v505_v23 = vld [vmem:[%s6197_s17 + $0x458] sm:$0xff]  ;;  %v763_v12 = vld [vmem:[%s6197_s17 + $0xc68] sm:$0xff]  ;;  %v568_v15 = vld [vmem:[%s6197_s17 + $0x650] sm:$0xff] }
 0x147   : > { %v4199_v32 = vpack.c.bf16 %v505_v23, %v497_v21  ;;  %v553_v61 = vld [vmem:[%s6197_s17 + $0x5d8] sm:$0xff]  ;;  %v762_v21 = vld [vmem:[%s6197_s17 + $0xc60] sm:$0xff]  ;;  %v771_v24 = vld [vmem:[%s6197_s17 + $0xca8] sm:$0xff]  ;;  %v4217_v23 = vpack.c.bf16 %v568_v15, %v560_v57 }
 0x148   : > { %4186 = vmatpush1.bf16.msra.mxu1 %v4185_v54  ;;  %v4445_v54 = vpack.c.bf16 %v714_v47, %v706_v46  ;;  %v4211_v5 = vpack.c.bf16 %v553_v61, %v545_v56  ;;  %v779_v25 = vld [vmem:[%s6197_s17 + $0xce8] sm:$0xff]  ;;  %v576_v26 = vld [vmem:[%s6197_s17 + $0x690] sm:$0xff]  ;;  %v593_v30 = vld [vmem:[%s6197_s17 + $0x718] sm:$0xff] }
 0x149   : > { %4188 = vmatprep.subr.bf16.mxu1 %v4187_v59  ;;  %4430 = vmatpush1.bf16.msra.mxu0 %v4429_v7  ;;  %v722_v59 = vld [vmem:[%s6197_s17 + $0xb20] sm:$0xff]  ;;  %v4451_v7 = vpack.c.bf16 %v747_v63, %v739_v62  ;;  %v584_v27 = vld [vmem:[%s6197_s17 + $0x6d0] sm:$0xff]  ;;  %v787_v35 = vld [vmem:[%s6197_s17 + $0xd28] sm:$0xff] }
 0x14a   : > { %4432 = vmatprep.subr.bf16.mxu0 %v4431_v10  ;;  %v569_v10 = vld [vmem:[%s6197_s17 + $0x658] sm:$0xff]  ;;  %v778_v33 = vld [vmem:[%s6197_s17 + $0xce0] sm:$0xff]  ;;  %v795_v36 = vld [vmem:[%s6197_s17 + $0xd68] sm:$0xff]  ;;  %v4221_v37 = vpack.c.bf16 %v584_v27, %v576_v26 }
 0x14b   : > { %v4215_v17 = vpack.c.bf16 %v569_v10, %v561_v6  ;;  %v592_v38 = vld [vmem:[%s6197_s17 + $0x710] sm:$0xff]  ;;  %v609_v41 = vld [vmem:[%s6197_s17 + $0x798] sm:$0xff]  ;;  %v794_v44 = vld [vmem:[%s6197_s17 + $0xd60] sm:$0xff] }
 0x14c   : > { %4190 = vmatpush1.bf16.msra.mxu1 %v4189_v3  ;;  %v4449_v3 = vpack.c.bf16 %v730_v60, %v722_v59  ;;  %v600_v39 = vld [vmem:[%s6197_s17 + $0x750] sm:$0xff]  ;;  %v803_v46 = vld [vmem:[%s6197_s17 + $0xda8] sm:$0xff]  ;;  %v625_v53 = vld [vmem:[%s6197_s17 + $0x818] sm:$0xff] }
 0x14d   : > { %4192 = vmatprep.subr.bf16.mxu1 %v4191_v8  ;;  %4434 = vmatpush1.bf16.msra.mxu0 %v4433_v19  ;;  %v738_v8 = vld [vmem:[%s6197_s17 + $0xba0] sm:$0xff]  ;;  %v4455_v19 = vpack.c.bf16 %v763_v12, %v755_v11  ;;  %v811_v47 = vld [vmem:[%s6197_s17 + $0xde8] sm:$0xff]  ;;  %v4225_v48 = vpack.c.bf16 %v600_v39, %v592_v38  ;;  %v608_v49 = vld [vmem:[%s6197_s17 + $0x790] sm:$0xff] }
 0x14e   : > { %4436 = vmatprep.subr.bf16.mxu0 %v4435_v22  ;;  %v585_v22 = vld [vmem:[%s6197_s17 + $0x6d8] sm:$0xff]  ;;  %v616_v50 = vld [vmem:[%s6197_s17 + $0x7d0] sm:$0xff]  ;;  %v810_v56 = vld [vmem:[%s6197_s17 + $0xde0] sm:$0xff] }
 0x14f   : > { %v4219_v29 = vpack.c.bf16 %v585_v22, %v577_v18  ;;  %v819_v59 = vld [vmem:[%s6197_s17 + $0xe28] sm:$0xff]  ;;  %v4229_v61 = vpack.c.bf16 %v616_v50, %v608_v49  ;;  %v624_v62 = vld [vmem:[%s6197_s17 + $0x810] sm:$0xff]  ;;  %v641_v2 = vld [vmem:[%s6197_s17 + $0x898] sm:$0xff] }
 0x150   : > { %4194 = vmatpush1.bf16.msra.mxu1 %v4193_v16  ;;  %v4453_v16 = vpack.c.bf16 %v746_v9, %v738_v8  ;;  %v827_v60 = vld [vmem:[%s6197_s17 + $0xe68] sm:$0xff]  ;;  %v632_v63 = vld [vmem:[%s6197_s17 + $0x850] sm:$0xff]  ;;  %v826_v6 = vld [vmem:[%s6197_s17 + $0xe60] sm:$0xff] }
 0x151   : > { %4196 = vmatprep.subr.bf16.mxu1 %v4195_v20  ;;  %4438 = vmatpush1.bf16.msra.mxu0 %v4437_v31  ;;  %v754_v20 = vld [vmem:[%s6197_s17 + $0xc20] sm:$0xff]  ;;  %v4459_v31 = vpack.c.bf16 %v779_v25, %v771_v24  ;;  %v835_v8 = vld [vmem:[%s6197_s17 + $0xea8] sm:$0xff]  ;;  %v4233_v10 = vpack.c.bf16 %v632_v63, %v624_v62  ;;  %v640_v11 = vld [vmem:[%s6197_s17 + $0x890] sm:$0xff] }
 0x152   : > { %4440 = vmatprep.subr.bf16.mxu0 %v4439_v34  ;;  %v601_v34 = vld [vmem:[%s6197_s17 + $0x758] sm:$0xff]  ;;  %v843_v9 = vld [vmem:[%s6197_s17 + $0xee8] sm:$0xff]  ;;  %v648_v12 = vld [vmem:[%s6197_s17 + $0x8d0] sm:$0xff] }
 0x153   : > { %v4223_v40 = vpack.c.bf16 %v601_v34, %v593_v30  ;;  %v657_v15 = vld [vmem:[%s6197_s17 + $0x918] sm:$0xff]  ;;  %v842_v18 = vld [vmem:[%s6197_s17 + $0xee0] sm:$0xff]  ;;  %v5672_v22 = vld [vmem:[#allocation3] sm:$0xff]  ;;  %v4237_v24 = vpack.c.bf16 %v648_v12, %v640_v11 }
 0x154   : > { %4198 = vmatpush1.bf16.msra.mxu1 %v4197_v28  ;;  %v4457_v28 = vpack.c.bf16 %v762_v21, %v754_v20  ;;  %v851_v20 = vld [vmem:[%s6197_s17 + $0xf28] sm:$0xff]  ;;  %v656_v25 = vld [vmem:[%s6197_s17 + $0x910] sm:$0xff]  ;;  %v850_v30 = vld [vmem:[%s6197_s17 + $0xf20] sm:$0xff] }
 0x155   : > { %4200 = vmatprep.subr.bf16.mxu1 %v4199_v32  ;;  %4442 = vmatpush1.bf16.msra.mxu0 %v4441_v42  ;;  %v770_v32 = vld [vmem:[%s6197_s17 + $0xca0] sm:$0xff]  ;;  %v4463_v42 = vpack.c.bf16 %v795_v36, %v787_v35  ;;  %v859_v21 = vld [vmem:[%s6197_s17 + $0xf68] sm:$0xff]  ;;  %v680_v38 = vld [vmem:[%s6197_s17 + $0x9d0] sm:$0xff] }
 0x156   : > { %4444 = vmatprep.subr.bf16.mxu0 %v4443_v45  ;;  %v617_v45 = vld [vmem:[%s6197_s17 + $0x7d8] sm:$0xff]  ;;  %v875_v34 = vld [vmem:[%s6197_s17 + $0xfe8] sm:$0xff]  ;;  %v696_v49 = vld [vmem:[%s6197_s17 + $0xa50] sm:$0xff] }
 0x157   : > { %v4227_v52 = vpack.c.bf16 %v617_v45, %v609_v41  ;;  %v5673_v35 = vld [vmem:[#allocation3 + $0x18] sm:$0xff]  ;;  %v712_v62 = vld [vmem:[%s6197_s17 + $0xad0] sm:$0xff] }
 0x158   : > { %4202 = vmatpush1.bf16.msra.mxu1 %v4201_v14  ;;  %v4461_v14 = vpack.c.bf16 %v778_v33, %v770_v32  ;;  %v681_v32 = vld [vmem:[%s6197_s17 + $0x9d8] sm:$0xff]  ;;  %v867_v33 = vld [vmem:[%s6197_s17 + $0xfa8] sm:$0xff]  ;;  %v728_v11 = vld [vmem:[%s6197_s17 + $0xb50] sm:$0xff] }
 0x159   : > { %4204 = vmatprep.subr.bf16.mxu1 %v4203_v43  ;;  %4446 = vmatpush1.bf16.msra.mxu0 %v4445_v54  ;;  %v786_v43 = vld [vmem:[%s6197_s17 + $0xd20] sm:$0xff]  ;;  %v4467_v54 = vpack.c.bf16 %v811_v47, %v803_v46  ;;  %v4483_v41 = vpack.c.bf16 %v875_v34, %v867_v33  ;;  %v883_v45 = vld [vmem:[%s6197_s17 + $0x1028] sm:$0xff]  ;;  %v752_v34 = vld [vmem:[%s6197_s17 + $0xc10] sm:$0xff] }
 0x15a   : > { %4448 = vmatprep.subr.bf16.mxu0 %v4447_v58  ;;  %v633_v58 = vld [vmem:[%s6197_s17 + $0x858] sm:$0xff]  ;;  %v891_v46 = vld [vmem:[%s6197_s17 + $0x1068] sm:$0xff] }
 0x15b   : > { %v4231_v1 = vpack.c.bf16 %v633_v58, %v625_v53  ;;  %v4487_v53 = vpack.c.bf16 %v891_v46, %v883_v45  ;;  %v899_v58 = vld [vmem:[%s6197_s17 + $0x10a8] sm:$0xff]  ;;  %v768_v45 = vld [vmem:[%s6197_s17 + $0xc90] sm:$0xff] }
 0x15c   : > { %4206 = vmatpush1.bf16.msra.mxu1 %v4205_v51  ;;  %v4465_v51 = vpack.c.bf16 %v794_v44, %v786_v43  ;;  %v874_v43 = vld [vmem:[%s6197_s17 + $0xfe0] sm:$0xff]  ;;  %v697_v44 = vld [vmem:[%s6197_s17 + $0xa58] sm:$0xff]  ;;  %v776_v46 = vld [vmem:[%s6197_s17 + $0xcd0] sm:$0xff] }
 0x15d   : > { %4208 = vmatprep.subr.bf16.mxu1 %v4207_v55  ;;  %4450 = vmatpush1.bf16.msra.mxu0 %v4449_v3  ;;  %v802_v55 = vld [vmem:[%s6197_s17 + $0xda0] sm:$0xff]  ;;  %v4471_v3 = vpack.c.bf16 %v827_v60, %v819_v59  ;;  %v907_v59 = vld [vmem:[%s6197_s17 + $0x10e8] sm:$0xff] }
 0x15e   : > { %4452 = vmatprep.subr.bf16.mxu0 %v4451_v7  ;;  %v649_v7 = vld [vmem:[%s6197_s17 + $0x8d8] sm:$0xff] }
 0x15f   : > { %v4235_v57 = vpack.c.bf16 %v649_v7, %v641_v2  ;;  %v4491_v2 = vpack.c.bf16 %v907_v59, %v899_v58  ;;  %v915_v7 = vld [vmem:[%s6197_s17 + $0x1128] sm:$0xff]  ;;  %v784_v58 = vld [vmem:[%s6197_s17 + $0xd10] sm:$0xff] }
 0x160   : > { %4210 = vmatpush1.bf16.msra.mxu1 %v4209_v0  ;;  %v4469_v0 = vpack.c.bf16 %v810_v56, %v802_v55  ;;  %v890_v55 = vld [vmem:[%s6197_s17 + $0x1060] sm:$0xff]  ;;  %v713_v56 = vld [vmem:[%s6197_s17 + $0xad8] sm:$0xff]  ;;  %v792_v59 = vld [vmem:[%s6197_s17 + $0xd50] sm:$0xff] }
 0x161   : > { %4212 = vmatprep.subr.bf16.mxu1 %v4211_v5  ;;  %4454 = vmatpush1.bf16.msra.mxu0 %v4453_v16  ;;  %v818_v5 = vld [vmem:[%s6197_s17 + $0xe20] sm:$0xff]  ;;  %v4475_v16 = vpack.c.bf16 %v843_v9, %v835_v8  ;;  %v923_v8 = vld [vmem:[%s6197_s17 + $0x1168] sm:$0xff] }
 0x162   : > { %4456 = vmatprep.subr.bf16.mxu0 %v4455_v19  ;;  %v665_v19 = vld [vmem:[%s6197_s17 + $0x958] sm:$0xff] }
 0x163   : > { %v4239_v27 = vpack.c.bf16 %v665_v19, %v657_v15  ;;  %v4495_v15 = vpack.c.bf16 %v923_v8, %v915_v7  ;;  %v939_v19 = vld [vmem:[%s6197_s17 + $0x11e8] sm:$0xff]  ;;  %v800_v7 = vld [vmem:[%s6197_s17 + $0xd90] sm:$0xff] }
 0x164   : > { %4214 = vmatpush1.bf16.msra.mxu1 %v4213_v13  ;;  %v4473_v13 = vpack.c.bf16 %v826_v6, %v818_v5  ;;  %v906_v5 = vld [vmem:[%s6197_s17 + $0x10e0] sm:$0xff]  ;;  %v729_v6 = vld [vmem:[%s6197_s17 + $0xb58] sm:$0xff]  ;;  %v808_v8 = vld [vmem:[%s6197_s17 + $0xdd0] sm:$0xff] }
 0x165   : > { %4216 = vmatprep.subr.bf16.mxu1 %v4215_v17  ;;  %4458 = vmatpush1.bf16.msra.mxu0 %v4457_v28  ;;  %v834_v17 = vld [vmem:[%s6197_s17 + $0xea0] sm:$0xff]  ;;  %v673_v28 = vld [vmem:[%s6197_s17 + $0x998] sm:$0xff] }
 0x166   : > { %4460 = vmatprep.subr.bf16.mxu0 %v4459_v31  ;;  %v4477_v26 = vpack.c.bf16 %v842_v18, %v834_v17  ;;  %v858_v31 = vld [vmem:[%s6197_s17 + $0xf60] sm:$0xff]  ;;  %v745_v18 = vld [vmem:[%s6197_s17 + $0xbd8] sm:$0xff] }
 0x167   : > { %v4481_v39 = vpack.c.bf16 %v858_v31, %v850_v30  ;;  %v922_v17 = vld [vmem:[%s6197_s17 + $0x1160] sm:$0xff]  ;;  %v761_v30 = vld [vmem:[%s6197_s17 + $0xc58] sm:$0xff]  ;;  %v947_v31 = vld [vmem:[%s6197_s17 + $0x1228] sm:$0xff] }
 0x168   : > { %4218 = vmatpush1.bf16.msra.mxu1 %v4217_v23  ;;  %v664_v23 = vld [vmem:[%s6197_s17 + $0x950] sm:$0xff] }
 0x169   : > { %4220 = vmatprep.subr.bf16.mxu1 %v4219_v29  ;;  %4462 = vmatpush1.bf16.msra.mxu0 %v4461_v14  ;;  %v4479_v29 = vpack.c.bf16 %v859_v21, %v851_v20  ;;  %v4241_v36 = vpack.c.bf16 %v664_v23, %v656_v25  ;;  %v4243_v14 = vpack.c.bf16 %v681_v32, %v673_v28  ;;  %v6660_v20 = vld [vmem:[#allocation3 + $0x28] sm:$0xff]  ;;  %v930_v28 = vld [vmem:[%s6197_s17 + $0x11a0] sm:$0xff]  ;;  %v955_v32 = vld [vmem:[%s6197_s17 + $0x1268] sm:$0xff] }
 0x16a   : > { %4464 = vmatprep.subr.bf16.mxu0 %v4463_v42  ;;  %v866_v42 = vld [vmem:[%s6197_s17 + $0xfa0] sm:$0xff] }
 0x16b   : > { %v4485_v50 = vpack.c.bf16 %v874_v43, %v866_v42  ;;  %v963_v42 = vld [vmem:[%s6197_s17 + $0x12a8] sm:$0xff] }
 0x16c   : > { %4222 = vmatpush1.bf16.msra.mxu1 %v4221_v37  ;;  %v672_v37 = vld [vmem:[%s6197_s17 + $0x990] sm:$0xff]  ;;  %v971_v43 = vld [vmem:[%s6197_s17 + $0x12e8] sm:$0xff] }
 0x16d   : > { %4224 = vmatprep.subr.bf16.mxu1 %v4223_v40  ;;  %4466 = vmatpush1.bf16.msra.mxu0 %v4465_v51  ;;  %v689_v40 = vld [vmem:[%s6197_s17 + $0xa18] sm:$0xff]  ;;  %v4245_v47 = vpack.c.bf16 %v680_v38, %v672_v37 }
 0x16e   : > { %4468 = vmatprep.subr.bf16.mxu0 %v4467_v54  ;;  %v4247_v51 = vpack.c.bf16 %v697_v44, %v689_v40  ;;  %v882_v54 = vld [vmem:[%s6197_s17 + $0x1020] sm:$0xff]  ;;  %v769_v38 = vld [vmem:[%s6197_s17 + $0xc98] sm:$0xff] }
 0x16f   : > { %v4489_v63 = vpack.c.bf16 %v890_v55, %v882_v54  ;;  %v954_v40 = vld [vmem:[%s6197_s17 + $0x1260] sm:$0xff]  ;;  %v979_v54 = vld [vmem:[%s6197_s17 + $0x1328] sm:$0xff] }
 0x170   : > { %4226 = vmatpush1.bf16.msra.mxu1 %v4225_v48  ;;  %v688_v48 = vld [vmem:[%s6197_s17 + $0xa10] sm:$0xff]  ;;  %v987_v55 = vld [vmem:[%s6197_s17 + $0x1368] sm:$0xff] }
 0x171   : > { %4228 = vmatprep.subr.bf16.mxu1 %v4227_v52  ;;  %4470 = vmatpush1.bf16.msra.mxu0 %v4469_v0  ;;  %v705_v52 = vld [vmem:[%s6197_s17 + $0xa98] sm:$0xff]  ;;  %v4249_v60 = vpack.c.bf16 %v696_v49, %v688_v48 }
 0x172   : > { %4472 = vmatprep.subr.bf16.mxu0 %v4471_v3  ;;  %v4251_v0 = vpack.c.bf16 %v713_v56, %v705_v52  ;;  %v898_v3 = vld [vmem:[%s6197_s17 + $0x10a0] sm:$0xff]  ;;  %v785_v49 = vld [vmem:[%s6197_s17 + $0xd18] sm:$0xff]  ;;  %v4269_v56 = vpack.c.bf16 %v776_v46, %v768_v45 }
 0x173   : > { %v4493_v12 = vpack.c.bf16 %v906_v5, %v898_v3  ;;  %v970_v52 = vld [vmem:[%s6197_s17 + $0x12e0] sm:$0xff]  ;;  %v995_v3 = vld [vmem:[%s6197_s17 + $0x13a8] sm:$0xff]  ;;  %v865_v46 = vld [vmem:[%s6197_s17 + $0xf98] sm:$0xff] }
 0x174   : > { %4230 = vmatpush1.bf16.msra.mxu1 %v4229_v61  ;;  %v704_v61 = vld [vmem:[%s6197_s17 + $0xa90] sm:$0xff]  ;;  %v1003_v5 = vld [vmem:[%s6197_s17 + $0x13e8] sm:$0xff] }
 0x175   : > { %4232 = vmatprep.subr.bf16.mxu1 %v4231_v1  ;;  %4474 = vmatpush1.bf16.msra.mxu0 %v4473_v13  ;;  %v721_v1 = vld [vmem:[%s6197_s17 + $0xb18] sm:$0xff]  ;;  %v4253_v9 = vpack.c.bf16 %v712_v62, %v704_v61 }
 0x176   : > { %4476 = vmatprep.subr.bf16.mxu0 %v4475_v16  ;;  %v4255_v13 = vpack.c.bf16 %v729_v6, %v721_v1  ;;  %v914_v16 = vld [vmem:[%s6197_s17 + $0x1120] sm:$0xff]  ;;  %v801_v62 = vld [vmem:[%s6197_s17 + $0xd98] sm:$0xff]  ;;  %v4273_v6 = vpack.c.bf16 %v792_v59, %v784_v58 }
 0x177   : > { %1454 = vmatmul.mubr.f32.vlgmr.msra.gmra.mrb[2].mxu1 %v5672_v22  ;;  %v736_v22 = vld [vmem:[%s6197_s17 + $0xb90] sm:$0xff]  ;;  %v4497_v25 = vpack.c.bf16 %v922_v17, %v914_v16  ;;  %v986_v1 = vld [vmem:[%s6197_s17 + $0x1360] sm:$0xff]  ;;  %v1011_v16 = vld [vmem:[%s6197_s17 + $0x1428] sm:$0xff] }
 0x178   : > { %4234 = vmatpush1.bf16.msra.mxu1 %v4233_v10  ;;  %1524 = vmatprep.mubr.f32.mxu1 %v5673_v35  ;;  %v720_v10 = vld [vmem:[%s6197_s17 + $0xb10] sm:$0xff]  ;;  %v1019_v17 = vld [vmem:[%s6197_s17 + $0x1468] sm:$0xff]  ;;  %v881_v59 = vld [vmem:[%s6197_s17 + $0x1018] sm:$0xff] }
 0x179   : > { %4236 = vmatprep.subr.bf16.mxu1 %v4235_v57  ;;  %4478 = vmatpush1.bf16.msra.mxu0 %v4477_v26  ;;  %v737_v57 = vld [vmem:[%s6197_s17 + $0xb98] sm:$0xff]  ;;  %v4257_v21 = vpack.c.bf16 %v728_v11, %v720_v10  ;;  %v760_v35 = vld [vmem:[%s6197_s17 + $0xc50] sm:$0xff] }
 0x17a   : > { %4480 = vmatprep.subr.bf16.mxu0 %v4479_v29  ;;  %v4259_v23 = vpack.c.bf16 %v745_v18, %v737_v57  ;;  %v753_v26 = vld [vmem:[%s6197_s17 + $0xc18] sm:$0xff]  ;;  %v938_v29 = vld [vmem:[%s6197_s17 + $0x11e0] sm:$0xff]  ;;  %v4265_v44 = vpack.c.bf16 %v760_v35, %v752_v34  ;;  %v4277_v18 = vpack.c.bf16 %v808_v8, %v800_v7 }
 0x17b   : > { %v4263_v37 = vpack.c.bf16 %v761_v30, %v753_v26  ;;  %v817_v11 = vld [vmem:[%s6197_s17 + $0xe18] sm:$0xff]  ;;  %v1002_v57 = vld [vmem:[%s6197_s17 + $0x13e0] sm:$0xff] }
 0x17c   : > { %4238 = vmatpush1.bf16.msra.mxu1 %v4237_v24  ;;  %v744_v24 = vld [vmem:[%s6197_s17 + $0xbd0] sm:$0xff]  ;;  %v1018_v26 = vld [vmem:[%s6197_s17 + $0x1460] sm:$0xff]  ;;  %v849_v35 = vld [vmem:[%s6197_s17 + $0xf18] sm:$0xff] }
 0x17d   : > { %4240 = vmatprep.subr.bf16.mxu1 %v4239_v27  ;;  %4482 = vmatpush1.bf16.msra.mxu0 %v4481_v39  ;;  %v4261_v33 = vpack.c.bf16 %v744_v24, %v736_v22  ;;  %v4503_v39 = vpack.c.bf16 %v955_v32, %v947_v31  ;;  %v833_v24 = vld [vmem:[%s6197_s17 + $0xe98] sm:$0xff]  ;;  %v832_v31 = vld [vmem:[%s6197_s17 + $0xe90] sm:$0xff] }
 0x17e   : > { %4484 = vmatprep.subr.bf16.mxu0 %v4483_v41  ;;  %v777_v41 = vld [vmem:[%s6197_s17 + $0xcd8] sm:$0xff]  ;;  %v840_v32 = vld [vmem:[%s6197_s17 + $0xed0] sm:$0xff] }
 0x17f   : > { %v4267_v48 = vpack.c.bf16 %v777_v41, %v769_v38  ;;  %v1034_v38 = vld [vmem:[%s6197_s17 + $0x14e0] sm:$0xff]  ;;  %v4285_v41 = vpack.c.bf16 %v840_v32, %v832_v31  ;;  %v897_v8 = vld [vmem:[%s6197_s17 + $0x1098] sm:$0xff] }
 0x180   : > { %4242 = vmatpush1.bf16.msra.mxu1 %v4241_v36  ;;  %v4501_v36 = vpack.c.bf16 %v938_v29, %v930_v28  ;;  %v1027_v28 = vld [vmem:[%s6197_s17 + $0x14a8] sm:$0xff] }
 0x181   : > { %4244 = vmatprep.subr.bf16.mxu1 %v4243_v14  ;;  %4486 = vmatpush1.bf16.msra.mxu0 %v4485_v50  ;;  %v946_v14 = vld [vmem:[%s6197_s17 + $0x1220] sm:$0xff]  ;;  %v4507_v50 = vpack.c.bf16 %v971_v43, %v963_v42  ;;  %v1035_v29 = vld [vmem:[%s6197_s17 + $0x14e8] sm:$0xff]  ;;  %v848_v42 = vld [vmem:[%s6197_s17 + $0xf10] sm:$0xff] }
 0x182   : > { %4488 = vmatprep.subr.bf16.mxu0 %v4487_v53  ;;  %v793_v53 = vld [vmem:[%s6197_s17 + $0xd58] sm:$0xff]  ;;  %v856_v43 = vld [vmem:[%s6197_s17 + $0xf50] sm:$0xff] }
 0x183   : > { %v4271_v61 = vpack.c.bf16 %v793_v53, %v785_v49  ;;  %v1050_v49 = vld [vmem:[%s6197_s17 + $0x1560] sm:$0xff]  ;;  %v4289_v53 = vpack.c.bf16 %v856_v43, %v848_v42 }
 0x184   : > { %4246 = vmatpush1.bf16.msra.mxu1 %v4245_v47  ;;  %1738 = vmatmul.mubr.f32.vlgmr.msra.gmra.mrb[2].mxu0 %v6477_v4  ;;  %v931_v4 = vld [vmem:[%s6197_s17 + $0x11a8] sm:$0xff]  ;;  %v4505_v47 = vpack.c.bf16 %v954_v40, %v946_v14 }
 0x185   : > { %4248 = vmatprep.subr.bf16.mxu1 %v4247_v51  ;;  %4490 = vmatpush1.bf16.msra.mxu0 %v4489_v63  ;;  %v4499_v27 = vpack.c.bf16 %v939_v19, %v931_v4  ;;  %v962_v51 = vld [vmem:[%s6197_s17 + $0x12a0] sm:$0xff]  ;;  %v4511_v63 = vpack.c.bf16 %v987_v55, %v979_v54  ;;  %v816_v4 = vld [vmem:[%s6197_s17 + $0xe10] sm:$0xff]  ;;  %v1043_v14 = vld [vmem:[%s6197_s17 + $0x1528] sm:$0xff] }
 0x186   : > { %4492 = vmatprep.subr.bf16.mxu0 %v4491_v2  ;;  %1808 = vmatprep.mubr.f32.mxu0 %v6660_v20  ;;  %v809_v2 = vld [vmem:[%s6197_s17 + $0xdd8] sm:$0xff]  ;;  %v824_v19 = vld [vmem:[%s6197_s17 + $0xe50] sm:$0xff]  ;;  %v1051_v40 = vld [vmem:[%s6197_s17 + $0x1568] sm:$0xff] }
 0x187   : > { %v4275_v10 = vpack.c.bf16 %v809_v2, %v801_v62  ;;  %v4281_v30 = vpack.c.bf16 %v824_v19, %v816_v4  ;;  %v864_v54 = vld [vmem:[%s6197_s17 + $0xf90] sm:$0xff]  ;;  %v1066_v62 = vld [vmem:[%s6197_s17 + $0x15e0] sm:$0xff]  ;;  %v913_v19 = vld [vmem:[%s6197_s17 + $0x1118] sm:$0xff] }
 0x188   : > { %4250 = vmatpush1.bf16.msra.mxu1 %v4249_v60  ;;  %v4509_v60 = vpack.c.bf16 %v970_v52, %v962_v51  ;;  %v1059_v51 = vld [vmem:[%s6197_s17 + $0x15a8] sm:$0xff]  ;;  %v872_v55 = vld [vmem:[%s6197_s17 + $0xfd0] sm:$0xff] }
 0x189   : > { %4252 = vmatprep.subr.bf16.mxu1 %v4251_v0  ;;  %4494 = vmatpush1.bf16.msra.mxu0 %v4493_v12  ;;  %v978_v0 = vld [vmem:[%s6197_s17 + $0x1320] sm:$0xff]  ;;  %v4515_v12 = vpack.c.bf16 %v1003_v5, %v995_v3  ;;  %v1067_v52 = vld [vmem:[%s6197_s17 + $0x15e8] sm:$0xff]  ;;  %v4293_v2 = vpack.c.bf16 %v872_v55, %v864_v54  ;;  %v880_v3 = vld [vmem:[%s6197_s17 + $0x1010] sm:$0xff] }
 0x18a   : > { %4496 = vmatprep.subr.bf16.mxu0 %v4495_v15  ;;  %v825_v15 = vld [vmem:[%s6197_s17 + $0xe58] sm:$0xff]  ;;  %v888_v5 = vld [vmem:[%s6197_s17 + $0x1050] sm:$0xff] }
 0x18b   : > { %v4279_v22 = vpack.c.bf16 %v825_v15, %v817_v11  ;;  %v1082_v11 = vld [vmem:[%s6197_s17 + $0x1660] sm:$0xff]  ;;  %v4297_v15 = vpack.c.bf16 %v888_v5, %v880_v3  ;;  %v961_v55 = vld [vmem:[%s6197_s17 + $0x1298] sm:$0xff] }
 0x18c   : > { %4254 = vmatpush1.bf16.msra.mxu1 %v4253_v9  ;;  %v4513_v9 = vpack.c.bf16 %v986_v1, %v978_v0  ;;  %v1075_v0 = vld [vmem:[%s6197_s17 + $0x1628] sm:$0xff]  ;;  %v977_v5 = vld [vmem:[%s6197_s17 + $0x1318] sm:$0xff] }
 0x18d   : > { %4256 = vmatprep.subr.bf16.mxu1 %v4255_v13  ;;  %4498 = vmatpush1.bf16.msra.mxu0 %v4497_v25  ;;  %v994_v13 = vld [vmem:[%s6197_s17 + $0x13a0] sm:$0xff]  ;;  %v4519_v25 = vpack.c.bf16 %v1019_v17, %v1011_v16  ;;  %v1083_v1 = vld [vmem:[%s6197_s17 + $0x1668] sm:$0xff]  ;;  %v896_v16 = vld [vmem:[%s6197_s17 + $0x1090] sm:$0xff] }
 0x18e   : > { %4500 = vmatprep.subr.bf16.mxu0 %v4499_v27  ;;  %v841_v27 = vld [vmem:[%s6197_s17 + $0xed8] sm:$0xff]  ;;  %v904_v17 = vld [vmem:[%s6197_s17 + $0x10d0] sm:$0xff] }
 0x18f   : > { %v4283_v34 = vpack.c.bf16 %v841_v27, %v833_v24  ;;  %v1098_v24 = vld [vmem:[%s6197_s17 + $0x16e0] sm:$0xff] }
 0x190   : > { %4258 = vmatpush1.bf16.msra.mxu1 %v4257_v21  ;;  %v4517_v21 = vpack.c.bf16 %v1002_v57, %v994_v13  ;;  %v1091_v13 = vld [vmem:[%s6197_s17 + $0x16a8] sm:$0xff]  ;;  %v5675_v27 = vld [vmem:[#allocation3 + $0x10] sm:$0xff] }
 0x191   : > { %4260 = vmatprep.subr.bf16.mxu1 %v4259_v23  ;;  %4502 = vmatpush1.bf16.msra.mxu0 %v4501_v36  ;;  %v1010_v23 = vld [vmem:[%s6197_s17 + $0x1420] sm:$0xff]  ;;  %v4523_v36 = vpack.c.bf16 %v1035_v29, %v1027_v28  ;;  %v1099_v57 = vld [vmem:[%s6197_s17 + $0x16e8] sm:$0xff]  ;;  %v4301_v28 = vpack.c.bf16 %v904_v17, %v896_v16  ;;  %v912_v29 = vld [vmem:[%s6197_s17 + $0x1110] sm:$0xff] }
 0x192   : > { %4504 = vmatprep.subr.bf16.mxu0 %v4503_v39  ;;  %v857_v39 = vld [vmem:[%s6197_s17 + $0xf58] sm:$0xff] }
 0x193   : > { %v4287_v45 = vpack.c.bf16 %v857_v39, %v849_v35  ;;  %v1106_v35 = vld [vmem:[%s6197_s17 + $0x1720] sm:$0xff]  ;;  %v1131_v39 = vld [vmem:[%s6197_s17 + $0x17e8] sm:$0xff] }
 0x194   : > { %4262 = vmatpush1.bf16.msra.mxu1 %v4261_v33  ;;  %v4521_v33 = vpack.c.bf16 %v1018_v26, %v1010_v23  ;;  %v1107_v23 = vld [vmem:[%s6197_s17 + $0x1728] sm:$0xff] }
 0x195   : > { %4264 = vmatprep.subr.bf16.mxu1 %v4263_v37  ;;  %4506 = vmatpush1.bf16.msra.mxu0 %v4505_v47  ;;  %v1026_v37 = vld [vmem:[%s6197_s17 + $0x14a0] sm:$0xff]  ;;  %v4527_v47 = vpack.c.bf16 %v1051_v40, %v1043_v14  ;;  %v1115_v26 = vld [vmem:[%s6197_s17 + $0x1768] sm:$0xff]  ;;  %v928_v40 = vld [vmem:[%s6197_s17 + $0x1190] sm:$0xff] }
 0x196   : > { %4508 = vmatprep.subr.bf16.mxu0 %v4507_v50  ;;  %v873_v50 = vld [vmem:[%s6197_s17 + $0xfd8] sm:$0xff] }
 0x197   : > { %v4291_v58 = vpack.c.bf16 %v873_v50, %v865_v46  ;;  %v1122_v46 = vld [vmem:[%s6197_s17 + $0x17a0] sm:$0xff] }
 0x198   : > { %4266 = vmatpush1.bf16.msra.mxu1 %v4265_v44  ;;  %v4525_v44 = vpack.c.bf16 %v1034_v38, %v1026_v37  ;;  %v937_v37 = vld [vmem:[%s6197_s17 + $0x11d8] sm:$0xff]  ;;  %v1123_v38 = vld [vmem:[%s6197_s17 + $0x17a8] sm:$0xff] }
 0x199   : > { %4268 = vmatprep.subr.bf16.mxu1 %v4267_v48  ;;  %4510 = vmatpush1.bf16.msra.mxu0 %v4509_v60  ;;  %v1042_v48 = vld [vmem:[%s6197_s17 + $0x1520] sm:$0xff]  ;;  %v4531_v60 = vpack.c.bf16 %v1067_v52, %v1059_v51  ;;  %v944_v51 = vld [vmem:[%s6197_s17 + $0x1210] sm:$0xff] }
 0x19a   : > { %4512 = vmatprep.subr.bf16.mxu0 %v4511_v63  ;;  %v889_v63 = vld [vmem:[%s6197_s17 + $0x1058] sm:$0xff]  ;;  %v952_v52 = vld [vmem:[%s6197_s17 + $0x1250] sm:$0xff] }
 0x19b   : > { %v4295_v7 = vpack.c.bf16 %v889_v63, %v881_v59  ;;  %v2106_v59 = vld [vmem:[%s6205_s6 + $0x30] sm:$0xff]  ;;  %v4313_v63 = vpack.c.bf16 %v952_v52, %v944_v51  ;;  %v1041_v52 = vld [vmem:[%s6197_s17 + $0x1518] sm:$0xff] }
 0x19c   : > { %4270 = vmatpush1.bf16.msra.mxu1 %v4269_v56  ;;  %v4529_v56 = vpack.c.bf16 %v1050_v49, %v1042_v48  ;;  %v2101_v48 = vld [vmem:[%s6205_s6 + $0x8] sm:$0xff]  ;;  %v2107_v49 = vld [vmem:[%s6205_s6 + $0x38] sm:$0xff] }
 0x19d   : > { %4272 = vmatprep.subr.bf16.mxu1 %v4271_v61  ;;  %4514 = vmatpush1.bf16.msra.mxu0 %v4513_v9  ;;  %v1058_v61 = vld [vmem:[%s6197_s17 + $0x15a0] sm:$0xff]  ;;  %v4535_v9 = vpack.c.bf16 %v1083_v1, %v1075_v0  ;;  %v960_v0 = vld [vmem:[%s6197_s17 + $0x1290] sm:$0xff] }
 0x19e   : > { %4516 = vmatprep.subr.bf16.mxu0 %v4515_v12  ;;  %v905_v12 = vld [vmem:[%s6197_s17 + $0x10d8] sm:$0xff]  ;;  %v968_v1 = vld [vmem:[%s6197_s17 + $0x12d0] sm:$0xff] }
 0x19f   : > { %v4299_v4 = vpack.c.bf16 %v905_v12, %v897_v8  ;;  %v2118_v8 = vld [vmem:[%s6205_s6 + $0x90] sm:$0xff]  ;;  %v6784_v12 = vld [vmem:[#allocation3 + $0x20] sm:$0xff] }
 0x1a0   : > { %4274 = vmatpush1.bf16.msra.mxu1 %v4273_v6  ;;  %v4533_v6 = vpack.c.bf16 %v1066_v62, %v1058_v61  ;;  %v2113_v61 = vld [vmem:[%s6205_s6 + $0x68] sm:$0xff]  ;;  %v2119_v62 = vld [vmem:[%s6205_s6 + $0x98] sm:$0xff] }
 0x1a1   : > { %4276 = vmatprep.subr.bf16.mxu1 %v4275_v10  ;;  %4518 = vmatpush1.bf16.msra.mxu0 %v4517_v21  ;;  %v1074_v10 = vld [vmem:[%s6197_s17 + $0x1620] sm:$0xff]  ;;  %v4539_v21 = vpack.c.bf16 %v1099_v57, %v1091_v13  ;;  %v4317_v13 = vpack.c.bf16 %v968_v1, %v960_v0  ;;  %v976_v57 = vld [vmem:[%s6197_s17 + $0x1310] sm:$0xff]  ;;  %v1057_v1 = vld [vmem:[%s6197_s17 + $0x1598] sm:$0xff] }
 0x1a2   : > { %4520 = vmatprep.subr.bf16.mxu0 %v4519_v25  ;;  %v921_v25 = vld [vmem:[%s6197_s17 + $0x1158] sm:$0xff] }
 0x1a3   : > { %v4303_v32 = vpack.c.bf16 %v921_v25, %v913_v19  ;;  %v2124_v19 = vld [vmem:[%s6205_s6 + $0xc0] sm:$0xff]  ;;  %v2143_v25 = vld [vmem:[%s6205_s6 + $0x158] sm:$0xff] }
 0x1a4   : > { %4278 = vmatpush1.bf16.msra.mxu1 %v4277_v18  ;;  %v4537_v18 = vpack.c.bf16 %v1082_v11, %v1074_v10  ;;  %v2125_v10 = vld [vmem:[%s6205_s6 + $0xc8] sm:$0xff]  ;;  %v2131_v11 = vld [vmem:[%s6205_s6 + $0xf8] sm:$0xff] }
 0x1a5   : > { %4280 = vmatprep.subr.bf16.mxu1 %v4279_v22  ;;  %4522 = vmatpush1.bf16.msra.mxu0 %v4521_v33  ;;  %v1090_v22 = vld [vmem:[%s6197_s17 + $0x16a0] sm:$0xff]  ;;  %v929_v33 = vld [vmem:[%s6197_s17 + $0x1198] sm:$0xff] }
 0x1a6   : > { %4524 = vmatprep.subr.bf16.mxu0 %v4523_v36  ;;  %v4541_v31 = vpack.c.bf16 %v1098_v24, %v1090_v22  ;;  %v1114_v36 = vld [vmem:[%s6197_s17 + $0x1760] sm:$0xff]  ;;  %v4307_v43 = vpack.c.bf16 %v937_v37, %v929_v33  ;;  %v1001_v22 = vld [vmem:[%s6197_s17 + $0x13d8] sm:$0xff] }
 0x1a7   : > { %v4545_v42 = vpack.c.bf16 %v1114_v36, %v1106_v35  ;;  %v2137_v24 = vld [vmem:[%s6205_s6 + $0x128] sm:$0xff]  ;;  %v2142_v33 = vld [vmem:[%s6205_s6 + $0x150] sm:$0xff]  ;;  %v2155_v36 = vld [vmem:[%s6205_s6 + $0x1b8] sm:$0xff] }
 0x1a8   : > { %4282 = vmatpush1.bf16.msra.mxu1 %v4281_v30  ;;  %v920_v30 = vld [vmem:[%s6197_s17 + $0x1150] sm:$0xff]  ;;  %v2149_v35 = vld [vmem:[%s6205_s6 + $0x188] sm:$0xff] }
 0x1a9   : > { %4284 = vmatprep.subr.bf16.mxu1 %v4283_v34  ;;  %4526 = vmatpush1.bf16.msra.mxu0 %v4525_v44  ;;  %v4543_v34 = vpack.c.bf16 %v1115_v26, %v1107_v23  ;;  %v4305_v14 = vpack.c.bf16 %v920_v30, %v912_v29  ;;  %v945_v44 = vld [vmem:[%s6197_s17 + $0x1218] sm:$0xff]  ;;  %v992_v26 = vld [vmem:[%s6197_s17 + $0x1390] sm:$0xff] }
 0x1aa   : > { %4528 = vmatprep.subr.bf16.mxu0 %v4527_v47  ;;  %v1130_v47 = vld [vmem:[%s6197_s17 + $0x17e0] sm:$0xff]  ;;  %v1009_v30 = vld [vmem:[%s6197_s17 + $0x1418] sm:$0xff] }
 0x1ac   : > { %4286 = vmatpush1.bf16.msra.mxu1 %v4285_v41  ;;  %v936_v41 = vld [vmem:[%s6197_s17 + $0x11d0] sm:$0xff] }
 0x1ad   : > { %4288 = vmatprep.subr.bf16.mxu1 %v4287_v45  ;;  %4530 = vmatpush1.bf16.msra.mxu0 %v4529_v56  ;;  %v4547_v45 = vpack.c.bf16 %v1131_v39, %v1123_v38  ;;  %v4309_v50 = vpack.c.bf16 %v936_v41, %v928_v40  ;;  %v4743_v56 = vpack.c.bf16 %v2107_v49, %v2101_v48  ;;  %v1008_v38 = vld [vmem:[%s6197_s17 + $0x1410] sm:$0xff]  ;;  %v1025_v41 = vld [vmem:[%s6197_s17 + $0x1498] sm:$0xff] }
 0x1ae   : > { %4532 = vmatprep.subr.bf16.mxu0 %v4531_v60  ;;  %v969_v60 = vld [vmem:[%s6197_s17 + $0x12d8] sm:$0xff]  ;;  %v1016_v39 = vld [vmem:[%s6197_s17 + $0x1450] sm:$0xff] }
 0x1af   : > { %v4315_v3 = vpack.c.bf16 %v969_v60, %v961_v55  ;;  %v1024_v48 = vld [vmem:[%s6197_s17 + $0x1490] sm:$0xff]  ;;  %v2166_v55 = vld [vmem:[%s6205_s6 + $0x210] sm:$0xff] }
 0x1b0   : > { %4290 = vmatpush1.bf16.msra.mxu1 %v4289_v53  ;;  %v4549_v53 = vpack.c.bf16 %v1130_v47, %v1122_v46  ;;  %v2161_v46 = vld [vmem:[%s6205_s6 + $0x1e8] sm:$0xff]  ;;  %v2167_v47 = vld [vmem:[%s6205_s6 + $0x218] sm:$0xff]  ;;  %v1032_v49 = vld [vmem:[%s6197_s17 + $0x14d0] sm:$0xff] }
 0x1b1   : > { %4292 = vmatprep.subr.bf16.mxu1 %v4291_v58  ;;  %4534 = vmatpush1.bf16.msra.mxu0 %v4533_v6  ;;  %v2100_v58 = vld [vmem:[%s6205_s6] sm:$0xff]  ;;  %v4747_v6 = vpack.c.bf16 %v2119_v62, %v2113_v61  ;;  %v4333_v60 = vpack.c.bf16 %v1032_v49, %v1024_v48 }
 0x1b2   : > { %4536 = vmatprep.subr.bf16.mxu0 %v4535_v9  ;;  %v985_v9 = vld [vmem:[%s6197_s17 + $0x1358] sm:$0xff]  ;;  %v1040_v61 = vld [vmem:[%s6197_s17 + $0x1510] sm:$0xff] }
 0x1b3   : > { %v4319_v17 = vpack.c.bf16 %v985_v9, %v977_v5  ;;  %v1048_v62 = vld [vmem:[%s6197_s17 + $0x1550] sm:$0xff]  ;;  %v2178_v5 = vld [vmem:[%s6205_s6 + $0x270] sm:$0xff] }
 0x1b4   : > { %4294 = vmatpush1.bf16.msra.mxu1 %v4293_v2  ;;  %v4745_v2 = vpack.c.bf16 %v2106_v59, %v2100_v58  ;;  %v2173_v58 = vld [vmem:[%s6205_s6 + $0x248] sm:$0xff]  ;;  %v2179_v59 = vld [vmem:[%s6205_s6 + $0x278] sm:$0xff]  ;;  %v1112_v48 = vld [vmem:[%s6197_s17 + $0x1750] sm:$0xff] }
 0x1b5   : > { %4296 = vmatprep.subr.bf16.mxu1 %v4295_v7  ;;  %4538 = vmatpush1.bf16.msra.mxu0 %v4537_v18  ;;  %v2112_v7 = vld [vmem:[%s6205_s6 + $0x60] sm:$0xff]  ;;  %v993_v18 = vld [vmem:[%s6197_s17 + $0x1398] sm:$0xff] }
 0x1b6   : > { %4540 = vmatprep.subr.bf16.mxu0 %v4539_v21  ;;  %v4749_v16 = vpack.c.bf16 %v2118_v8, %v2112_v7  ;;  %v2130_v21 = vld [vmem:[%s6205_s6 + $0xf0] sm:$0xff]  ;;  %v4323_v29 = vpack.c.bf16 %v1001_v22, %v993_v18  ;;  %v2185_v7 = vld [vmem:[%s6205_s6 + $0x2a8] sm:$0xff]  ;;  %v2191_v8 = vld [vmem:[%s6205_s6 + $0x2d8] sm:$0xff] }
 0x1b7   : > { %1525 = vmatmul.mubr.f32.vlgmr.msra.gmra.mrb[2].mxu1 %v5675_v27  ;;  %v1000_v27 = vld [vmem:[%s6197_s17 + $0x13d0] sm:$0xff]  ;;  %v4771_v18 = vpack.c.bf16 %v2191_v8, %v2185_v7  ;;  %v2197_v22 = vld [vmem:[%s6205_s6 + $0x308] sm:$0xff]  ;;  %v2251_v7 = vld [vmem:[%s6205_s6 + $0x4b8] sm:$0xff] }
 0x1b8   : > { %4298 = vmatpush1.bf16.msra.mxu1 %v4297_v15  ;;  %1595 = vmatprep.mubr.f32.mxu1 %v6660_v20  ;;  %v953_v20 = vld [vmem:[%s6197_s17 + $0x1258] sm:$0xff]  ;;  %v984_v15 = vld [vmem:[%s6197_s17 + $0x1350] sm:$0xff]  ;;  %v4325_v37 = vpack.c.bf16 %v1000_v27, %v992_v26 }
 0x1b9   : > { %4300 = vmatprep.subr.bf16.mxu1 %v4299_v4  ;;  %4542 = vmatpush1.bf16.msra.mxu0 %v4541_v31  ;;  %v4311_v54 = vpack.c.bf16 %v953_v20, %v945_v44  ;;  %v4751_v4 = vpack.c.bf16 %v2131_v11, %v2125_v10  ;;  %v4321_v23 = vpack.c.bf16 %v984_v15, %v976_v57  ;;  %v2154_v44 = vld [vmem:[%s6205_s6 + $0x1b0] sm:$0xff]  ;;  %v1064_v57 = vld [vmem:[%s6197_s17 + $0x15d0] sm:$0xff] }
 0x1ba   : > { %4544 = vmatprep.subr.bf16.mxu0 %v4543_v34  ;;  %v4755_v31 = vpack.c.bf16 %v2143_v25, %v2137_v24  ;;  %v1017_v34 = vld [vmem:[%s6197_s17 + $0x1458] sm:$0xff]  ;;  %v4329_v20 = vpack.c.bf16 %v1016_v39, %v1008_v38  ;;  %v4337_v11 = vpack.c.bf16 %v1048_v62, %v1040_v61  ;;  %v2203_v24 = vld [vmem:[%s6205_s6 + $0x338] sm:$0xff]  ;;  %v1080_v26 = vld [vmem:[%s6197_s17 + $0x1650] sm:$0xff] }
 0x1bb   : > { %v4327_v40 = vpack.c.bf16 %v1017_v34, %v1009_v30  ;;  %v4775_v30 = vpack.c.bf16 %v2203_v24, %v2197_v22  ;;  %v2209_v34 = vld [vmem:[%s6205_s6 + $0x368] sm:$0xff]  ;;  %v1096_v38 = vld [vmem:[%s6197_s17 + $0x16d0] sm:$0xff]  ;;  %v2263_v22 = vld [vmem:[%s6205_s6 + $0x518] sm:$0xff] }
 0x1bc   : > { %4302 = vmatpush1.bf16.msra.mxu1 %v4301_v28  ;;  %v4753_v28 = vpack.c.bf16 %v2130_v21, %v2124_v19  ;;  %v2190_v19 = vld [vmem:[%s6205_s6 + $0x2d0] sm:$0xff]  ;;  %v1081_v21 = vld [vmem:[%s6197_s17 + $0x1658] sm:$0xff]  ;;  %v1128_v61 = vld [vmem:[%s6197_s17 + $0x17d0] sm:$0xff] }
 0x1bd   : > { %4304 = vmatprep.subr.bf16.mxu1 %v4303_v32  ;;  %4546 = vmatpush1.bf16.msra.mxu0 %v4545_v42  ;;  %v2136_v32 = vld [vmem:[%s6205_s6 + $0x120] sm:$0xff]  ;;  %v4759_v42 = vpack.c.bf16 %v2155_v36, %v2149_v35  ;;  %v2215_v35 = vld [vmem:[%s6205_s6 + $0x398] sm:$0xff] }
 0x1be   : > { %4548 = vmatprep.subr.bf16.mxu0 %v4547_v45  ;;  %v1033_v45 = vld [vmem:[%s6197_s17 + $0x14d8] sm:$0xff] }
 0x1bf   : > { %v4331_v51 = vpack.c.bf16 %v1033_v45, %v1025_v41  ;;  %v4779_v41 = vpack.c.bf16 %v2215_v35, %v2209_v34  ;;  %v2221_v45 = vld [vmem:[%s6205_s6 + $0x3c8] sm:$0xff]  ;;  %v2275_v34 = vld [vmem:[%s6205_s6 + $0x578] sm:$0xff] }
 0x1c0   : > { %4306 = vmatpush1.bf16.msra.mxu1 %v4305_v14  ;;  %v4757_v14 = vpack.c.bf16 %v2142_v33, %v2136_v32  ;;  %v2202_v32 = vld [vmem:[%s6205_s6 + $0x330] sm:$0xff]  ;;  %v1097_v33 = vld [vmem:[%s6197_s17 + $0x16d8] sm:$0xff] }
 0x1c1   : > { %4308 = vmatprep.subr.bf16.mxu1 %v4307_v43  ;;  %4550 = vmatpush1.bf16.msra.mxu0 %v4549_v53  ;;  %v2148_v43 = vld [vmem:[%s6205_s6 + $0x180] sm:$0xff]  ;;  %v4763_v53 = vpack.c.bf16 %v2167_v47, %v2161_v46  ;;  %v2227_v46 = vld [vmem:[%s6205_s6 + $0x3f8] sm:$0xff] }
 0x1c2   : > { %4744 = vmatprep.subr.bf16.mxu0 %v4743_v56  ;;  %v1049_v56 = vld [vmem:[%s6197_s17 + $0x1558] sm:$0xff] }
 0x1c3   : > { %v4335_v0 = vpack.c.bf16 %v1049_v56, %v1041_v52  ;;  %v4783_v52 = vpack.c.bf16 %v2227_v46, %v2221_v45  ;;  %v2233_v56 = vld [vmem:[%s6205_s6 + $0x428] sm:$0xff]  ;;  %v1136_v46 = vlaneseq }
 0x1c4   : > { %4310 = vmatpush1.bf16.msra.mxu1 %v4309_v50  ;;  %1809 = vmatmul.mubr.f32.vlgmr.msra.gmra.mrb[2].mxu0 %v6784_v12  ;;  %v4761_v50 = vpack.c.bf16 %v2154_v44, %v2148_v43  ;;  %v2214_v43 = vld [vmem:[%s6205_s6 + $0x390] sm:$0xff]  ;;  %v1113_v44 = vld [vmem:[%s6197_s17 + $0x1758] sm:$0xff] }
 0x1c5   : > { %4312 = vmatprep.subr.bf16.mxu1 %v4311_v54  ;;  %4746 = vmatpush1.bf16.msra.mxu0 %v4745_v2  ;;  %v2160_v54 = vld [vmem:[%s6205_s6 + $0x1e0] sm:$0xff]  ;;  %v4767_v2 = vpack.c.bf16 %v2179_v59, %v2173_v58  ;;  %v2239_v58 = vld [vmem:[%s6205_s6 + $0x458] sm:$0xff]  ;;  %v5677_v45 = vld [vmem:[#allocation3 + $0x8] sm:$0xff] }
 0x1c6   : > { %4748 = vmatprep.subr.bf16.mxu0 %v4747_v6  ;;  %v1065_v6 = vld [vmem:[%s6197_s17 + $0x15d8] sm:$0xff] }
 0x1c8   : > { %4314 = vmatpush1.bf16.msra.mxu1 %v4313_v63  ;;  %v4765_v63 = vpack.c.bf16 %v2166_v55, %v2160_v54  ;;  %v2226_v54 = vld [vmem:[%s6205_s6 + $0x3f0] sm:$0xff]  ;;  %v1129_v55 = vld [vmem:[%s6197_s17 + $0x17d8] sm:$0xff] }
 0x1c9   : > { %4316 = vmatprep.subr.bf16.mxu1 %v4315_v3  ;;  %4750 = vmatpush1.bf16.msra.mxu0 %v4749_v16  ;;  %v2172_v3 = vld [vmem:[%s6205_s6 + $0x240] sm:$0xff]  ;;  %v4339_v16 = vpack.c.bf16 %v1065_v6, %v1057_v1  ;;  %v4787_v1 = vpack.c.bf16 %v2239_v58, %v2233_v56  ;;  %v2245_v6 = vld [vmem:[%s6205_s6 + $0x488] sm:$0xff]  ;;  %v6902_v56 = vshrl.u32 %v1136_v46, 7 }
 0x1ca   : > { %4752 = vmatprep.subr.bf16.mxu0 %v4751_v4  ;;  %v4769_v15 = vpack.c.bf16 %v2178_v5, %v2172_v3  ;;  %v2184_v4 = vld [vmem:[%s6205_s6 + $0x2a0] sm:$0xff]  ;;  %v2238_v3 = vld [vmem:[%s6205_s6 + $0x450] sm:$0xff]  ;;  %v381_v5 = vld [vmem:[%s6197_s17 + $0x78] sm:$0xff] }
 0x1cb   : > { %v4773_v27 = vpack.c.bf16 %v2190_v19, %v2184_v4  ;;  %v2250_v4 = vld [vmem:[%s6205_s6 + $0x4b0] sm:$0xff]  ;;  %v397_v19 = vld [vmem:[%s6197_s17 + $0xf8] sm:$0xff] }
 0x1cc   : > { %4318 = vmatpush1.bf16.msra.mxu1 %v4317_v13  ;;  %v1056_v13 = vld [vmem:[%s6197_s17 + $0x1590] sm:$0xff] }
 0x1cd   : > { %4320 = vmatprep.subr.bf16.mxu1 %v4319_v17  ;;  %4754 = vmatpush1.bf16.msra.mxu0 %v4753_v28  ;;  %v1073_v17 = vld [vmem:[%s6197_s17 + $0x1618] sm:$0xff]  ;;  %v4341_v25 = vpack.c.bf16 %v1064_v57, %v1056_v13  ;;  %v380_v13 = vld [vmem:[%s6197_s17 + $0x70] sm:$0xff] }
 0x1ce   : > { %4756 = vmatprep.subr.bf16.mxu0 %v4755_v31  ;;  %v4343_v28 = vpack.c.bf16 %v1081_v21, %v1073_v17  ;;  %v2196_v31 = vld [vmem:[%s6205_s6 + $0x300] sm:$0xff]  ;;  %v4791_v17 = vpack.c.bf16 %v2251_v7, %v2245_v6  ;;  %v2257_v21 = vld [vmem:[%s6205_s6 + $0x4e8] sm:$0xff] }
 0x1cf   : > { %v4777_v39 = vpack.c.bf16 %v2202_v32, %v2196_v31  ;;  %v2262_v31 = vld [vmem:[%s6205_s6 + $0x510] sm:$0xff]  ;;  %v413_v32 = vld [vmem:[%s6197_s17 + $0x178] sm:$0xff]  ;;  %v452_v7 = vld [vmem:[%s6197_s17 + $0x2b0] sm:$0xff] }
 0x1d0   : > { %4322 = vmatpush1.bf16.msra.mxu1 %v4321_v23  ;;  %v1072_v23 = vld [vmem:[%s6197_s17 + $0x1610] sm:$0xff] }
 0x1d1   : > { %4324 = vmatprep.subr.bf16.mxu1 %v4323_v29  ;;  %4758 = vmatpush1.bf16.msra.mxu0 %v4757_v14  ;;  %v1089_v29 = vld [vmem:[%s6197_s17 + $0x1698] sm:$0xff]  ;;  %v4345_v36 = vpack.c.bf16 %v1080_v26, %v1072_v23  ;;  %v396_v23 = vld [vmem:[%s6197_s17 + $0xf0] sm:$0xff] }
 0x1d2   : > { %4760 = vmatprep.subr.bf16.mxu0 %v4759_v42  ;;  %v4347_v14 = vpack.c.bf16 %v1097_v33, %v1089_v29  ;;  %v2208_v42 = vld [vmem:[%s6205_s6 + $0x360] sm:$0xff]  ;;  %v4795_v29 = vpack.c.bf16 %v2263_v22, %v2257_v21  ;;  %v2269_v33 = vld [vmem:[%s6205_s6 + $0x548] sm:$0xff] }
 0x1d3   : > { %v4781_v49 = vpack.c.bf16 %v2214_v43, %v2208_v42  ;;  %v2274_v42 = vld [vmem:[%s6205_s6 + $0x570] sm:$0xff]  ;;  %v429_v43 = vld [vmem:[%s6197_s17 + $0x1f8] sm:$0xff] }
 0x1d4   : > { %4326 = vmatpush1.bf16.msra.mxu1 %v4325_v37  ;;  %v1088_v37 = vld [vmem:[%s6197_s17 + $0x1690] sm:$0xff]  ;;  %v485_v21 = vld [vmem:[%s6197_s17 + $0x3b8] sm:$0xff] }
 0x1d5   : > { %4328 = vmatprep.subr.bf16.mxu1 %v4327_v40  ;;  %4762 = vmatpush1.bf16.msra.mxu0 %v4761_v50  ;;  %v1105_v40 = vld [vmem:[%s6197_s17 + $0x1718] sm:$0xff]  ;;  %v4349_v47 = vpack.c.bf16 %v1096_v38, %v1088_v37  ;;  %v412_v37 = vld [vmem:[%s6197_s17 + $0x170] sm:$0xff] }
 0x1d6   : > { %4764 = vmatprep.subr.bf16.mxu0 %v4763_v53  ;;  %v4351_v50 = vpack.c.bf16 %v1113_v44, %v1105_v40  ;;  %v2220_v53 = vld [vmem:[%s6205_s6 + $0x3c0] sm:$0xff]  ;;  %v4799_v40 = vpack.c.bf16 %v2275_v34, %v2269_v33  ;;  %v2281_v44 = vld [vmem:[%s6205_s6 + $0x5a8] sm:$0xff] }
 0x1d7   : > { %v6827_v9 = vpop.f32.mrb[0].mxu0  ;;  %v4785_v62 = vpack.c.bf16 %v2226_v54, %v2220_v53  ;;  %v2286_v53 = vld [vmem:[%s6205_s6 + $0x5d0] sm:$0xff]  ;;  %v437_v54 = vld [vmem:[%s6197_s17 + $0x238] sm:$0xff] }
 0x1d8   : > { %4330 = vmatpush1.bf16.msra.mxu1 %v4329_v20  ;;  %v6829_v10 = vpop.f32.mrb[1].mxu0  ;;  %v1104_v20 = vld [vmem:[%s6197_s17 + $0x1710] sm:$0xff]  ;;  %v493_v22 = vld [vmem:[%s6197_s17 + $0x3f8] sm:$0xff] }
 0x1d9   : > { %4332 = vmatprep.subr.bf16.mxu1 %v4331_v51  ;;  %4766 = vmatpush1.bf16.msra.mxu0 %v4765_v63  ;;  %v1121_v51 = vld [vmem:[%s6197_s17 + $0x1798] sm:$0xff]  ;;  %v4353_v59 = vpack.c.bf16 %v1112_v48, %v1104_v20  ;;  %v420_v20 = vld [vmem:[%s6197_s17 + $0x1b0] sm:$0xff] }
 0x1da   : > { %4768 = vmatprep.subr.bf16.mxu0 %v4767_v2  ;;  %v4355_v63 = vpack.c.bf16 %v1129_v55, %v1121_v51  ;;  %v2232_v2 = vld [vmem:[%s6205_s6 + $0x420] sm:$0xff]  ;;  %v445_v55 = vld [vmem:[%s6197_s17 + $0x278] sm:$0xff] }
 0x1db   : > { %v4789_v57 = vpack.c.bf16 %v2238_v3, %v2232_v2  ;;  %v1134_v3 = vld [vmem:[%s6203_s7] sm:$0xff]  ;;  %v509_v33 = vld [vmem:[%s6197_s17 + $0x478] sm:$0xff] }
 0x1dc   : > { %4334 = vmatpush1.bf16.msra.mxu1 %v4333_v60  ;;  %v1120_v60 = vld [vmem:[%s6197_s17 + $0x1790] sm:$0xff] }
 0x1dd   : > { %4336 = vmatprep.subr.bf16.mxu1 %v4335_v0  ;;  %4770 = vmatpush1.bf16.msra.mxu0 %v4769_v15  ;;  %v373_v0 = vld [vmem:[%s6197_s17 + $0x38] sm:$0xff]  ;;  %v4357_v8 = vpack.c.bf16 %v1128_v61, %v1120_v60  ;;  %v4567_v60 = vpack.c.bf16 %v445_v55, %v437_v54  ;;  %v436_v61 = vld [vmem:[%s6197_s17 + $0x230] sm:$0xff] }
 0x1de   : > { %4772 = vmatprep.subr.bf16.mxu0 %v4771_v18  ;;  %v4551_v15 = vpack.c.bf16 %v381_v5, %v373_v0  ;;  %v2244_v18 = vld [vmem:[%s6205_s6 + $0x480] sm:$0xff]  ;;  %v461_v0 = vld [vmem:[%s6197_s17 + $0x2f8] sm:$0xff]  ;;  %v1142_v5 = vsub.s32 1, %v6902_v56 }
 0x1df   : > { %v4793_v26 = vpack.c.bf16 %v2250_v4, %v2244_v18  ;;  %v468_v18 = vld [vmem:[%s6197_s17 + $0x330] sm:$0xff]  ;;  %v549_v55 = vld [vmem:[%s6197_s17 + $0x5b8] sm:$0xff] }
 0x1e0   : > { %4338 = vmatpush1.bf16.msra.mxu1 %v4337_v11  ;;  %v372_v11 = vld [vmem:[%s6197_s17 + $0x30] sm:$0xff] }
 0x1e1   : > { %4340 = vmatprep.subr.bf16.mxu1 %v4339_v16  ;;  %4774 = vmatpush1.bf16.msra.mxu0 %v4773_v27  ;;  %v389_v16 = vld [vmem:[%s6197_s17 + $0xb8] sm:$0xff]  ;;  %v4553_v24 = vpack.c.bf16 %v380_v13, %v372_v11  ;;  %v476_v4 = vld [vmem:[%s6197_s17 + $0x370] sm:$0xff] }
 0x1e2   : > { %4776 = vmatprep.subr.bf16.mxu0 %v4775_v30  ;;  %v4555_v27 = vpack.c.bf16 %v397_v19, %v389_v16  ;;  %v2256_v30 = vld [vmem:[%s6205_s6 + $0x4e0] sm:$0xff]  ;;  %v469_v11 = vld [vmem:[%s6197_s17 + $0x338] sm:$0xff] }
 0x1e3   : > { %v4797_v38 = vpack.c.bf16 %v2262_v31, %v2256_v30  ;;  %v477_v13 = vld [vmem:[%s6197_s17 + $0x378] sm:$0xff]  ;;  %v492_v30 = vld [vmem:[%s6197_s17 + $0x3f0] sm:$0xff] }
 0x1e4   : > { %4342 = vmatpush1.bf16.msra.mxu1 %v4341_v25  ;;  %v388_v25 = vld [vmem:[%s6197_s17 + $0xb0] sm:$0xff] }
 0x1e5   : > { %4344 = vmatprep.subr.bf16.mxu1 %v4343_v28  ;;  %4778 = vmatpush1.bf16.msra.mxu0 %v4777_v39  ;;  %v405_v28 = vld [vmem:[%s6197_s17 + $0x138] sm:$0xff]  ;;  %v4557_v35 = vpack.c.bf16 %v396_v23, %v388_v25  ;;  %v540_v54 = vld [vmem:[%s6197_s17 + $0x570] sm:$0xff] }
 0x1e6   : > { %4780 = vmatprep.subr.bf16.mxu0 %v4779_v41  ;;  %v4559_v39 = vpack.c.bf16 %v413_v32, %v405_v28  ;;  %v2268_v41 = vld [vmem:[%s6205_s6 + $0x540] sm:$0xff]  ;;  %v4579_v28 = vpack.c.bf16 %v493_v22, %v485_v21  ;;  %v501_v32 = vld [vmem:[%s6197_s17 + $0x438] sm:$0xff]  ;;  %v2298_v22 = vld [vmem:[%s6205_s6 + $0x630] sm:$0xff] }
 0x1e7   : > { %v4801_v48 = vpack.c.bf16 %v2274_v42, %v2268_v41  ;;  %v2292_v21 = vld [vmem:[%s6205_s6 + $0x600] sm:$0xff] }
 0x1e8   : > { %4346 = vmatpush1.bf16.msra.mxu1 %v4345_v36  ;;  %v404_v36 = vld [vmem:[%s6197_s17 + $0x130] sm:$0xff] }
 0x1e9   : > { %4348 = vmatprep.subr.bf16.mxu1 %v4347_v14  ;;  %4782 = vmatpush1.bf16.msra.mxu0 %v4781_v49  ;;  %v421_v14 = vld [vmem:[%s6197_s17 + $0x1b8] sm:$0xff] }
 0x1ea   : > { %4784 = vmatprep.subr.bf16.mxu0 %v4783_v52  ;;  %v4563_v49 = vpack.c.bf16 %v429_v43, %v421_v14  ;;  %v2280_v52 = vld [vmem:[%s6205_s6 + $0x5a0] sm:$0xff] }
 0x1ec   : > { %4350 = vmatpush1.bf16.msra.mxu1 %v4349_v47  ;;  %v4561_v47 = vpack.c.bf16 %v412_v37, %v404_v36 }
 0x1ed   : > { %4352 = vmatprep.subr.bf16.mxu1 %v4351_v50  ;;  %4786 = vmatpush1.bf16.msra.mxu0 %v4785_v62  ;;  %v428_v50 = vld [vmem:[%s6197_s17 + $0x1f0] sm:$0xff] }
 0x1ee   : > { %4788 = vmatprep.subr.bf16.mxu0 %v4787_v1  ;;  %v4565_v58 = vpack.c.bf16 %v428_v50, %v420_v20  ;;  %v444_v62 = vld [vmem:[%s6197_s17 + $0x270] sm:$0xff]  ;;  %v1138_v1 = vsub.s32 0, %v6902_v56  ;;  %v541_v50 = vld [vmem:[%s6197_s17 + $0x578] sm:$0xff] }
 0x1ef   : > { %v4569_v2 = vpack.c.bf16 %v444_v62, %v436_v61  ;;  %v524_v20 = vld [vmem:[%s6197_s17 + $0x4f0] sm:$0xff] }
 0x1f0   : > { %4354 = vmatpush1.bf16.msra.mxu1 %v4353_v59  ;;  %v4805_v59 = vpack.c.bf16 %v2286_v53, %v2280_v52  ;;  %v532_v53 = vld [vmem:[%s6197_s17 + $0x530] sm:$0xff] }
 0x1f1   : > { %4356 = vmatprep.subr.bf16.mxu1 %v4355_v63  ;;  %4790 = vmatpush1.bf16.msra.mxu0 %v4789_v57  ;;  %v453_v63 = vld [vmem:[%s6197_s17 + $0x2b8] sm:$0xff]  ;;  %v1139_v57 = vrot.slane %v1134_v3, %v1138_v1  ;;  %v548_v61 = vld [vmem:[%s6197_s17 + $0x5b0] sm:$0xff] }
 0x1f2   : > { %4792 = vmatprep.subr.bf16.mxu0 %v4791_v17  ;;  %v4571_v6 = vpack.c.bf16 %v461_v0, %v453_v63  ;;  %v4575_v17 = vpack.c.bf16 %v477_v13, %v469_v11  ;;  %v556_v62 = vld [vmem:[%s6197_s17 + $0x5f0] sm:$0xff]  ;;  %v565_v63 = vld [vmem:[%s6197_s17 + $0x638] sm:$0xff] }
 0x1f3   : > { %v573_v0 = vld [vmem:[%s6197_s17 + $0x678] sm:$0xff] }
 0x1f4   : > { %4358 = vmatpush1.bf16.msra.mxu1 %v4357_v8  ;;  %v460_v8 = vld [vmem:[%s6197_s17 + $0x2f0] sm:$0xff]  ;;  %v581_v11 = vld [vmem:[%s6197_s17 + $0x6b8] sm:$0xff] }
 0x1f5   : > { %4552 = vmatprep.subr.bf16.mxu1 %v4551_v15  ;;  %4794 = vmatpush1.bf16.msra.mxu0 %v4793_v26  ;;  %v1143_v15 = vrot.slane %v1134_v3, %v1142_v5  ;;  %v4573_v16 = vpack.c.bf16 %v460_v8, %v452_v7  ;;  %v4577_v26 = vpack.c.bf16 %v476_v4, %v468_v18  ;;  %v564_v7 = vld [vmem:[%s6197_s17 + $0x630] sm:$0xff] }
 0x1f6   : > { %4796 = vmatprep.subr.bf16.mxu0 %v4795_v29  ;;  %v484_v29 = vld [vmem:[%s6197_s17 + $0x3b0] sm:$0xff] }
 0x1f7   : > { %1596 = vmatmul.mubr.f32.vlgmr.msra.gmra.mrb[2].mxu1 %v6784_v12  ;;  %v2287_v12 = vld [vmem:[%s6205_s6 + $0x5d8] sm:$0xff]  ;;  %v4581_v36 = vpack.c.bf16 %v492_v30, %v484_v29  ;;  %v572_v8 = vld [vmem:[%s6197_s17 + $0x670] sm:$0xff]  ;;  %v597_v30 = vld [vmem:[%s6197_s17 + $0x738] sm:$0xff] }
 0x1f8   : > { %4554 = vmatpush1.bf16.msra.mxu1 %v4553_v24  ;;  %1879 = vmatprep.mubr.f32.mxu1 %v5677_v45  ;;  %v4803_v51 = vpack.c.bf16 %v2287_v12, %v2281_v44  ;;  %v588_v29 = vld [vmem:[%s6197_s17 + $0x6f0] sm:$0xff] }
 0x1f9   : > { %4556 = vmatprep.subr.bf16.mxu1 %v4555_v27  ;;  %4798 = vmatpush1.bf16.msra.mxu0 %v4797_v38  ;;  %v500_v38 = vld [vmem:[%s6197_s17 + $0x430] sm:$0xff] }
 0x1fa   : > { %4800 = vmatprep.subr.bf16.mxu0 %v4799_v40  ;;  %v517_v40 = vld [vmem:[%s6197_s17 + $0x4b8] sm:$0xff] }
 0x1fc   : > { %4558 = vmatpush1.bf16.msra.mxu1 %v4557_v35 }
 0x1fd   : > { %4560 = vmatprep.subr.bf16.mxu1 %v4559_v39  ;;  %4802 = vmatpush1.bf16.msra.mxu0 %v4801_v48  ;;  %v508_v39 = vld [vmem:[%s6197_s17 + $0x470] sm:$0xff] }
 0x1fe   : > { %4804 = vmatprep.subr.bf16.mxu0 %v4803_v51  ;;  %v4585_v12 = vpack.c.bf16 %v508_v39, %v500_v38  ;;  %v596_v39 = vld [vmem:[%s6197_s17 + $0x730] sm:$0xff] }
 0x200   : > { %4562 = vmatpush1.bf16.msra.mxu1 %v4561_v47  ;;  %v516_v47 = vld [vmem:[%s6197_s17 + $0x4b0] sm:$0xff] }
 0x201   : > { %4564 = vmatprep.subr.bf16.mxu1 %v4563_v49  ;;  %4806 = vmatpush1.bf16.msra.mxu0 %v4805_v59  ;;  %v533_v49 = vld [vmem:[%s6197_s17 + $0x538] sm:$0xff]  ;;  %v4589_v51 = vpack.c.bf16 %v524_v20, %v516_v47  ;;  %v4593_v59 = vpack.c.bf16 %v540_v54, %v532_v53  ;;  %v612_v20 = vld [vmem:[%s6197_s17 + $0x7b0] sm:$0xff]  ;;  %v2335_v53 = vld [vmem:[%s6205_s6 + $0x758] sm:$0xff] }
 0x202   : > { %v4591_v52 = vpack.c.bf16 %v541_v50, %v533_v49  ;;  %v629_v49 = vld [vmem:[%s6197_s17 + $0x838] sm:$0xff] }
 0x204   : > { %4566 = vmatpush1.bf16.msra.mxu1 %v4565_v58  ;;  %v557_v58 = vld [vmem:[%s6197_s17 + $0x5f8] sm:$0xff] }
 0x205   : > { %4568 = vmatprep.subr.bf16.mxu1 %v4567_v60  ;;  %v4595_v60 = vpack.c.bf16 %v557_v58, %v549_v55  ;;  %v2328_v55 = vld [vmem:[%s6205_s6 + $0x720] sm:$0xff]  ;;  %v2334_v58 = vld [vmem:[%s6205_s6 + $0x750] sm:$0xff] }
 0x208   : > { %4570 = vmatpush1.bf16.msra.mxu1 %v4569_v2  ;;  %v4597_v2 = vpack.c.bf16 %v556_v62, %v548_v61  ;;  %v628_v61 = vld [vmem:[%s6197_s17 + $0x830] sm:$0xff] }
 0x209   : > { %4572 = vmatprep.subr.bf16.mxu1 %v4571_v6  ;;  %v4599_v6 = vpack.c.bf16 %v573_v0, %v565_v63  ;;  %v636_v62 = vld [vmem:[%s6197_s17 + $0x870] sm:$0xff]  ;;  %v645_v63 = vld [vmem:[%s6197_s17 + $0x8b8] sm:$0xff]  ;;  %v4821_v0 = vpack.c.bf16 %v2334_v58, %v2328_v55  ;;  %v2395_v58 = vld [vmem:[%s6205_s6 + $0x938] sm:$0xff] }
 0x20a   : > { %v1313_v19 = vpop.f32.mrb[0].mxu1  ;;  %v2389_v55 = vld [vmem:[%s6205_s6 + $0x908] sm:$0xff] }
 0x20b   : > { %v5511_v24 = vadd.f32 %v1313_v19, %v1139_v57  ;;  %v1315_v25 = vpop.f32.mrb[1].mxu1 }
 0x20c   : > { %v5513_v23 = vadd.f32 %v1315_v25, %v1143_v15  ;;  %4574 = vmatpush1.bf16.msra.mxu1 %v4573_v16  ;;  %v589_v15 = vld [vmem:[%s6197_s17 + $0x6f8] sm:$0xff]  ;;  %v4601_v25 = vpack.c.bf16 %v572_v8, %v564_v7  ;;  %v2340_v8 = vld [vmem:[%s6205_s6 + $0x780] sm:$0xff] }
 0x20d   : > { %v6924_v27 = vadd.f32 %v5511_v24, %v6827_v9  ;;  %4576 = vmatprep.subr.bf16.mxu1 %v4575_v17  ;;  %v4583_v9 = vpack.c.bf16 %v509_v33, %v501_v32  ;;  %v2293_v16 = vld [vmem:[%s6205_s6 + $0x608] sm:$0xff]  ;;  %v2299_v17 = vld [vmem:[%s6205_s6 + $0x638] sm:$0xff] }
 0x20e   : > { %v5514_v31 = vadd.f32 %v5513_v23, %v6829_v10  ;;  %v525_v10 = vld [vmem:[%s6197_s17 + $0x4f8] sm:$0xff]  ;;  %v4807_v19 = vpack.c.bf16 %v2299_v17, %v2293_v16  ;;  %v652_v16 = vld [vmem:[%s6197_s17 + $0x8f0] sm:$0xff] }
 0x20f   : > { %v2044_v34 = vmul.f32 %v6924_v27, %v6924_v27  ;;  %v2036_v41 = vmul.f32 0.7978846, %v6924_v27  ;;  %v4587_v46 = vpack.c.bf16 %v525_v10, %v517_v40  ;;  %v2028_v24 = vmul.f32 0.5, %v6924_v27  ;;  %v605_v33 = vld [vmem:[%s6197_s17 + $0x778] sm:$0xff] }
 0x210   : > { %v2045_v35 = vmul.f32 %v5514_v31, %v5514_v31  ;;  %4578 = vmatpush1.bf16.msra.mxu1 %v4577_v26  ;;  %v2037_v43 = vmul.f32 0.7978846, %v5514_v31  ;;  %v2029_v18 = vmul.f32 0.5, %v5514_v31  ;;  %v4603_v26 = vpack.c.bf16 %v589_v15, %v581_v11  ;;  %4808 = vmatprep.subr.bf16.mxu0 %v4807_v19  ;;  %v2305_v27 = vld [vmem:[%s6205_s6 + $0x668] sm:$0xff]  ;;  %v2346_v11 = vld [vmem:[%s6205_s6 + $0x7b0] sm:$0xff]  ;;  %v644_v15 = vld [vmem:[%s6197_s17 + $0x8b0] sm:$0xff] }
 0x211   : > { %v2052_v37 = vmul.f32 0.044715, %v2044_v34  ;;  %4580 = vmatprep.subr.bf16.mxu1 %v4579_v28  ;;  %v580_v28 = vld [vmem:[%s6197_s17 + $0x6b0] sm:$0xff]  ;;  %v4809_v31 = vpack.c.bf16 %v2298_v22, %v2292_v21  ;;  %v2311_v34 = vld [vmem:[%s6205_s6 + $0x698] sm:$0xff]  ;;  %v4607_v38 = vpack.c.bf16 %v605_v33, %v597_v30  ;;  %v613_v40 = vld [vmem:[%s6197_s17 + $0x7b8] sm:$0xff] }
 0x212   : > { %v2053_v14 = vmul.f32 0.044715, %v2045_v35  ;;  %v4811_v35 = vpack.c.bf16 %v2311_v34, %v2305_v27  ;;  %v661_v17 = vld [vmem:[%s6197_s17 + $0x938] sm:$0xff]  ;;  %v2359_v21 = vld [vmem:[%s6205_s6 + $0x818] sm:$0xff]  ;;  %v5678_v22 = vld [vmem:[#allocation3] sm:$0xff] }
 0x213   : > { %v2060_v42 = vadd.f32 1.0, %v2052_v37  ;;  %v2310_v37 = vld [vmem:[%s6205_s6 + $0x690] sm:$0xff]  ;;  %v2353_v19 = vld [vmem:[%s6205_s6 + $0x7e8] sm:$0xff]  ;;  %v668_v33 = vld [vmem:[%s6197_s17 + $0x970] sm:$0xff] }
 0x214   : > { %v2061_v44 = vadd.f32 1.0, %v2053_v14  ;;  %4582 = vmatpush1.bf16.msra.mxu1 %v4581_v36  ;;  %v2304_v36 = vld [vmem:[%s6205_s6 + $0x660] sm:$0xff]  ;;  %v677_v27 = vld [vmem:[%s6197_s17 + $0x9b8] sm:$0xff] }
 0x215   : > { %v2068_v45 = vmul.f32 %v2060_v42, %v2036_v41  ;;  %4584 = vmatprep.subr.bf16.mxu1 %v4583_v9  ;;  %v4605_v9 = vpack.c.bf16 %v588_v29, %v580_v28  ;;  %v604_v14 = vld [vmem:[%s6197_s17 + $0x770] sm:$0xff]  ;;  %v4813_v10 = vpack.c.bf16 %v2310_v37, %v2304_v36  ;;  %v621_v41 = vld [vmem:[%s6197_s17 + $0x7f8] sm:$0xff]  ;;  %v4621_v28 = vpack.c.bf16 %v652_v16, %v644_v15  ;;  %v5679_v29 = vld [vmem:[#allocation3 + $0x18] sm:$0xff] }
 0x216   : > { %v2069_v48 = vmul.f32 %v2061_v44, %v2037_v43  ;;  %v2317_v42 = vld [vmem:[%s6205_s6 + $0x6c8] sm:$0xff]  ;;  %v2323_v43 = vld [vmem:[%s6205_s6 + $0x6f8] sm:$0xff]  ;;  %v4611_v47 = vpack.c.bf16 %v621_v41, %v613_v40  ;;  %v684_v41 = vld [vmem:[%s6197_s17 + $0x9f0] sm:$0xff] }
 0x217   : > { %5656 = vtanh.f32 %v2068_v45  ;;  %v4815_v44 = vpack.c.bf16 %v2323_v43, %v2317_v42  ;;  %v2322_v45 = vld [vmem:[%s6205_s6 + $0x6f0] sm:$0xff]  ;;  %v2365_v36 = vld [vmem:[%s6205_s6 + $0x848] sm:$0xff]  ;;  %v2371_v37 = vld [vmem:[%s6205_s6 + $0x878] sm:$0xff] }
 0x218   : > { %5658 = vtanh.f32 %v2069_v48  ;;  %4586 = vmatpush1.bf16.msra.mxu1 %v4585_v12  ;;  %v2316_v12 = vld [vmem:[%s6205_s6 + $0x6c0] sm:$0xff]  ;;  %v693_v42 = vld [vmem:[%s6197_s17 + $0xa38] sm:$0xff]  ;;  %v2406_v15 = vld [vmem:[%s6205_s6 + $0x990] sm:$0xff] }
 0x219   : > { %4588 = vmatprep.subr.bf16.mxu1 %v4587_v46  ;;  %v4609_v46 = vpack.c.bf16 %v604_v14, %v596_v39  ;;  %v620_v48 = vld [vmem:[%s6197_s17 + $0x7f0] sm:$0xff]  ;;  %v4817_v50 = vpack.c.bf16 %v2322_v45, %v2316_v12  ;;  %v2370_v39 = vld [vmem:[%s6205_s6 + $0x870] sm:$0xff]  ;;  %v2377_v12 = vld [vmem:[%s6205_s6 + $0x8a8] sm:$0xff] }
 0x21a   : > { %v2383_v45 = vld [vmem:[%s6205_s6 + $0x8d8] sm:$0xff] }
 0x21c   : > { %4590 = vmatpush1.bf16.msra.mxu1 %v4589_v51  ;;  %v637_v51 = vld [vmem:[%s6197_s17 + $0x878] sm:$0xff] }
 0x21d   : > { %4592 = vmatprep.subr.bf16.mxu1 %v4591_v52  ;;  %v2329_v52 = vld [vmem:[%s6205_s6 + $0x728] sm:$0xff] }
 0x21e   : > { %v4819_v54 = vpack.c.bf16 %v2335_v53, %v2329_v52  ;;  %v709_v52 = vld [vmem:[%s6197_s17 + $0xab8] sm:$0xff] }
 0x220   : > { %4594 = vmatpush1.bf16.msra.mxu1 %v4593_v59  ;;  %v4613_v59 = vpack.c.bf16 %v620_v48, %v612_v20  ;;  %v2382_v20 = vld [vmem:[%s6205_s6 + $0x8d0] sm:$0xff] }
 0x221   : > { %v5657_v3 = vpop.eup %5656  ;;  %4596 = vmatprep.subr.bf16.mxu1 %v4595_v60  ;;  %v4615_v60 = vpack.c.bf16 %v637_v51, %v629_v49  ;;  %v700_v51 = vld [vmem:[%s6197_s17 + $0xa70] sm:$0xff] }
 0x222   : > { %v5659_v13 = vpop.eup %5658  ;;  %v2084_v57 = vadd.f32 1.0, %v5657_v3  ;;  %v2341_v3 = vld [vmem:[%s6205_s6 + $0x788] sm:$0xff] }
 0x223   : > { %v2085_v4 = vadd.f32 1.0, %v5659_v13  ;;  %v4617_v13 = vpack.c.bf16 %v636_v62, %v628_v61  ;;  %v2394_v61 = vld [vmem:[%s6205_s6 + $0x930] sm:$0xff] }
 0x224   : > { %4598 = vmatpush1.bf16.msra.mxu1 %v4597_v2  ;;  %v6964_v32 = vmul.f32 %v2084_v57, %v2028_v24  ;;  %v653_v2 = vld [vmem:[%s6197_s17 + $0x8f8] sm:$0xff]  ;;  %v4827_v24 = vpack.c.bf16 %v2359_v21, %v2353_v19 }
 0x225   : > { %4600 = vmatprep.subr.bf16.mxu1 %v4599_v6  ;;  %v6959_v23 = vmul.f32 %v2085_v4, %v2029_v18  ;;  %v2347_v6 = vld [vmem:[%s6205_s6 + $0x7b8] sm:$0xff]  ;;  %v4619_v57 = vpack.c.bf16 %v653_v2, %v645_v63  ;;  %v4825_v18 = vpack.c.bf16 %v2346_v11, %v2340_v8  ;;  %v669_v4 = vld [vmem:[%s6197_s17 + $0x978] sm:$0xff]  ;;  %v716_v2 = vld [vmem:[%s6197_s17 + $0xaf0] sm:$0xff] }
 0x226   : > { %v4823_v7 = vpack.c.bf16 %v2347_v6, %v2341_v3  ;;  %v4623_v30 = vpack.c.bf16 %v669_v4, %v661_v17  ;;  %v725_v3 = vld [vmem:[%s6197_s17 + $0xb38] sm:$0xff]  ;;  %v2407_v11 = vld [vmem:[%s6205_s6 + $0x998] sm:$0xff]  ;;  %v732_v4 = vld [vmem:[%s6197_s17 + $0xb70] sm:$0xff] }
 0x227   : > { %2932 = vmatprep.mubr.f32.mxu0 %v6959_v23  ;;  %v2401_v8 = vld [vmem:[%s6205_s6 + $0x968] sm:$0xff] }
 0x228   : > { %4602 = vmatpush1.bf16.msra.mxu1 %v4601_v25  ;;  %2933 = vmatmul.mubr.f32.vlgmr.msra.gmra.mrb[4].mxu0 %v6964_v32  ;;  %v2352_v25 = vld [vmem:[%s6205_s6 + $0x7e0] sm:$0xff]  ;;  %v741_v19 = vld [vmem:[%s6197_s17 + $0xbb8] sm:$0xff] }
 0x229   : > { %4604 = vmatprep.subr.bf16.mxu1 %v4603_v26  ;;  %4810 = vmatpush1.bf16.msra.mxu0 %v4809_v31  ;;  %v2358_v26 = vld [vmem:[%s6205_s6 + $0x810] sm:$0xff]  ;;  %v660_v31 = vld [vmem:[%s6197_s17 + $0x930] sm:$0xff] }
 0x22a   : > { %4812 = vmatprep.subr.bf16.mxu0 %v4811_v35  ;;  %v4829_v34 = vpack.c.bf16 %v2358_v26, %v2352_v25  ;;  %v685_v35 = vld [vmem:[%s6197_s17 + $0x9f8] sm:$0xff]  ;;  %v4625_v14 = vpack.c.bf16 %v668_v33, %v660_v31  ;;  %v2419_v25 = vld [vmem:[%s6205_s6 + $0x9f8] sm:$0xff]  ;;  %v740_v33 = vld [vmem:[%s6197_s17 + $0xbb0] sm:$0xff] }
 0x22b   : > { %v4627_v40 = vpack.c.bf16 %v685_v35, %v677_v27  ;;  %v748_v27 = vld [vmem:[%s6197_s17 + $0xbf0] sm:$0xff] }
 0x22c   : > { %4606 = vmatpush1.bf16.msra.mxu1 %v4605_v9  ;;  %v4831_v9 = vpack.c.bf16 %v2371_v37, %v2365_v36  ;;  %v765_v36 = vld [vmem:[%s6197_s17 + $0xc78] sm:$0xff] }
 0x22d   : > { %4608 = vmatprep.subr.bf16.mxu1 %v4607_v38  ;;  %4814 = vmatpush1.bf16.msra.mxu0 %v4813_v10  ;;  %v2364_v38 = vld [vmem:[%s6205_s6 + $0x840] sm:$0xff]  ;;  %v2425_v37 = vld [vmem:[%s6205_s6 + $0xa28] sm:$0xff] }
 0x22e   : > { %4816 = vmatprep.subr.bf16.mxu0 %v4815_v44  ;;  %v676_v10 = vld [vmem:[%s6197_s17 + $0x9b0] sm:$0xff]  ;;  %v4833_v43 = vpack.c.bf16 %v2370_v39, %v2364_v38  ;;  %v701_v44 = vld [vmem:[%s6197_s17 + $0xa78] sm:$0xff] }
 0x22f   : > { %v4629_v48 = vpack.c.bf16 %v684_v41, %v676_v10  ;;  %v4631_v49 = vpack.c.bf16 %v701_v44, %v693_v42  ;;  %v2424_v39 = vld [vmem:[%s6205_s6 + $0xa20] sm:$0xff] }
 0x230   : > { %4610 = vmatpush1.bf16.msra.mxu1 %v4609_v46  ;;  %v4835_v46 = vpack.c.bf16 %v2383_v45, %v2377_v12  ;;  %v756_v41 = vld [vmem:[%s6197_s17 + $0xc30] sm:$0xff]  ;;  %v781_v12 = vld [vmem:[%s6197_s17 + $0xcf8] sm:$0xff] }
 0x231   : > { %4612 = vmatprep.subr.bf16.mxu1 %v4611_v47  ;;  %4818 = vmatpush1.bf16.msra.mxu0 %v4817_v50  ;;  %v2376_v47 = vld [vmem:[%s6205_s6 + $0x8a0] sm:$0xff]  ;;  %v2437_v45 = vld [vmem:[%s6205_s6 + $0xa88] sm:$0xff] }
 0x232   : > { %4820 = vmatprep.subr.bf16.mxu0 %v4819_v54  ;;  %v692_v50 = vld [vmem:[%s6197_s17 + $0xa30] sm:$0xff]  ;;  %v4837_v53 = vpack.c.bf16 %v2382_v20, %v2376_v47  ;;  %v717_v54 = vld [vmem:[%s6197_s17 + $0xaf8] sm:$0xff] }
 0x233   : > { %v4633_v62 = vpack.c.bf16 %v700_v51, %v692_v50  ;;  %v4635_v63 = vpack.c.bf16 %v717_v54, %v709_v52  ;;  %v764_v42 = vld [vmem:[%s6197_s17 + $0xc70] sm:$0xff] }
 0x234   : > { %4614 = vmatpush1.bf16.msra.mxu1 %v4613_v59  ;;  %v4839_v59 = vpack.c.bf16 %v2395_v58, %v2389_v55  ;;  %v2436_v20 = vld [vmem:[%s6205_s6 + $0xa80] sm:$0xff]  ;;  %v797_v55 = vld [vmem:[%s6197_s17 + $0xd78] sm:$0xff] }
 0x235   : > { %4616 = vmatprep.subr.bf16.mxu1 %v4615_v60  ;;  %4822 = vmatpush1.bf16.msra.mxu0 %v4821_v0  ;;  %v2388_v60 = vld [vmem:[%s6205_s6 + $0x900] sm:$0xff]  ;;  %v2449_v58 = vld [vmem:[%s6205_s6 + $0xae8] sm:$0xff] }
 0x236   : > { %4824 = vmatprep.subr.bf16.mxu0 %v4823_v7  ;;  %v708_v0 = vld [vmem:[%s6197_s17 + $0xab0] sm:$0xff]  ;;  %v4841_v6 = vpack.c.bf16 %v2394_v61, %v2388_v60  ;;  %v733_v7 = vld [vmem:[%s6197_s17 + $0xb78] sm:$0xff] }
 0x237   : > { %1880 = vmatmul.mubr.f32.vlgmr.msra.gmra.mrb[4].mxu1 %v5678_v22  ;;  %v4637_v16 = vpack.c.bf16 %v716_v2, %v708_v0  ;;  %v4639_v17 = vpack.c.bf16 %v733_v7, %v725_v3  ;;  %v749_v22 = vld [vmem:[%s6197_s17 + $0xbf8] sm:$0xff]  ;;  %v772_v51 = vld [vmem:[%s6197_s17 + $0xcb0] sm:$0xff] }
 0x238   : > { %4618 = vmatpush1.bf16.msra.mxu1 %v4617_v13  ;;  %1950 = vmatprep.mubr.f32.mxu1 %v5679_v29  ;;  %v4843_v13 = vpack.c.bf16 %v2407_v11, %v2401_v8  ;;  %v2418_v29 = vld [vmem:[%s6205_s6 + $0x9f0] sm:$0xff]  ;;  %v4643_v31 = vpack.c.bf16 %v749_v22, %v741_v19  ;;  %v780_v52 = vld [vmem:[%s6197_s17 + $0xcf0] sm:$0xff]  ;;  %v813_v8 = vld [vmem:[%s6197_s17 + $0xdf8] sm:$0xff] }
 0x239   : > { %4620 = vmatprep.subr.bf16.mxu1 %v4619_v57  ;;  %4826 = vmatpush1.bf16.msra.mxu0 %v4825_v18  ;;  %v2400_v57 = vld [vmem:[%s6205_s6 + $0x960] sm:$0xff]  ;;  %v2461_v11 = vld [vmem:[%s6205_s6 + $0xb48] sm:$0xff] }
 0x23a   : > { %4828 = vmatprep.subr.bf16.mxu0 %v4827_v24  ;;  %v724_v18 = vld [vmem:[%s6197_s17 + $0xb30] sm:$0xff]  ;;  %v4845_v21 = vpack.c.bf16 %v2406_v15, %v2400_v57  ;;  %v2413_v24 = vld [vmem:[%s6205_s6 + $0x9c8] sm:$0xff] }
 0x23b   : > { %v4847_v26 = vpack.c.bf16 %v2419_v25, %v2413_v24  ;;  %v2448_v61 = vld [vmem:[%s6205_s6 + $0xae0] sm:$0xff]  ;;  %v829_v24 = vld [vmem:[%s6197_s17 + $0xe78] sm:$0xff] }
 0x23c   : > { %4622 = vmatpush1.bf16.msra.mxu1 %v4621_v28  ;;  %v2412_v28 = vld [vmem:[%s6205_s6 + $0x9c0] sm:$0xff]  ;;  %v2473_v25 = vld [vmem:[%s6205_s6 + $0xba8] sm:$0xff] }
 0x23d   : > { %4624 = vmatprep.subr.bf16.mxu1 %v4623_v30  ;;  %4830 = vmatpush1.bf16.msra.mxu0 %v4829_v34  ;;  %v4641_v30 = vpack.c.bf16 %v732_v4, %v724_v18  ;;  %v757_v34 = vld [vmem:[%s6197_s17 + $0xc38] sm:$0xff]  ;;  %v4849_v35 = vpack.c.bf16 %v2418_v29, %v2412_v28  ;;  %v788_v2 = vld [vmem:[%s6197_s17 + $0xd30] sm:$0xff] }
 0x23e   : > { %4832 = vmatprep.subr.bf16.mxu0 %v4831_v9  ;;  %v2431_v9 = vld [vmem:[%s6205_s6 + $0xa58] sm:$0xff]  ;;  %v4647_v10 = vpack.c.bf16 %v765_v36, %v757_v34  ;;  %v796_v3 = vld [vmem:[%s6197_s17 + $0xd70] sm:$0xff] }
 0x23f   : > { %v4851_v38 = vpack.c.bf16 %v2431_v9, %v2425_v37  ;;  %v2460_v15 = vld [vmem:[%s6205_s6 + $0xb40] sm:$0xff]  ;;  %v845_v37 = vld [vmem:[%s6197_s17 + $0xef8] sm:$0xff] }
 0x240   : > { %4626 = vmatpush1.bf16.msra.mxu1 %v4625_v14  ;;  %v2430_v14 = vld [vmem:[%s6205_s6 + $0xa50] sm:$0xff]  ;;  %v804_v4 = vld [vmem:[%s6197_s17 + $0xdb0] sm:$0xff]  ;;  %v2485_v9 = vld [vmem:[%s6205_s6 + $0xc08] sm:$0xff] }
 0x241   : > { %4628 = vmatprep.subr.bf16.mxu1 %v4627_v40  ;;  %4834 = vmatpush1.bf16.msra.mxu0 %v4833_v43  ;;  %v4645_v40 = vpack.c.bf16 %v748_v27, %v740_v33  ;;  %v773_v43 = vld [vmem:[%s6197_s17 + $0xcb8] sm:$0xff]  ;;  %v4853_v44 = vpack.c.bf16 %v2430_v14, %v2424_v39  ;;  %v812_v19 = vld [vmem:[%s6197_s17 + $0xdf0] sm:$0xff] }
 0x242   : > { %4836 = vmatprep.subr.bf16.mxu0 %v4835_v46  ;;  %v2443_v46 = vld [vmem:[%s6205_s6 + $0xab8] sm:$0xff]  ;;  %v4651_v50 = vpack.c.bf16 %v781_v12, %v773_v43  ;;  %v2472_v29 = vld [vmem:[%s6205_s6 + $0xba0] sm:$0xff]  ;;  %v861_v43 = vld [vmem:[%s6197_s17 + $0xf78] sm:$0xff] }
 0x243   : > { %v4855_v47 = vpack.c.bf16 %v2443_v46, %v2437_v45  ;;  %v820_v27 = vld [vmem:[%s6197_s17 + $0xe30] sm:$0xff] }
 0x244   : > { %4630 = vmatpush1.bf16.msra.mxu1 %v4629_v48  ;;  %v2442_v48 = vld [vmem:[%s6205_s6 + $0xab0] sm:$0xff]  ;;  %v828_v34 = vld [vmem:[%s6197_s17 + $0xe70] sm:$0xff] }
 0x245   : > { %4632 = vmatprep.subr.bf16.mxu1 %v4631_v49  ;;  %4838 = vmatpush1.bf16.msra.mxu0 %v4837_v53  ;;  %v4649_v49 = vpack.c.bf16 %v764_v42, %v756_v41  ;;  %v789_v53 = vld [vmem:[%s6197_s17 + $0xd38] sm:$0xff]  ;;  %v4857_v54 = vpack.c.bf16 %v2442_v48, %v2436_v20  ;;  %v4665_v14 = vpack.c.bf16 %v828_v34, %v820_v27  ;;  %v844_v41 = vld [vmem:[%s6197_s17 + $0xef0] sm:$0xff] }
 0x246   : > { %4840 = vmatprep.subr.bf16.mxu0 %v4839_v59  ;;  %v2455_v59 = vld [vmem:[%s6205_s6 + $0xb18] sm:$0xff]  ;;  %v4655_v0 = vpack.c.bf16 %v797_v55, %v789_v53  ;;  %v853_v42 = vld [vmem:[%s6197_s17 + $0xf38] sm:$0xff]  ;;  %v852_v45 = vld [vmem:[%s6197_s17 + $0xf30] sm:$0xff] }
 0x247   : > { %v4859_v60 = vpack.c.bf16 %v2455_v59, %v2449_v58  ;;  %v4671_v12 = vpack.c.bf16 %v861_v43, %v853_v42  ;;  %v860_v46 = vld [vmem:[%s6197_s17 + $0xf70] sm:$0xff]  ;;  %v877_v20 = vld [vmem:[%s6197_s17 + $0xff8] sm:$0xff] }
 0x248   : > { %4634 = vmatpush1.bf16.msra.mxu1 %v4633_v62  ;;  %v2454_v62 = vld [vmem:[%s6205_s6 + $0xb10] sm:$0xff]  ;;  %v4673_v48 = vpack.c.bf16 %v860_v46, %v852_v45  ;;  %v893_v53 = vld [vmem:[%s6197_s17 + $0x1078] sm:$0xff]  ;;  %v884_v58 = vld [vmem:[%s6197_s17 + $0x1030] sm:$0xff] }
 0x249   : > { %4636 = vmatprep.subr.bf16.mxu1 %v4635_v63  ;;  %4842 = vmatpush1.bf16.msra.mxu0 %v4841_v6  ;;  %v4653_v63 = vpack.c.bf16 %v780_v52, %v772_v51  ;;  %v805_v6 = vld [vmem:[%s6197_s17 + $0xdb8] sm:$0xff]  ;;  %v4861_v7 = vpack.c.bf16 %v2454_v62, %v2448_v61  ;;  %v876_v51 = vld [vmem:[%s6197_s17 + $0xff0] sm:$0xff] }
 0x24a   : > { %4844 = vmatprep.subr.bf16.mxu0 %v4843_v13  ;;  %v2467_v13 = vld [vmem:[%s6205_s6 + $0xb78] sm:$0xff]  ;;  %v4659_v18 = vpack.c.bf16 %v813_v8, %v805_v6  ;;  %v885_v52 = vld [vmem:[%s6197_s17 + $0x1038] sm:$0xff]  ;;  %v892_v59 = vld [vmem:[%s6197_s17 + $0x1070] sm:$0xff] }
 0x24b   : > { %v4863_v57 = vpack.c.bf16 %v2467_v13, %v2461_v11  ;;  %v4679_v55 = vpack.c.bf16 %v893_v53, %v885_v52  ;;  %v909_v61 = vld [vmem:[%s6197_s17 + $0x10f8] sm:$0xff]  ;;  %v4681_v62 = vpack.c.bf16 %v892_v59, %v884_v58  ;;  %v964_v34 = vld [vmem:[%s6197_s17 + $0x12b0] sm:$0xff] }
 0x24c   : > { %4638 = vmatpush1.bf16.msra.mxu1 %v4637_v16  ;;  %v2466_v16 = vld [vmem:[%s6205_s6 + $0xb70] sm:$0xff]  ;;  %v925_v6 = vld [vmem:[%s6197_s17 + $0x1178] sm:$0xff]  ;;  %v996_v43 = vld [vmem:[%s6197_s17 + $0x13b0] sm:$0xff] }
 0x24d   : > { %4640 = vmatprep.subr.bf16.mxu1 %v4639_v17  ;;  %4846 = vmatpush1.bf16.msra.mxu0 %v4845_v21  ;;  %v4657_v17 = vpack.c.bf16 %v796_v3, %v788_v2  ;;  %v821_v21 = vld [vmem:[%s6197_s17 + $0xe38] sm:$0xff]  ;;  %v4865_v22 = vpack.c.bf16 %v2466_v16, %v2460_v15  ;;  %v908_v2 = vld [vmem:[%s6197_s17 + $0x10f0] sm:$0xff] }
 0x24e   : > { %4848 = vmatprep.subr.bf16.mxu0 %v4847_v26  ;;  %v2479_v26 = vld [vmem:[%s6205_s6 + $0xbd8] sm:$0xff]  ;;  %v4663_v33 = vpack.c.bf16 %v829_v24, %v821_v21  ;;  %v917_v3 = vld [vmem:[%s6197_s17 + $0x1138] sm:$0xff]  ;;  %v924_v15 = vld [vmem:[%s6197_s17 + $0x1170] sm:$0xff] }
 0x24f   : > { %v4867_v28 = vpack.c.bf16 %v2479_v26, %v2473_v25  ;;  %v5681_v11 = vld [vmem:[#allocation3 + $0x28] sm:$0xff]  ;;  %v4687_v13 = vpack.c.bf16 %v925_v6, %v917_v3  ;;  %v940_v21 = vld [vmem:[%s6197_s17 + $0x11f0] sm:$0xff] }
 0x250   : > { %4642 = vmatpush1.bf16.msra.mxu1 %v4641_v30  ;;  %v2478_v30 = vld [vmem:[%s6205_s6 + $0xbd0] sm:$0xff]  ;;  %v933_v16 = vld [vmem:[%s6197_s17 + $0x11b8] sm:$0xff]  ;;  %v1028_v53 = vld [vmem:[%s6197_s17 + $0x14b0] sm:$0xff] }
 0x251   : > { %4644 = vmatprep.subr.bf16.mxu1 %v4643_v31  ;;  %4850 = vmatpush1.bf16.msra.mxu0 %v4849_v35  ;;  %v4661_v31 = vpack.c.bf16 %v812_v19, %v804_v4  ;;  %v837_v35 = vld [vmem:[%s6197_s17 + $0xeb8] sm:$0xff]  ;;  %v4869_v36 = vpack.c.bf16 %v2478_v30, %v2472_v29  ;;  %v932_v19 = vld [vmem:[%s6197_s17 + $0x11b0] sm:$0xff] }
 0x252   : > { %4852 = vmatprep.subr.bf16.mxu0 %v4851_v38  ;;  %v2491_v38 = vld [vmem:[%s6205_s6 + $0xc38] sm:$0xff]  ;;  %v957_v24 = vld [vmem:[%s6197_s17 + $0x1278] sm:$0xff]  ;;  %v4693_v25 = vpack.c.bf16 %v940_v21, %v932_v19  ;;  %v956_v29 = vld [vmem:[%s6197_s17 + $0x1270] sm:$0xff] }
 0x253   : > { %v4871_v39 = vpack.c.bf16 %v2491_v38, %v2485_v9  ;;  %v965_v30 = vld [vmem:[%s6197_s17 + $0x12b8] sm:$0xff] }
 0x254   : > { %4646 = vmatpush1.bf16.msra.mxu1 %v4645_v40  ;;  %v4667_v40 = vpack.c.bf16 %v845_v37, %v837_v35  ;;  %v972_v35 = vld [vmem:[%s6197_s17 + $0x12f0] sm:$0xff]  ;;  %v989_v37 = vld [vmem:[%s6197_s17 + $0x1378] sm:$0xff] }
 0x255   : > { %4648 = vmatprep.subr.bf16.mxu1 %v4647_v10  ;;  %4854 = vmatpush1.bf16.msra.mxu0 %v4853_v44  ;;  %v836_v10 = vld [vmem:[%s6197_s17 + $0xeb0] sm:$0xff]  ;;  %v4701_v9 = vpack.c.bf16 %v972_v35, %v964_v34  ;;  %v1021_v45 = vld [vmem:[%s6197_s17 + $0x1478] sm:$0xff] }
 0x256   : > { %4856 = vmatprep.subr.bf16.mxu0 %v4855_v47  ;;  %v4669_v44 = vpack.c.bf16 %v844_v41, %v836_v10  ;;  %v869_v47 = vld [vmem:[%s6197_s17 + $0xfb8] sm:$0xff] }
 0x257   : > { %v1005_v10 = vld [vmem:[%s6197_s17 + $0x13f8] sm:$0xff] }
 0x258   : > { %4650 = vmatpush1.bf16.msra.mxu1 %v4649_v49  ;;  %v4675_v49 = vpack.c.bf16 %v877_v20, %v869_v47  ;;  %v1012_v20 = vld [vmem:[%s6197_s17 + $0x1430] sm:$0xff]  ;;  %v1053_v58 = vld [vmem:[%s6197_s17 + $0x1578] sm:$0xff] }
 0x259   : > { %4652 = vmatprep.subr.bf16.mxu1 %v4651_v50  ;;  %4858 = vmatpush1.bf16.msra.mxu0 %v4857_v54  ;;  %v868_v50 = vld [vmem:[%s6197_s17 + $0xfb0] sm:$0xff]  ;;  %v1101_v19 = vld [vmem:[%s6197_s17 + $0x16f8] sm:$0xff] }
 0x25a   : > { %4860 = vmatprep.subr.bf16.mxu0 %v4859_v60  ;;  %v4677_v54 = vpack.c.bf16 %v876_v51, %v868_v50  ;;  %v901_v60 = vld [vmem:[%s6197_s17 + $0x10b8] sm:$0xff] }
 0x25b   : > { %v1037_v50 = vld [vmem:[%s6197_s17 + $0x14f8] sm:$0xff] }
 0x25c   : > { %4654 = vmatpush1.bf16.msra.mxu1 %v4653_v63  ;;  %v4683_v63 = vpack.c.bf16 %v909_v61, %v901_v60  ;;  %v1044_v61 = vld [vmem:[%s6197_s17 + $0x1530] sm:$0xff]  ;;  %v1133_v34 = vld [vmem:[%s6197_s17 + $0x17f8] sm:$0xff] }
 0x25d   : > { %4656 = vmatprep.subr.bf16.mxu1 %v4655_v0  ;;  %4862 = vmatpush1.bf16.msra.mxu0 %v4861_v7  ;;  %v900_v0 = vld [vmem:[%s6197_s17 + $0x10b0] sm:$0xff]  ;;  %v5680_v7 = vld [vmem:[#allocation3 + $0x10] sm:$0xff] }
 0x25e   : > { %4864 = vmatprep.subr.bf16.mxu0 %v4863_v57  ;;  %v4685_v8 = vpack.c.bf16 %v908_v2, %v900_v0  ;;  %v916_v57 = vld [vmem:[%s6197_s17 + $0x1130] sm:$0xff]  ;;  %v1069_v0 = vld [vmem:[%s6197_s17 + $0x15f8] sm:$0xff] }
 0x260   : > { %4658 = vmatpush1.bf16.msra.mxu1 %v4657_v17  ;;  %v941_v17 = vld [vmem:[%s6197_s17 + $0x11f8] sm:$0xff] }
 0x261   : > { %4660 = vmatprep.subr.bf16.mxu1 %v4659_v18  ;;  %4866 = vmatpush1.bf16.msra.mxu0 %v4865_v22  ;;  %v4689_v18 = vpack.c.bf16 %v924_v15, %v916_v57  ;;  %v4691_v4 = vpack.c.bf16 %v941_v17, %v933_v16  ;;  %v949_v22 = vld [vmem:[%s6197_s17 + $0x1238] sm:$0xff]  ;;  %v1076_v17 = vld [vmem:[%s6197_s17 + $0x1630] sm:$0xff] }
 0x262   : > { %4868 = vmatprep.subr.bf16.mxu0 %v4867_v28  ;;  %v4695_v26 = vpack.c.bf16 %v957_v24, %v949_v22  ;;  %v948_v28 = vld [vmem:[%s6197_s17 + $0x1230] sm:$0xff]  ;;  %v1085_v57 = vld [vmem:[%s6197_s17 + $0x1678] sm:$0xff] }
 0x263   : > { %v1092_v24 = vld [vmem:[%s6197_s17 + $0x16b0] sm:$0xff] }
 0x264   : > { %4662 = vmatpush1.bf16.msra.mxu1 %v4661_v31  ;;  %v973_v31 = vld [vmem:[%s6197_s17 + $0x12f8] sm:$0xff] }
 0x265   : > { %4664 = vmatprep.subr.bf16.mxu1 %v4663_v33  ;;  %4870 = vmatpush1.bf16.msra.mxu0 %v4869_v36  ;;  %v4697_v33 = vpack.c.bf16 %v956_v29, %v948_v28  ;;  %v4699_v27 = vpack.c.bf16 %v973_v31, %v965_v30  ;;  %v981_v36 = vld [vmem:[%s6197_s17 + $0x1338] sm:$0xff]  ;;  %v1108_v31 = vld [vmem:[%s6197_s17 + $0x1730] sm:$0xff] }
 0x266   : > { %4872 = vmatprep.subr.bf16.mxu0 %v4871_v39  ;;  %v4703_v38 = vpack.c.bf16 %v989_v37, %v981_v36  ;;  %v980_v39 = vld [vmem:[%s6197_s17 + $0x1330] sm:$0xff]  ;;  %v1117_v28 = vld [vmem:[%s6197_s17 + $0x1778] sm:$0xff] }
 0x267   : > { %v1124_v37 = vld [vmem:[%s6197_s17 + $0x17b0] sm:$0xff] }
 0x268   : > { %4666 = vmatpush1.bf16.msra.mxu1 %v4665_v14  ;;  %v988_v14 = vld [vmem:[%s6197_s17 + $0x1370] sm:$0xff] }
 0x269   : > { %4668 = vmatprep.subr.bf16.mxu1 %v4667_v40  ;;  %v997_v40 = vld [vmem:[%s6197_s17 + $0x13b8] sm:$0xff]  ;;  %v4705_v41 = vpack.c.bf16 %v988_v14, %v980_v39 }
 0x26a   : > { %v4707_v42 = vpack.c.bf16 %v1005_v10, %v997_v40  ;;  %v2109_v39 = vld [vmem:[%s6205_s6 + $0x48] sm:$0xff]  ;;  %v2102_v10 = vld [vmem:[%s6205_s6 + $0x10] sm:$0xff] }
 0x26c   : > { %4670 = vmatpush1.bf16.msra.mxu1 %v4669_v44  ;;  %v1004_v44 = vld [vmem:[%s6197_s17 + $0x13f0] sm:$0xff] }
 0x26d   : > { %4672 = vmatprep.subr.bf16.mxu1 %v4671_v12  ;;  %v1013_v12 = vld [vmem:[%s6197_s17 + $0x1438] sm:$0xff]  ;;  %v4709_v46 = vpack.c.bf16 %v1004_v44, %v996_v43 }
 0x26e   : > { %v4711_v47 = vpack.c.bf16 %v1021_v45, %v1013_v12  ;;  %v2121_v43 = vld [vmem:[%s6205_s6 + $0xa8] sm:$0xff]  ;;  %v2114_v45 = vld [vmem:[%s6205_s6 + $0x70] sm:$0xff] }
 0x270   : > { %4674 = vmatpush1.bf16.msra.mxu1 %v4673_v48  ;;  %v1020_v48 = vld [vmem:[%s6197_s17 + $0x1470] sm:$0xff] }
 0x271   : > { %4676 = vmatprep.subr.bf16.mxu1 %v4675_v49  ;;  %v1029_v49 = vld [vmem:[%s6197_s17 + $0x14b8] sm:$0xff]  ;;  %v4713_v51 = vpack.c.bf16 %v1020_v48, %v1012_v20  ;;  %v5682_v48 = vld [vmem:[#allocation3 + $0x20] sm:$0xff] }
 0x272   : > { %v4715_v52 = vpack.c.bf16 %v1037_v50, %v1029_v49  ;;  %v2133_v20 = vld [vmem:[%s6205_s6 + $0x108] sm:$0xff]  ;;  %v1158_v49 = vsub.s32 5, %v6902_v56 }
 0x274   : > { %4678 = vmatpush1.bf16.msra.mxu1 %v4677_v54  ;;  %v1036_v54 = vld [vmem:[%s6197_s17 + $0x14f0] sm:$0xff] }
 0x275   : > { %4680 = vmatprep.subr.bf16.mxu1 %v4679_v55  ;;  %v1045_v55 = vld [vmem:[%s6197_s17 + $0x1538] sm:$0xff]  ;;  %v4717_v59 = vpack.c.bf16 %v1036_v54, %v1028_v53  ;;  %v2132_v53 = vld [vmem:[%s6205_s6 + $0x100] sm:$0xff]  ;;  %v2139_v54 = vld [vmem:[%s6205_s6 + $0x138] sm:$0xff] }
 0x276   : > { %v4719_v60 = vpack.c.bf16 %v1053_v58, %v1045_v55  ;;  %v2145_v55 = vld [vmem:[%s6205_s6 + $0x168] sm:$0xff]  ;;  %v7186_v58 = vld [vmem:[%s6203_s7] sm:$0xff] }
 0x277   : > { %1951 = vmatmul.mubr.f32.vlgmr.msra.gmra.mrb[4].mxu1 %v5680_v7 }
 0x278   : > { %4682 = vmatpush1.bf16.msra.mxu1 %v4681_v62  ;;  %2021 = vmatprep.mubr.f32.mxu1 %v5681_v11  ;;  %v1052_v62 = vld [vmem:[%s6197_s17 + $0x1570] sm:$0xff] }
 0x279   : > { %4684 = vmatprep.subr.bf16.mxu1 %v4683_v63  ;;  %v1061_v63 = vld [vmem:[%s6197_s17 + $0x15b8] sm:$0xff]  ;;  %v4721_v6 = vpack.c.bf16 %v1052_v62, %v1044_v61  ;;  %v1068_v11 = vld [vmem:[%s6197_s17 + $0x15f0] sm:$0xff]  ;;  %v5011_v61 = vpack.c.bf16 %v2145_v55, %v2139_v54  ;;  %v2138_v62 = vld [vmem:[%s6205_s6 + $0x130] sm:$0xff] }
 0x27a   : > { %v4723_v7 = vpack.c.bf16 %v1069_v0, %v1061_v63  ;;  %v2144_v63 = vld [vmem:[%s6205_s6 + $0x160] sm:$0xff]  ;;  %v2151_v0 = vld [vmem:[%s6205_s6 + $0x198] sm:$0xff] }
 0x27b   : > { %v2204_v54 = vld [vmem:[%s6205_s6 + $0x340] sm:$0xff] }
 0x27c   : > { %4686 = vmatpush1.bf16.msra.mxu1 %v4685_v8  ;;  %v1060_v8 = vld [vmem:[%s6197_s17 + $0x15b0] sm:$0xff] }
 0x27d   : > { %4688 = vmatprep.subr.bf16.mxu1 %v4687_v13  ;;  %v1077_v13 = vld [vmem:[%s6197_s17 + $0x1638] sm:$0xff]  ;;  %v4725_v15 = vpack.c.bf16 %v1068_v11, %v1060_v8  ;;  %v5013_v8 = vpack.c.bf16 %v2144_v63, %v2138_v62 }
 0x27e   : > { %v4727_v16 = vpack.c.bf16 %v1085_v57, %v1077_v13  ;;  %v2150_v13 = vld [vmem:[%s6205_s6 + $0x190] sm:$0xff]  ;;  %v2156_v57 = vld [vmem:[%s6205_s6 + $0x1c0] sm:$0xff] }
 0x280   : > { %4690 = vmatpush1.bf16.msra.mxu1 %v4689_v18  ;;  %v1084_v18 = vld [vmem:[%s6197_s17 + $0x1670] sm:$0xff] }
 0x281   : > { %4692 = vmatprep.subr.bf16.mxu1 %v4691_v4  ;;  %v1093_v4 = vld [vmem:[%s6197_s17 + $0x16b8] sm:$0xff]  ;;  %v4729_v21 = vpack.c.bf16 %v1084_v18, %v1076_v17  ;;  %v1146_v17 = vsub.s32 2, %v6902_v56 }
 0x282   : > { %v4731_v22 = vpack.c.bf16 %v1101_v19, %v1093_v4  ;;  %v1150_v4 = vsub.s32 3, %v6902_v56 }
 0x284   : > { %4694 = vmatpush1.bf16.msra.mxu1 %v4693_v25  ;;  %v1100_v25 = vld [vmem:[%s6197_s17 + $0x16f0] sm:$0xff] }
 0x285   : > { %4696 = vmatprep.subr.bf16.mxu1 %v4695_v26  ;;  %v1109_v26 = vld [vmem:[%s6197_s17 + $0x1738] sm:$0xff]  ;;  %v4733_v29 = vpack.c.bf16 %v1100_v25, %v1092_v24  ;;  %v2175_v24 = vld [vmem:[%s6205_s6 + $0x258] sm:$0xff] }
 0x286   : > { %v4735_v30 = vpack.c.bf16 %v1117_v28, %v1109_v26  ;;  %v2181_v25 = vld [vmem:[%s6205_s6 + $0x288] sm:$0xff]  ;;  %v1147_v26 = vrot.slane %v7186_v58, %v1146_v17 }
 0x288   : > { %4698 = vmatpush1.bf16.msra.mxu1 %v4697_v33  ;;  %v1116_v33 = vld [vmem:[%s6197_s17 + $0x1770] sm:$0xff] }
 0x289   : > { %4700 = vmatprep.subr.bf16.mxu1 %v4699_v27  ;;  %v1125_v27 = vld [vmem:[%s6197_s17 + $0x17b8] sm:$0xff]  ;;  %v4737_v35 = vpack.c.bf16 %v1116_v33, %v1108_v31  ;;  %v5023_v31 = vpack.c.bf16 %v2181_v25, %v2175_v24  ;;  %v2174_v33 = vld [vmem:[%s6205_s6 + $0x250] sm:$0xff] }
 0x28a   : > { %v4739_v36 = vpack.c.bf16 %v1133_v34, %v1125_v27  ;;  %v2180_v27 = vld [vmem:[%s6205_s6 + $0x280] sm:$0xff]  ;;  %v2234_v24 = vld [vmem:[%s6205_s6 + $0x430] sm:$0xff] }
 0x28c   : > { %4702 = vmatpush1.bf16.msra.mxu1 %v4701_v9  ;;  %v1132_v9 = vld [vmem:[%s6197_s17 + $0x17f0] sm:$0xff] }
 0x28d   : > { %4704 = vmatprep.subr.bf16.mxu1 %v4703_v38  ;;  %v2103_v38 = vld [vmem:[%s6205_s6 + $0x18] sm:$0xff]  ;;  %v4741_v14 = vpack.c.bf16 %v1132_v9, %v1124_v37 }
 0x28e   : > { %v4999_v40 = vpack.c.bf16 %v2109_v39, %v2103_v38 }
 0x290   : > { %4706 = vmatpush1.bf16.msra.mxu1 %v4705_v41  ;;  %v2108_v41 = vld [vmem:[%s6205_s6 + $0x40] sm:$0xff] }
 0x291   : > { %4708 = vmatprep.subr.bf16.mxu1 %v4707_v42  ;;  %v2115_v42 = vld [vmem:[%s6205_s6 + $0x78] sm:$0xff]  ;;  %v5001_v44 = vpack.c.bf16 %v2108_v41, %v2102_v10 }
 0x292   : > { %v5003_v12 = vpack.c.bf16 %v2121_v43, %v2115_v42  ;;  %v2186_v42 = vld [vmem:[%s6205_s6 + $0x2b0] sm:$0xff]  ;;  %v2192_v43 = vld [vmem:[%s6205_s6 + $0x2e0] sm:$0xff] }
 0x294   : > { %4710 = vmatpush1.bf16.msra.mxu1 %v4709_v46  ;;  %v2120_v46 = vld [vmem:[%s6205_s6 + $0xa0] sm:$0xff] }
 0x295   : > { %4712 = vmatprep.subr.bf16.mxu1 %v4711_v47  ;;  %v2127_v47 = vld [vmem:[%s6205_s6 + $0xd8] sm:$0xff]  ;;  %v5005_v50 = vpack.c.bf16 %v2120_v46, %v2114_v45  ;;  %v2205_v45 = vld [vmem:[%s6205_s6 + $0x348] sm:$0xff] }
 0x297   : > { %v7147_v2 = vpop.f32.mrb[2].mxu0 }
 0x298   : > { %4714 = vmatpush1.bf16.msra.mxu1 %v4713_v51  ;;  %v7149_v3 = vpop.f32.mrb[3].mxu0  ;;  %v5007_v51 = vpack.c.bf16 %v2133_v20, %v2127_v47 }
 0x299   : > { %4716 = vmatprep.subr.bf16.mxu1 %v4715_v52  ;;  %v2126_v52 = vld [vmem:[%s6205_s6 + $0xd0] sm:$0xff] }
 0x29c   : > { %4718 = vmatpush1.bf16.msra.mxu1 %v4717_v59  ;;  %v1159_v59 = vrot.slane %v7186_v58, %v1158_v49 }
 0x29d   : > { %4720 = vmatprep.subr.bf16.mxu1 %v4719_v60  ;;  %v5009_v60 = vpack.c.bf16 %v2132_v53, %v2126_v52  ;;  %v2198_v53 = vld [vmem:[%s6205_s6 + $0x310] sm:$0xff] }
 0x2a0   : > { %4722 = vmatpush1.bf16.msra.mxu1 %v4721_v6  ;;  %v2157_v6 = vld [vmem:[%s6205_s6 + $0x1c8] sm:$0xff] }
 0x2a1   : > { %4724 = vmatprep.subr.bf16.mxu1 %v4723_v7  ;;  %v7196_v7 = vadd.f32 %v7149_v3, %v1159_v59  ;;  %v5015_v11 = vpack.c.bf16 %v2157_v6, %v2151_v0  ;;  %v5017_v3 = vpack.c.bf16 %v2156_v57, %v2150_v13  ;;  %v5033_v0 = vpack.c.bf16 %v2204_v54, %v2198_v53  ;;  %v2223_v13 = vld [vmem:[%s6205_s6 + $0x3d8] sm:$0xff]  ;;  %v2229_v57 = vld [vmem:[%s6205_s6 + $0x408] sm:$0xff]  ;;  %v2264_v54 = vld [vmem:[%s6205_s6 + $0x520] sm:$0xff] }
 0x2a3   : > { %v2049_v18 = vmul.f32 %v7196_v7, %v7196_v7  ;;  %v2041_v38 = vmul.f32 0.7978846, %v7196_v7 }
 0x2a4   : > { %4726 = vmatpush1.bf16.msra.mxu1 %v4725_v15  ;;  %v2163_v15 = vld [vmem:[%s6205_s6 + $0x1f8] sm:$0xff] }
 0x2a5   : > { %4728 = vmatprep.subr.bf16.mxu1 %v4727_v16  ;;  %v2169_v16 = vld [vmem:[%s6205_s6 + $0x228] sm:$0xff]  ;;  %v2057_v28 = vmul.f32 0.044715, %v2049_v18  ;;  %v2222_v18 = vld [vmem:[%s6205_s6 + $0x3d0] sm:$0xff] }
 0x2a6   : > { %v5019_v19 = vpack.c.bf16 %v2169_v16, %v2163_v15  ;;  %v5039_v16 = vpack.c.bf16 %v2229_v57, %v2223_v13  ;;  %v2276_v57 = vld [vmem:[%s6205_s6 + $0x580] sm:$0xff] }
 0x2a7   : > { %v2065_v39 = vadd.f32 1.0, %v2057_v28  ;;  %v2247_v28 = vld [vmem:[%s6205_s6 + $0x498] sm:$0xff] }
 0x2a8   : > { %4730 = vmatpush1.bf16.msra.mxu1 %v4729_v21  ;;  %v2162_v21 = vld [vmem:[%s6205_s6 + $0x1f0] sm:$0xff] }
 0x2a9   : > { %4732 = vmatprep.subr.bf16.mxu1 %v4731_v22  ;;  %v2168_v22 = vld [vmem:[%s6205_s6 + $0x220] sm:$0xff]  ;;  %v2073_v47 = vmul.f32 %v2065_v39, %v2041_v38  ;;  %v2246_v38 = vld [vmem:[%s6205_s6 + $0x490] sm:$0xff] }
 0x2aa   : > { %v2252_v39 = vld [vmem:[%s6205_s6 + $0x4c0] sm:$0xff] }
 0x2ab   : > { %5660 = vtanh.f32 %v2073_v47 }
 0x2ac   : > { %4734 = vmatpush1.bf16.msra.mxu1 %v4733_v29  ;;  %v1151_v29 = vrot.slane %v7186_v58, %v1150_v4 }
 0x2ad   : > { %4736 = vmatprep.subr.bf16.mxu1 %v4735_v30  ;;  %v5021_v30 = vpack.c.bf16 %v2168_v22, %v2162_v21  ;;  %v2241_v21 = vld [vmem:[%s6205_s6 + $0x468] sm:$0xff] }
 0x2b0   : > { %4738 = vmatpush1.bf16.msra.mxu1 %v4737_v35  ;;  %v2187_v35 = vld [vmem:[%s6205_s6 + $0x2b8] sm:$0xff] }
 0x2b1   : > { %4740 = vmatprep.subr.bf16.mxu1 %v4739_v36  ;;  %v2193_v36 = vld [vmem:[%s6205_s6 + $0x2e8] sm:$0xff] }
 0x2b2   : > { %v5027_v41 = vpack.c.bf16 %v2193_v36, %v2187_v35  ;;  %v2490_v36 = vld [vmem:[%s6205_s6 + $0xc30] sm:$0xff] }
 0x2b4   : > { %4742 = vmatpush1.bf16.msra.mxu1 %v4741_v14 }
 0x2b5   : > { %5000 = vmatprep.subr.bf16.mxu1 %v4999_v40  ;;  %v5025_v40 = vpack.c.bf16 %v2180_v27, %v2174_v33  ;;  %v2484_v33 = vld [vmem:[%s6205_s6 + $0xc00] sm:$0xff] }
 0x2b7   : > { %2022 = vmatmul.mubr.f32.vlgmr.msra.gmra.mrb[4].mxu1 %v5682_v48  ;;  %v5029_v48 = vpack.c.bf16 %v2192_v43, %v2186_v42  ;;  %v2497_v43 = vld [vmem:[%s6205_s6 + $0xc68] sm:$0xff] }
 0x2b8   : > { %5002 = vmatpush1.bf16.msra.mxu1 %v5001_v44  ;;  %3216 = vmatprep.mubr.f32.mxu1 %v6959_v23 }
 0x2b9   : > { %5004 = vmatprep.subr.bf16.mxu1 %v5003_v12  ;;  %v2199_v12 = vld [vmem:[%s6205_s6 + $0x318] sm:$0xff] }
 0x2ba   : > { %v5031_v52 = vpack.c.bf16 %v2205_v45, %v2199_v12  ;;  %v2259_v45 = vld [vmem:[%s6205_s6 + $0x4f8] sm:$0xff] }
 0x2bc   : > { %5006 = vmatpush1.bf16.msra.mxu1 %v5005_v50 }
 0x2bd   : > { %5008 = vmatprep.subr.bf16.mxu1 %v5007_v51 }
 0x2c0   : > { %5010 = vmatpush1.bf16.msra.mxu1 %v5009_v60  ;;  %v2211_v60 = vld [vmem:[%s6205_s6 + $0x378] sm:$0xff] }
 0x2c1   : > { %5012 = vmatprep.subr.bf16.mxu1 %v5011_v61  ;;  %v2217_v61 = vld [vmem:[%s6205_s6 + $0x3a8] sm:$0xff] }
 0x2c2   : > { %v5035_v6 = vpack.c.bf16 %v2217_v61, %v2211_v60  ;;  %v2271_v60 = vld [vmem:[%s6205_s6 + $0x558] sm:$0xff]  ;;  %v2277_v61 = vld [vmem:[%s6205_s6 + $0x588] sm:$0xff] }
 0x2c3   : > { %v5055_v13 = vpack.c.bf16 %v2277_v61, %v2271_v60 }
 0x2c4   : > { %5014 = vmatpush1.bf16.msra.mxu1 %v5013_v8  ;;  %v2210_v8 = vld [vmem:[%s6205_s6 + $0x370] sm:$0xff] }
 0x2c5   : > { %5016 = vmatprep.subr.bf16.mxu1 %v5015_v11  ;;  %v2216_v11 = vld [vmem:[%s6205_s6 + $0x3a0] sm:$0xff] }
 0x2c6   : > { %v5037_v15 = vpack.c.bf16 %v2216_v11, %v2210_v8  ;;  %v2514_v8 = vld [vmem:[%s6205_s6 + $0xcf0] sm:$0xff] }
 0x2c7   : > { %v2270_v11 = vld [vmem:[%s6205_s6 + $0x550] sm:$0xff] }
 0x2c8   : > { %5018 = vmatpush1.bf16.msra.mxu1 %v5017_v3  ;;  %v2228_v3 = vld [vmem:[%s6205_s6 + $0x400] sm:$0xff] }
 0x2c9   : > { %5020 = vmatprep.subr.bf16.mxu1 %v5019_v19  ;;  %v2235_v19 = vld [vmem:[%s6205_s6 + $0x438] sm:$0xff]  ;;  %v5041_v22 = vpack.c.bf16 %v2228_v3, %v2222_v18  ;;  %v2289_v3 = vld [vmem:[%s6205_s6 + $0x5e8] sm:$0xff] }
 0x2ca   : > { %v1597_v34 = vpop.f32.mrb[2].mxu1  ;;  %v5043_v25 = vpack.c.bf16 %v2241_v21, %v2235_v19  ;;  %v2283_v18 = vld [vmem:[%s6205_s6 + $0x5b8] sm:$0xff]  ;;  %v5057_v21 = vpack.c.bf16 %v2276_v57, %v2270_v11  ;;  %v2324_v11 = vld [vmem:[%s6205_s6 + $0x700] sm:$0xff] }
 0x2cb   : > { %v7220_v37 = vadd.f32 %v1597_v34, %v1147_v26  ;;  %v1599_v9 = vpop.f32.mrb[3].mxu1  ;;  %v2240_v26 = vld [vmem:[%s6205_s6 + $0x460] sm:$0xff]  ;;  %v2575_v57 = vld [vmem:[%s6205_s6 + $0xed8] sm:$0xff] }
 0x2cc   : > { %v7223_v14 = vadd.f32 %v1599_v9, %v1151_v29  ;;  %5022 = vmatpush1.bf16.msra.mxu1 %v5021_v30  ;;  %v2253_v29 = vld [vmem:[%s6205_s6 + $0x4c8] sm:$0xff]  ;;  %v5661_v30 = vpop.eup %5660  ;;  %v5045_v35 = vpack.c.bf16 %v2240_v26, %v2234_v24  ;;  %v2520_v24 = vld [vmem:[%s6205_s6 + $0xd20] sm:$0xff]  ;;  %v2282_v26 = vld [vmem:[%s6205_s6 + $0x5b0] sm:$0xff] }
 0x2cd   : > { %v2046_v10 = vmul.f32 %v7220_v37, %v7220_v37  ;;  %5024 = vmatprep.subr.bf16.mxu1 %v5023_v31  ;;  %v2038_v50 = vmul.f32 0.7978846, %v7220_v37  ;;  %v5047_v9 = vpack.c.bf16 %v2253_v29, %v2247_v28  ;;  %v2089_v42 = vadd.f32 1.0, %v5661_v30  ;;  %v2288_v29 = vld [vmem:[%s6205_s6 + $0x5e0] sm:$0xff]  ;;  %v2533_v30 = vld [vmem:[%s6205_s6 + $0xd88] sm:$0xff] }
 0x2ce   : > { %v2047_v44 = vmul.f32 %v7223_v14, %v7223_v14  ;;  %v2039_v55 = vmul.f32 0.7978846, %v7223_v14  ;;  %v2030_v12 = vmul.f32 0.5, %v7220_v37  ;;  %v5059_v28 = vpack.c.bf16 %v2289_v3, %v2283_v18 }
 0x2cf   : > { %v2054_v46 = vmul.f32 0.044715, %v2046_v10  ;;  %v2031_v10 = vmul.f32 0.5, %v7223_v14  ;;  %v5049_v14 = vpack.c.bf16 %v2252_v39, %v2246_v38  ;;  %v2538_v38 = vld [vmem:[%s6205_s6 + $0xdb0] sm:$0xff] }
 0x2d0   : > { %v2055_v20 = vmul.f32 0.044715, %v2047_v44  ;;  %5026 = vmatpush1.bf16.msra.mxu1 %v5025_v40  ;;  %v2033_v40 = vmul.f32 0.5, %v7196_v7  ;;  %v2503_v44 = vld [vmem:[%s6205_s6 + $0xc98] sm:$0xff]  ;;  %v4873_v7 = vpack.c.bf16 %v2490_v36, %v2484_v33 }
 0x2d1   : > { %v2062_v51 = vadd.f32 1.0, %v2054_v46  ;;  %5028 = vmatprep.subr.bf16.mxu1 %v5027_v41  ;;  %v2265_v46 = vld [vmem:[%s6205_s6 + $0x528] sm:$0xff]  ;;  %v2295_v33 = vld [vmem:[%s6205_s6 + $0x618] sm:$0xff] }
 0x2d2   : > { %v2063_v59 = vadd.f32 1.0, %v2055_v20  ;;  %v7270_v37 = vmul.f32 %v2089_v42, %v2033_v40  ;;  %v5051_v53 = vpack.c.bf16 %v2265_v46, %v2259_v45  ;;  %v2294_v40 = vld [vmem:[%s6205_s6 + $0x610] sm:$0xff]  ;;  %v2551_v42 = vld [vmem:[%s6205_s6 + $0xe18] sm:$0xff]  ;;  %v2544_v46 = vld [vmem:[%s6205_s6 + $0xde0] sm:$0xff] }
 0x2d3   : > { %v2070_v62 = vmul.f32 %v2062_v51, %v2038_v50  ;;  %v2496_v50 = vld [vmem:[%s6205_s6 + $0xc60] sm:$0xff]  ;;  %v2502_v51 = vld [vmem:[%s6205_s6 + $0xc90] sm:$0xff] }
 0x2d4   : > { %v2071_v63 = vmul.f32 %v2063_v59, %v2039_v55  ;;  %5030 = vmatpush1.bf16.msra.mxu1 %v5029_v48  ;;  %v4875_v48 = vpack.c.bf16 %v2503_v44, %v2497_v43  ;;  %v2509_v55 = vld [vmem:[%s6205_s6 + $0xcc8] sm:$0xff]  ;;  %v2515_v59 = vld [vmem:[%s6205_s6 + $0xcf8] sm:$0xff] }
 0x2d5   : > { %5662 = vtanh.f32 %v2070_v62  ;;  %5032 = vmatprep.subr.bf16.mxu1 %v5031_v52  ;;  %v2258_v52 = vld [vmem:[%s6205_s6 + $0x4f0] sm:$0xff]  ;;  %v4877_v62 = vpack.c.bf16 %v2502_v51, %v2496_v50  ;;  %v2307_v43 = vld [vmem:[%s6205_s6 + $0x678] sm:$0xff]  ;;  %v2313_v44 = vld [vmem:[%s6205_s6 + $0x6a8] sm:$0xff] }
 0x2d6   : > { %5664 = vtanh.f32 %v2071_v63  ;;  %v5053_v63 = vpack.c.bf16 %v2264_v54, %v2258_v52  ;;  %v5067_v50 = vpack.c.bf16 %v2313_v44, %v2307_v43  ;;  %v2312_v51 = vld [vmem:[%s6205_s6 + $0x6a0] sm:$0xff]  ;;  %v2557_v52 = vld [vmem:[%s6205_s6 + $0xe48] sm:$0xff]  ;;  %v2319_v54 = vld [vmem:[%s6205_s6 + $0x6d8] sm:$0xff] }
 0x2d8   : > { %5034 = vmatpush1.bf16.msra.mxu1 %v5033_v0  ;;  %v4879_v0 = vpack.c.bf16 %v2515_v59, %v2509_v55  ;;  %v2325_v55 = vld [vmem:[%s6205_s6 + $0x708] sm:$0xff]  ;;  %v1154_v59 = vsub.s32 4, %v6902_v56 }
 0x2d9   : > { %5036 = vmatprep.subr.bf16.mxu1 %v5035_v6  ;;  %v2508_v6 = vld [vmem:[%s6205_s6 + $0xcc0] sm:$0xff] }
 0x2da   : > { %v4881_v19 = vpack.c.bf16 %v2514_v8, %v2508_v6  ;;  %v2318_v6 = vld [vmem:[%s6205_s6 + $0x6d0] sm:$0xff]  ;;  %v5071_v8 = vpack.c.bf16 %v2325_v55, %v2319_v54  ;;  %v1155_v18 = vrot.slane %v7186_v58, %v1154_v59  ;;  %v2343_v58 = vld [vmem:[%s6205_s6 + $0x798] sm:$0xff]  ;;  %v2373_v54 = vld [vmem:[%s6205_s6 + $0x888] sm:$0xff] }
 0x2dc   : > { %5038 = vmatpush1.bf16.msra.mxu1 %v5037_v15  ;;  %v2521_v15 = vld [vmem:[%s6205_s6 + $0xd28] sm:$0xff] }
 0x2dd   : > { %5040 = vmatprep.subr.bf16.mxu1 %v5039_v16  ;;  %v2527_v16 = vld [vmem:[%s6205_s6 + $0xd58] sm:$0xff] }
 0x2df   : > { %v5663_v31 = vpop.eup %5662 }
 0x2e0   : > { %v5665_v27 = vpop.eup %5664  ;;  %v2086_v34 = vadd.f32 1.0, %v5663_v31  ;;  %5042 = vmatpush1.bf16.msra.mxu1 %v5041_v22  ;;  %v4883_v22 = vpack.c.bf16 %v2527_v16, %v2521_v15  ;;  %v2539_v31 = vld [vmem:[%s6205_s6 + $0xdb8] sm:$0xff]  ;;  %v2337_v16 = vld [vmem:[%s6205_s6 + $0x768] sm:$0xff] }
 0x2e1   : > { %5044 = vmatprep.subr.bf16.mxu1 %v5043_v25  ;;  %v2087_v41 = vadd.f32 1.0, %v5665_v27  ;;  %v2526_v25 = vld [vmem:[%s6205_s6 + $0xd50] sm:$0xff]  ;;  %v2301_v27 = vld [vmem:[%s6205_s6 + $0x648] sm:$0xff]  ;;  %v4887_v36 = vpack.c.bf16 %v2539_v31, %v2533_v30  ;;  %v2331_v15 = vld [vmem:[%s6205_s6 + $0x738] sm:$0xff] }
 0x2e2   : > { %v7264_v20 = vmul.f32 %v2086_v34, %v2030_v12  ;;  %v4885_v34 = vpack.c.bf16 %v2526_v25, %v2520_v24  ;;  %v5063_v39 = vpack.c.bf16 %v2301_v27, %v2295_v33  ;;  %v2574_v24 = vld [vmem:[%s6205_s6 + $0xed0] sm:$0xff]  ;;  %v2587_v30 = vld [vmem:[%s6205_s6 + $0xf38] sm:$0xff]  ;;  %v2349_v31 = vld [vmem:[%s6205_s6 + $0x7c8] sm:$0xff]  ;;  %v7334_v33 = vadd.f32 %v7147_v2, %v1155_v18 }
 0x2e3   : > { %v7262_v47 = vmul.f32 %v2087_v41, %v2031_v10  ;;  %v2300_v10 = vld [vmem:[%s6205_s6 + $0x640] sm:$0xff]  ;;  %v2545_v41 = vld [vmem:[%s6205_s6 + $0xde8] sm:$0xff]  ;;  %v2330_v25 = vld [vmem:[%s6205_s6 + $0x730] sm:$0xff] }
 0x2e4   : > { %5046 = vmatpush1.bf16.msra.mxu1 %v5045_v35  ;;  %v5061_v35 = vpack.c.bf16 %v2288_v29, %v2282_v26  ;;  %v5065_v45 = vpack.c.bf16 %v2300_v10, %v2294_v40  ;;  %v5075_v26 = vpack.c.bf16 %v2337_v16, %v2331_v15  ;;  %v2581_v29 = vld [vmem:[%s6205_s6 + $0xf08] sm:$0xff]  ;;  %v2348_v40 = vld [vmem:[%s6205_s6 + $0x7c0] sm:$0xff]  ;;  %v2599_v2 = vld [vmem:[%s6205_s6 + $0xf98] sm:$0xff]  ;;  %v2048_v43 = vmul.f32 %v7334_v33, %v7334_v33 }
 0x2e5   : > { %3003 = vmatprep.mubr.f32.mxu0 %v7262_v47  ;;  %5048 = vmatprep.subr.bf16.mxu1 %v5047_v9  ;;  %v2532_v9 = vld [vmem:[%s6205_s6 + $0xd80] sm:$0xff]  ;;  %v2593_v10 = vld [vmem:[%s6205_s6 + $0xf68] sm:$0xff]  ;;  %v2379_v15 = vld [vmem:[%s6205_s6 + $0x8b8] sm:$0xff]  ;;  %v2040_v18 = vmul.f32 0.7978846, %v7334_v33 }
 0x2e6   : > { %3004 = vmatmul.mubr.f32.vlgmr.msra.gmra.mrb[4].mxu0 %v7264_v20  ;;  %v4889_v12 = vpack.c.bf16 %v2538_v38, %v2532_v9  ;;  %v2586_v9 = vld [vmem:[%s6205_s6 + $0xf30] sm:$0xff]  ;;  %v2056_v55 = vmul.f32 0.044715, %v2048_v43  ;;  %v2385_v16 = vld [vmem:[%s6205_s6 + $0x8e8] sm:$0xff]  ;;  %v2403_v43 = vld [vmem:[%s6205_s6 + $0x978] sm:$0xff] }
 0x2e7   : > { %4874 = vmatpush1.bf16.msra.mxu0 %v4873_v7  ;;  %3074 = vmatprep.mubr.f32.mxu0 %v7270_v37  ;;  %v2550_v7 = vld [vmem:[%s6205_s6 + $0xe10] sm:$0xff] }
 0x2e8   : > { %5050 = vmatpush1.bf16.msra.mxu1 %v5049_v14  ;;  %4876 = vmatprep.subr.bf16.mxu0 %v4875_v48  ;;  %v2306_v14 = vld [vmem:[%s6205_s6 + $0x670] sm:$0xff]  ;;  %v4891_v48 = vpack.c.bf16 %v2551_v42, %v2545_v41  ;;  %v4893_v60 = vpack.c.bf16 %v2550_v7, %v2544_v46  ;;  %v2355_v41 = vld [vmem:[%s6205_s6 + $0x7f8] sm:$0xff]  ;;  %v2361_v42 = vld [vmem:[%s6205_s6 + $0x828] sm:$0xff] }
 0x2e9   : > { %5052 = vmatprep.subr.bf16.mxu1 %v5051_v53  ;;  %v2563_v53 = vld [vmem:[%s6205_s6 + $0xe78] sm:$0xff]  ;;  %v5069_v61 = vpack.c.bf16 %v2312_v51, %v2306_v14  ;;  %v2342_v38 = vld [vmem:[%s6205_s6 + $0x790] sm:$0xff]  ;;  %v2592_v46 = vld [vmem:[%s6205_s6 + $0xf60] sm:$0xff] }
 0x2ea   : > { %v2598_v7 = vld [vmem:[%s6205_s6 + $0xf90] sm:$0xff]  ;;  %v2605_v51 = vld [vmem:[%s6205_s6 + $0xfc8] sm:$0xff] }
 0x2eb   : > { %4878 = vmatpush1.bf16.msra.mxu0 %v4877_v62  ;;  %v4895_v62 = vpack.c.bf16 %v2563_v53, %v2557_v52  ;;  %v2354_v14 = vld [vmem:[%s6205_s6 + $0x7f0] sm:$0xff]  ;;  %v2611_v52 = vld [vmem:[%s6205_s6 + $0xff8] sm:$0xff] }
 0x2ec   : > { %5054 = vmatpush1.bf16.msra.mxu1 %v5053_v63  ;;  %4880 = vmatprep.subr.bf16.mxu0 %v4879_v0  ;;  %v2556_v63 = vld [vmem:[%s6205_s6 + $0xe40] sm:$0xff]  ;;  %v2562_v0 = vld [vmem:[%s6205_s6 + $0xe70] sm:$0xff]  ;;  %v2367_v53 = vld [vmem:[%s6205_s6 + $0x858] sm:$0xff] }
 0x2ed   : > { %5056 = vmatprep.subr.bf16.mxu1 %v5055_v13  ;;  %v2569_v13 = vld [vmem:[%s6205_s6 + $0xea8] sm:$0xff]  ;;  %v4897_v3 = vpack.c.bf16 %v2562_v0, %v2556_v63  ;;  %v2604_v63 = vld [vmem:[%s6205_s6 + $0xfc0] sm:$0xff]  ;;  %v2610_v0 = vld [vmem:[%s6205_s6 + $0xff0] sm:$0xff] }
 0x2ef   : > { %4882 = vmatpush1.bf16.msra.mxu0 %v4881_v19  ;;  %v5073_v19 = vpack.c.bf16 %v2324_v11, %v2318_v6  ;;  %v2366_v6 = vld [vmem:[%s6205_s6 + $0x850] sm:$0xff]  ;;  %v2372_v11 = vld [vmem:[%s6205_s6 + $0x880] sm:$0xff] }
 0x2f0   : > { %5058 = vmatpush1.bf16.msra.mxu1 %v5057_v21  ;;  %4884 = vmatprep.subr.bf16.mxu0 %v4883_v22  ;;  %v4899_v21 = vpack.c.bf16 %v2575_v57, %v2569_v13  ;;  %v2568_v22 = vld [vmem:[%s6205_s6 + $0xea0] sm:$0xff]  ;;  %v2617_v13 = vld [vmem:[%s6205_s6 + $0x1028] sm:$0xff]  ;;  %v2623_v57 = vld [vmem:[%s6205_s6 + $0x1058] sm:$0xff] }
 0x2f1   : > { %5060 = vmatprep.subr.bf16.mxu1 %v5059_v28  ;;  %v2336_v28 = vld [vmem:[%s6205_s6 + $0x760] sm:$0xff]  ;;  %v4901_v27 = vpack.c.bf16 %v2574_v24, %v2568_v22  ;;  %v4915_v22 = vpack.c.bf16 %v2623_v57, %v2617_v13  ;;  %v2665_v13 = vld [vmem:[%s6205_s6 + $0x11a8] sm:$0xff]  ;;  %v2671_v57 = vld [vmem:[%s6205_s6 + $0x11d8] sm:$0xff] }
 0x2f2   : > { %v2616_v24 = vld [vmem:[%s6205_s6 + $0x1020] sm:$0xff] }
 0x2f3   : > { %4886 = vmatpush1.bf16.msra.mxu0 %v4885_v34  ;;  %v5077_v34 = vpack.c.bf16 %v2336_v28, %v2330_v25  ;;  %v2622_v25 = vld [vmem:[%s6205_s6 + $0x1050] sm:$0xff]  ;;  %v5091_v28 = vpack.c.bf16 %v2385_v16, %v2379_v15  ;;  %v2427_v15 = vld [vmem:[%s6205_s6 + $0xa38] sm:$0xff]  ;;  %v2433_v16 = vld [vmem:[%s6205_s6 + $0xa68] sm:$0xff] }
 0x2f4   : > { %5062 = vmatpush1.bf16.msra.mxu1 %v5061_v35  ;;  %4888 = vmatprep.subr.bf16.mxu0 %v4887_v36  ;;  %v4903_v35 = vpack.c.bf16 %v2587_v30, %v2581_v29  ;;  %v2580_v36 = vld [vmem:[%s6205_s6 + $0xf00] sm:$0xff]  ;;  %v2629_v30 = vld [vmem:[%s6205_s6 + $0x1088] sm:$0xff] }
 0x2f5   : > { %5064 = vmatprep.subr.bf16.mxu1 %v5063_v39  ;;  %v5079_v39 = vpack.c.bf16 %v2349_v31, %v2343_v58  ;;  %v4905_v44 = vpack.c.bf16 %v2586_v9, %v2580_v36  ;;  %v2384_v29 = vld [vmem:[%s6205_s6 + $0x8e0] sm:$0xff]  ;;  %v2635_v58 = vld [vmem:[%s6205_s6 + $0x10b8] sm:$0xff] }
 0x2f6   : > { %v2391_v31 = vld [vmem:[%s6205_s6 + $0x918] sm:$0xff]  ;;  %v4919_v9 = vpack.c.bf16 %v2635_v58, %v2629_v30 }
 0x2f7   : > { %4890 = vmatpush1.bf16.msra.mxu0 %v4889_v12  ;;  %3217 = vmatmul.mubr.f32.vlgmr.msra.gmra.mrb[6].mxu1 %v6964_v32  ;;  %v5081_v12 = vpack.c.bf16 %v2348_v40, %v2342_v38  ;;  %v2628_v38 = vld [vmem:[%s6205_s6 + $0x1080] sm:$0xff]  ;;  %v2390_v40 = vld [vmem:[%s6205_s6 + $0x910] sm:$0xff]  ;;  %v2683_v30 = vld [vmem:[%s6205_s6 + $0x1238] sm:$0xff] }
 0x2f8   : > { %5066 = vmatpush1.bf16.msra.mxu1 %v5065_v45  ;;  %3287 = vmatprep.mubr.f32.mxu1 %v7262_v47  ;;  %v4907_v45 = vpack.c.bf16 %v2599_v2, %v2593_v10  ;;  %v2396_v2 = vld [vmem:[%s6205_s6 + $0x940] sm:$0xff]  ;;  %v2439_v58 = vld [vmem:[%s6205_s6 + $0xa98] sm:$0xff] }
 0x2f9   : > { %4892 = vmatprep.subr.bf16.mxu0 %v4891_v48  ;;  %5068 = vmatprep.subr.bf16.mxu1 %v5067_v50  ;;  %v5083_v48 = vpack.c.bf16 %v2361_v42, %v2355_v41  ;;  %v2360_v50 = vld [vmem:[%s6205_s6 + $0x820] sm:$0xff]  ;;  %v2641_v41 = vld [vmem:[%s6205_s6 + $0x10e8] sm:$0xff]  ;;  %v2647_v42 = vld [vmem:[%s6205_s6 + $0x1118] sm:$0xff] }
 0x2fb   : > { %4894 = vmatpush1.bf16.msra.mxu0 %v4893_v60  ;;  %v4909_v60 = vpack.c.bf16 %v2598_v7, %v2592_v46  ;;  %v4923_v46 = vpack.c.bf16 %v2647_v42, %v2641_v41  ;;  %v2640_v7 = vld [vmem:[%s6205_s6 + $0x10e0] sm:$0xff]  ;;  %v2689_v41 = vld [vmem:[%s6205_s6 + $0x1268] sm:$0xff]  ;;  %v2695_v42 = vld [vmem:[%s6205_s6 + $0x1298] sm:$0xff] }
 0x2fc   : > { %5070 = vmatpush1.bf16.msra.mxu1 %v5069_v61  ;;  %4896 = vmatprep.subr.bf16.mxu0 %v4895_v62  ;;  %v5085_v61 = vpack.c.bf16 %v2360_v50, %v2354_v14  ;;  %v4911_v62 = vpack.c.bf16 %v2611_v52, %v2605_v51  ;;  %v2646_v14 = vld [vmem:[%s6205_s6 + $0x1110] sm:$0xff]  ;;  %v2408_v51 = vld [vmem:[%s6205_s6 + $0x9a0] sm:$0xff]  ;;  %v2653_v52 = vld [vmem:[%s6205_s6 + $0x1148] sm:$0xff] }
 0x2fd   : > { %5072 = vmatprep.subr.bf16.mxu1 %v5071_v8  ;;  %v5087_v8 = vpack.c.bf16 %v2373_v54, %v2367_v53  ;;  %v2659_v53 = vld [vmem:[%s6205_s6 + $0x1178] sm:$0xff] }
 0x2fe   : > { %v2415_v54 = vld [vmem:[%s6205_s6 + $0x9d8] sm:$0xff] }
 0x2ff   : > { %4898 = vmatpush1.bf16.msra.mxu0 %v4897_v3  ;;  %v2064_v3 = vadd.f32 1.0, %v2056_v55  ;;  %v2421_v55 = vld [vmem:[%s6205_s6 + $0xa08] sm:$0xff] }
 0x300   : > { %5074 = vmatpush1.bf16.msra.mxu1 %v5073_v19  ;;  %4900 = vmatprep.subr.bf16.mxu0 %v4899_v21  ;;  %v4913_v19 = vpack.c.bf16 %v2610_v0, %v2604_v63  ;;  %v5089_v21 = vpack.c.bf16 %v2372_v11, %v2366_v6  ;;  %v2652_v63 = vld [vmem:[%s6205_s6 + $0x1140] sm:$0xff]  ;;  %v2658_v0 = vld [vmem:[%s6205_s6 + $0x1170] sm:$0xff] }
 0x301   : > { %5076 = vmatprep.subr.bf16.mxu1 %v5075_v26  ;;  %v2378_v26 = vld [vmem:[%s6205_s6 + $0x8b0] sm:$0xff]  ;;  %v2420_v11 = vld [vmem:[%s6205_s6 + $0xa00] sm:$0xff] }
 0x302   : > { %v5093_v36 = vpack.c.bf16 %v2384_v29, %v2378_v26  ;;  %v2414_v6 = vld [vmem:[%s6205_s6 + $0x9d0] sm:$0xff]  ;;  %v5107_v26 = vpack.c.bf16 %v2433_v16, %v2427_v15  ;;  %v2677_v29 = vld [vmem:[%s6205_s6 + $0x1208] sm:$0xff]  ;;  %v2475_v15 = vld [vmem:[%s6205_s6 + $0xbb8] sm:$0xff] }
 0x303   : > { %4902 = vmatpush1.bf16.msra.mxu0 %v4901_v27  ;;  %v2397_v27 = vld [vmem:[%s6205_s6 + $0x948] sm:$0xff] }
 0x304   : > { %5078 = vmatpush1.bf16.msra.mxu1 %v5077_v34  ;;  %4904 = vmatprep.subr.bf16.mxu0 %v4903_v35  ;;  %v2072_v34 = vmul.f32 %v2064_v3, %v2040_v18  ;;  %v4917_v35 = vpack.c.bf16 %v2622_v25, %v2616_v24  ;;  %v5095_v10 = vpack.c.bf16 %v2397_v27, %v2391_v31  ;;  %v2426_v24 = vld [vmem:[%s6205_s6 + $0xa30] sm:$0xff]  ;;  %v2445_v31 = vld [vmem:[%s6205_s6 + $0xac8] sm:$0xff] }
 0x305   : > { %5080 = vmatprep.subr.bf16.mxu1 %v5079_v39  ;;  %v2634_v39 = vld [vmem:[%s6205_s6 + $0x10b0] sm:$0xff]  ;;  %v4929_v18 = vpack.c.bf16 %v2658_v0, %v2652_v63  ;;  %v5105_v3 = vpack.c.bf16 %v2420_v11, %v2414_v6  ;;  %v2700_v0 = vld [vmem:[%s6205_s6 + $0x12c0] sm:$0xff]  ;;  %v2481_v16 = vld [vmem:[%s6205_s6 + $0xbe8] sm:$0xff] }
 0x306   : > { %5666 = vtanh.f32 %v2072_v34  ;;  %v2032_v34 = vmul.f32 0.5, %v7334_v33  ;;  %v2457_v33 = vld [vmem:[%s6205_s6 + $0xb28] sm:$0xff]  ;;  %v2706_v6 = vld [vmem:[%s6205_s6 + $0x12f0] sm:$0xff]  ;;  %v2468_v11 = vld [vmem:[%s6205_s6 + $0xb80] sm:$0xff] }
 0x307   : > { %4906 = vmatpush1.bf16.msra.mxu0 %v4905_v44  ;;  %v2409_v44 = vld [vmem:[%s6205_s6 + $0x9a8] sm:$0xff] }
 0x308   : > { %5082 = vmatpush1.bf16.msra.mxu1 %v5081_v12  ;;  %4908 = vmatprep.subr.bf16.mxu0 %v4907_v45  ;;  %v4921_v12 = vpack.c.bf16 %v2634_v39, %v2628_v38  ;;  %v5097_v45 = vpack.c.bf16 %v2396_v2, %v2390_v40  ;;  %v5099_v50 = vpack.c.bf16 %v2409_v44, %v2403_v43  ;;  %v2676_v39 = vld [vmem:[%s6205_s6 + $0x1200] sm:$0xff]  ;;  %v2682_v40 = vld [vmem:[%s6205_s6 + $0x1230] sm:$0xff]  ;;  %v2451_v43 = vld [vmem:[%s6205_s6 + $0xaf8] sm:$0xff] }
 0x309   : > { %5084 = vmatprep.subr.bf16.mxu1 %v5083_v48  ;;  %v2402_v48 = vld [vmem:[%s6205_s6 + $0x970] sm:$0xff]  ;;  %v4935_v38 = vpack.c.bf16 %v2683_v30, %v2677_v29  ;;  %v2444_v2 = vld [vmem:[%s6205_s6 + $0xac0] sm:$0xff]  ;;  %v4937_v44 = vpack.c.bf16 %v2682_v40, %v2676_v39  ;;  %v2731_v29 = vld [vmem:[%s6205_s6 + $0x13b8] sm:$0xff] }
 0x30a   : > { %v2487_v30 = vld [vmem:[%s6205_s6 + $0xc18] sm:$0xff]  ;;  %v2492_v39 = vld [vmem:[%s6205_s6 + $0xc40] sm:$0xff] }
 0x30b   : > { %4910 = vmatpush1.bf16.msra.mxu0 %v4909_v60  ;;  %v4925_v60 = vpack.c.bf16 %v2646_v14, %v2640_v7  ;;  %v4939_v7 = vpack.c.bf16 %v2695_v42, %v2689_v41  ;;  %v2688_v14 = vld [vmem:[%s6205_s6 + $0x1260] sm:$0xff]  ;;  %v2499_v40 = vld [vmem:[%s6205_s6 + $0xc78] sm:$0xff] }
 0x30c   : > { %5086 = vmatpush1.bf16.msra.mxu1 %v5085_v61  ;;  %4912 = vmatprep.subr.bf16.mxu0 %v4911_v62  ;;  %v5101_v61 = vpack.c.bf16 %v2408_v51, %v2402_v48  ;;  %v4927_v62 = vpack.c.bf16 %v2659_v53, %v2653_v52  ;;  %v2694_v48 = vld [vmem:[%s6205_s6 + $0x1290] sm:$0xff]  ;;  %v2456_v51 = vld [vmem:[%s6205_s6 + $0xb20] sm:$0xff]  ;;  %v2701_v52 = vld [vmem:[%s6205_s6 + $0x12c8] sm:$0xff] }
 0x30d   : > { %5088 = vmatprep.subr.bf16.mxu1 %v5087_v8  ;;  %v5103_v8 = vpack.c.bf16 %v2421_v55, %v2415_v54  ;;  %v2707_v53 = vld [vmem:[%s6205_s6 + $0x12f8] sm:$0xff]  ;;  %v2469_v55 = vld [vmem:[%s6205_s6 + $0xb88] sm:$0xff] }
 0x30e   : > { %v2463_v54 = vld [vmem:[%s6205_s6 + $0xb58] sm:$0xff]  ;;  %v4943_v63 = vpack.c.bf16 %v2707_v53, %v2701_v52  ;;  %v2517_v52 = vld [vmem:[%s6205_s6 + $0xd08] sm:$0xff] }
 0x30f   : > { %4914 = vmatpush1.bf16.msra.mxu0 %v4913_v19  ;;  %v4931_v19 = vpack.c.bf16 %v2671_v57, %v2665_v13  ;;  %v2713_v13 = vld [vmem:[%s6205_s6 + $0x1328] sm:$0xff]  ;;  %v2719_v57 = vld [vmem:[%s6205_s6 + $0x1358] sm:$0xff] }
 0x310   : > { %5090 = vmatpush1.bf16.msra.mxu1 %v5089_v21  ;;  %4916 = vmatprep.subr.bf16.mxu0 %v4915_v22  ;;  %v2664_v21 = vld [vmem:[%s6205_s6 + $0x11a0] sm:$0xff]  ;;  %v2670_v22 = vld [vmem:[%s6205_s6 + $0x11d0] sm:$0xff]  ;;  %v5667_v25 = vpop.eup %5666  ;;  %v2743_v41 = vld [vmem:[%s6205_s6 + $0x1418] sm:$0xff] }
 0x311   : > { %5092 = vmatprep.subr.bf16.mxu1 %v5091_v28  ;;  %v2432_v28 = vld [vmem:[%s6205_s6 + $0xa60] sm:$0xff]  ;;  %v4933_v27 = vpack.c.bf16 %v2670_v22, %v2664_v21  ;;  %v4947_v21 = vpack.c.bf16 %v2719_v57, %v2713_v13  ;;  %v2529_v13 = vld [vmem:[%s6205_s6 + $0xd68] sm:$0xff] }
 0x312   : > { %v2712_v22 = vld [vmem:[%s6205_s6 + $0x1320] sm:$0xff] }
 0x313   : > { %4918 = vmatpush1.bf16.msra.mxu0 %v4917_v35  ;;  %v2088_v35 = vadd.f32 1.0, %v5667_v25  ;;  %v5123_v25 = vpack.c.bf16 %v2481_v16, %v2475_v15  ;;  %v2522_v16 = vld [vmem:[%s6205_s6 + $0xd30] sm:$0xff] }
 0x314   : > { %5094 = vmatpush1.bf16.msra.mxu1 %v5093_v36  ;;  %4920 = vmatprep.subr.bf16.mxu0 %v4919_v9  ;;  %v5109_v36 = vpack.c.bf16 %v2432_v28, %v2426_v24  ;;  %v2438_v9 = vld [vmem:[%s6205_s6 + $0xa90] sm:$0xff]  ;;  %v2725_v28 = vld [vmem:[%s6205_s6 + $0x1388] sm:$0xff] }
 0x315   : > { %5096 = vmatprep.subr.bf16.mxu1 %v5095_v10  ;;  %v5111_v10 = vpack.c.bf16 %v2445_v31, %v2439_v58  ;;  %v2718_v24 = vld [vmem:[%s6205_s6 + $0x1350] sm:$0xff]  ;;  %v2493_v58 = vld [vmem:[%s6205_s6 + $0xc48] sm:$0xff] }
 0x316   : > { %v4949_v31 = vpack.c.bf16 %v2718_v24, %v2712_v22  ;;  %v2528_v22 = vld [vmem:[%s6205_s6 + $0xd60] sm:$0xff]  ;;  %v2773_v24 = vld [vmem:[%s6205_s6 + $0x1508] sm:$0xff] }
 0x317   : > { %4922 = vmatpush1.bf16.msra.mxu0 %v4921_v12  ;;  %v7412_v12 = vmul.f32 %v2088_v35, %v2032_v34  ;;  %v4951_v34 = vpack.c.bf16 %v2731_v29, %v2725_v28  ;;  %v2724_v35 = vld [vmem:[%s6205_s6 + $0x1380] sm:$0xff]  ;;  %v2541_v28 = vld [vmem:[%s6205_s6 + $0xdc8] sm:$0xff] }
 0x318   : > { %5098 = vmatpush1.bf16.msra.mxu1 %v5097_v45  ;;  %4924 = vmatprep.subr.bf16.mxu0 %v4923_v46  ;;  %v5113_v45 = vpack.c.bf16 %v2444_v2, %v2438_v9  ;;  %v2450_v46 = vld [vmem:[%s6205_s6 + $0xaf0] sm:$0xff]  ;;  %v5127_v9 = vpack.c.bf16 %v2493_v58, %v2487_v30  ;;  %v2737_v2 = vld [vmem:[%s6205_s6 + $0x13e8] sm:$0xff]  ;;  %v5141_v30 = vpack.c.bf16 %v2528_v22, %v2522_v16  ;;  %v2583_v22 = vld [vmem:[%s6205_s6 + $0xf18] sm:$0xff] }
 0x319   : > { %5100 = vmatprep.subr.bf16.mxu1 %v5099_v50  ;;  %v5115_v50 = vpack.c.bf16 %v2457_v33, %v2451_v43  ;;  %v2498_v33 = vld [vmem:[%s6205_s6 + $0xc70] sm:$0xff] }
 0x31a   : > { %v2534_v58 = vld [vmem:[%s6205_s6 + $0xd90] sm:$0xff] }
 0x31b   : > { %4926 = vmatpush1.bf16.msra.mxu0 %v4925_v60  ;;  %v4941_v60 = vpack.c.bf16 %v2694_v48, %v2688_v14  ;;  %v4955_v14 = vpack.c.bf16 %v2743_v41, %v2737_v2  ;;  %v2749_v48 = vld [vmem:[%s6205_s6 + $0x1448] sm:$0xff]  ;;  %v2546_v41 = vld [vmem:[%s6205_s6 + $0xdf0] sm:$0xff] }
 0x31c   : > { %5102 = vmatpush1.bf16.msra.mxu1 %v5101_v61  ;;  %4928 = vmatprep.subr.bf16.mxu0 %v4927_v62  ;;  %v5117_v61 = vpack.c.bf16 %v2456_v51, %v2450_v46  ;;  %v2462_v62 = vld [vmem:[%s6205_s6 + $0xb50] sm:$0xff]  ;;  %v2511_v51 = vld [vmem:[%s6205_s6 + $0xcd8] sm:$0xff] }
 0x31d   : > { %5104 = vmatprep.subr.bf16.mxu1 %v5103_v8  ;;  %v5119_v8 = vpack.c.bf16 %v2469_v55, %v2463_v54  ;;  %v2510_v55 = vld [vmem:[%s6205_s6 + $0xcd0] sm:$0xff] }
 0x31e   : > { %v2814_v16 = vld [vmem:[%s6205_s6 + $0x1650] sm:$0xff] }
 0x31f   : > { %4930 = vmatpush1.bf16.msra.mxu0 %v4929_v18  ;;  %v4945_v18 = vpack.c.bf16 %v2706_v6, %v2700_v0  ;;  %v2516_v0 = vld [vmem:[%s6205_s6 + $0xd00] sm:$0xff]  ;;  %v2761_v6 = vld [vmem:[%s6205_s6 + $0x14a8] sm:$0xff] }
 0x320   : > { %5106 = vmatpush1.bf16.msra.mxu1 %v5105_v3  ;;  %4932 = vmatprep.subr.bf16.mxu0 %v4931_v19  ;;  %v5121_v3 = vpack.c.bf16 %v2468_v11, %v2462_v62  ;;  %v2474_v19 = vld [vmem:[%s6205_s6 + $0xbb0] sm:$0xff]  ;;  %v2523_v11 = vld [vmem:[%s6205_s6 + $0xd38] sm:$0xff]  ;;  %v5137_v15 = vpack.c.bf16 %v2516_v0, %v2510_v55 }
 0x321   : > { %5108 = vmatprep.subr.bf16.mxu1 %v5107_v26  ;;  %v2480_v26 = vld [vmem:[%s6205_s6 + $0xbe0] sm:$0xff]  ;;  %v2754_v62 = vld [vmem:[%s6205_s6 + $0x1470] sm:$0xff]  ;;  %v2571_v0 = vld [vmem:[%s6205_s6 + $0xeb8] sm:$0xff] }
 0x322   : > { %v2802_v55 = vld [vmem:[%s6205_s6 + $0x15f0] sm:$0xff] }
 0x323   : > { %4934 = vmatpush1.bf16.msra.mxu0 %v4933_v27  ;;  %v5125_v27 = vpack.c.bf16 %v2480_v26, %v2474_v19  ;;  %v2766_v19 = vld [vmem:[%s6205_s6 + $0x14d0] sm:$0xff]  ;;  %v2535_v26 = vld [vmem:[%s6205_s6 + $0xd98] sm:$0xff] }
 0x324   : > { %5110 = vmatpush1.bf16.msra.mxu1 %v5109_v36  ;;  %4936 = vmatprep.subr.bf16.mxu0 %v4935_v38  ;;  %v2730_v36 = vld [vmem:[%s6205_s6 + $0x13b0] sm:$0xff] }
 0x325   : > { %5112 = vmatprep.subr.bf16.mxu1 %v5111_v10  ;;  %v2486_v38 = vld [vmem:[%s6205_s6 + $0xc10] sm:$0xff]  ;;  %v2505_v10 = vld [vmem:[%s6205_s6 + $0xca8] sm:$0xff]  ;;  %v4953_v42 = vpack.c.bf16 %v2730_v36, %v2724_v35  ;;  %v5143_v35 = vpack.c.bf16 %v2541_v28, %v2535_v26  ;;  %v2540_v36 = vld [vmem:[%s6205_s6 + $0xdc0] sm:$0xff] }
 0x326   : > { %3075 = vmatmul.mubr.f32.vlgmr.msra.gmra.mrb[4].mxu0 %v7412_v12  ;;  %v5129_v43 = vpack.c.bf16 %v2492_v39, %v2486_v38  ;;  %v5131_v46 = vpack.c.bf16 %v2505_v10, %v2499_v40  ;;  %v2791_v38 = vld [vmem:[%s6205_s6 + $0x1598] sm:$0xff]  ;;  %v2553_v40 = vld [vmem:[%s6205_s6 + $0xe28] sm:$0xff]  ;;  %v5145_v2 = vpack.c.bf16 %v2540_v36, %v2534_v58  ;;  %v2582_v28 = vld [vmem:[%s6205_s6 + $0xf10] sm:$0xff] }
 0x327   : > { %4938 = vmatpush1.bf16.msra.mxu0 %v4937_v44  ;;  %v2736_v44 = vld [vmem:[%s6205_s6 + $0x13e0] sm:$0xff]  ;;  %v2547_v39 = vld [vmem:[%s6205_s6 + $0xdf8] sm:$0xff]  ;;  %v2826_v58 = vld [vmem:[%s6205_s6 + $0x16b0] sm:$0xff] }
 0x328   : > { %5114 = vmatpush1.bf16.msra.mxu1 %v5113_v45  ;;  %4940 = vmatprep.subr.bf16.mxu0 %v4939_v7  ;;  %v2742_v45 = vld [vmem:[%s6205_s6 + $0x1410] sm:$0xff]  ;;  %v2504_v7 = vld [vmem:[%s6205_s6 + $0xca0] sm:$0xff]  ;;  %v2595_v36 = vld [vmem:[%s6205_s6 + $0xf78] sm:$0xff] }
 0x329   : > { %5116 = vmatprep.subr.bf16.mxu1 %v5115_v50  ;;  %v2755_v50 = vld [vmem:[%s6205_s6 + $0x1478] sm:$0xff]  ;;  %v4957_v53 = vpack.c.bf16 %v2742_v45, %v2736_v44  ;;  %v5133_v54 = vpack.c.bf16 %v2504_v7, %v2498_v33  ;;  %v2790_v33 = vld [vmem:[%s6205_s6 + $0x1590] sm:$0xff]  ;;  %v5147_v44 = vpack.c.bf16 %v2553_v40, %v2547_v39  ;;  %v2552_v45 = vld [vmem:[%s6205_s6 + $0xe20] sm:$0xff] }
 0x32a   : > { %v2803_v7 = vld [vmem:[%s6205_s6 + $0x15f8] sm:$0xff]  ;;  %v2594_v40 = vld [vmem:[%s6205_s6 + $0xf70] sm:$0xff] }
 0x32b   : > { %4942 = vmatpush1.bf16.msra.mxu0 %v4941_v60  ;;  %v4959_v60 = vpack.c.bf16 %v2755_v50, %v2749_v48  ;;  %v2565_v48 = vld [vmem:[%s6205_s6 + $0xe88] sm:$0xff] }
 0x32c   : > { %5118 = vmatpush1.bf16.msra.mxu1 %v5117_v61  ;;  %4944 = vmatprep.subr.bf16.mxu0 %v4943_v63  ;;  %v2748_v61 = vld [vmem:[%s6205_s6 + $0x1440] sm:$0xff]  ;;  %v5135_v63 = vpack.c.bf16 %v2517_v52, %v2511_v51  ;;  %v5149_v51 = vpack.c.bf16 %v2552_v45, %v2546_v41  ;;  %v2558_v52 = vld [vmem:[%s6205_s6 + $0xe50] sm:$0xff]  ;;  %v2607_v45 = vld [vmem:[%s6205_s6 + $0xfd8] sm:$0xff] }
 0x32d   : > { %5120 = vmatprep.subr.bf16.mxu1 %v5119_v8  ;;  %v2767_v8 = vld [vmem:[%s6205_s6 + $0x14d8] sm:$0xff]  ;;  %v4961_v57 = vpack.c.bf16 %v2754_v62, %v2748_v61  ;;  %v2564_v61 = vld [vmem:[%s6205_s6 + $0xe80] sm:$0xff]  ;;  %v2809_v62 = vld [vmem:[%s6205_s6 + $0x1628] sm:$0xff] }
 0x32e   : > { %v2838_v41 = vld [vmem:[%s6205_s6 + $0x1710] sm:$0xff] }
 0x32f   : > { %4946 = vmatpush1.bf16.msra.mxu0 %v4945_v18  ;;  %v4963_v18 = vpack.c.bf16 %v2767_v8, %v2761_v6  ;;  %v2577_v6 = vld [vmem:[%s6205_s6 + $0xee8] sm:$0xff] }
 0x330   : > { %5122 = vmatpush1.bf16.msra.mxu1 %v5121_v3  ;;  %4948 = vmatprep.subr.bf16.mxu0 %v4947_v21  ;;  %v2760_v3 = vld [vmem:[%s6205_s6 + $0x14a0] sm:$0xff]  ;;  %v5139_v21 = vpack.c.bf16 %v2529_v13, %v2523_v11  ;;  %v5153_v11 = vpack.c.bf16 %v2564_v61, %v2558_v52  ;;  %v2570_v13 = vld [vmem:[%s6205_s6 + $0xeb0] sm:$0xff]  ;;  %v2619_v61 = vld [vmem:[%s6205_s6 + $0x1038] sm:$0xff] }
 0x331   : > { %5124 = vmatprep.subr.bf16.mxu1 %v5123_v25  ;;  %v2779_v25 = vld [vmem:[%s6205_s6 + $0x1538] sm:$0xff]  ;;  %v4965_v29 = vpack.c.bf16 %v2766_v19, %v2760_v3  ;;  %v2576_v3 = vld [vmem:[%s6205_s6 + $0xee0] sm:$0xff]  ;;  %v2821_v19 = vld [vmem:[%s6205_s6 + $0x1688] sm:$0xff] }
 0x332   : > { %v5157_v26 = vpack.c.bf16 %v2576_v3, %v2570_v13  ;;  %v2850_v52 = vld [vmem:[%s6205_s6 + $0x1770] sm:$0xff]  ;;  %v2631_v3 = vld [vmem:[%s6205_s6 + $0x1098] sm:$0xff] }
 0x333   : > { %4950 = vmatpush1.bf16.msra.mxu0 %v4949_v31  ;;  %v4967_v31 = vpack.c.bf16 %v2779_v25, %v2773_v24  ;;  %v2589_v24 = vld [vmem:[%s6205_s6 + $0xf48] sm:$0xff]  ;;  %v2862_v13 = vld [vmem:[%s6205_s6 + $0x17d0] sm:$0xff] }
 0x334   : > { %5126 = vmatpush1.bf16.msra.mxu1 %v5125_v27  ;;  %4952 = vmatprep.subr.bf16.mxu0 %v4951_v34  ;;  %v2772_v27 = vld [vmem:[%s6205_s6 + $0x1500] sm:$0xff]  ;;  %v2778_v34 = vld [vmem:[%s6205_s6 + $0x1530] sm:$0xff] }
 0x335   : > { %5128 = vmatprep.subr.bf16.mxu1 %v5127_v9  ;;  %v2785_v9 = vld [vmem:[%s6205_s6 + $0x1568] sm:$0xff]  ;;  %v4969_v10 = vpack.c.bf16 %v2778_v34, %v2772_v27  ;;  %v2588_v27 = vld [vmem:[%s6205_s6 + $0xf40] sm:$0xff] }
 0x336   : > { %v2833_v34 = vld [vmem:[%s6205_s6 + $0x16e8] sm:$0xff]  ;;  %v5161_v39 = vpack.c.bf16 %v2588_v27, %v2582_v28  ;;  %v2636_v28 = vld [vmem:[%s6205_s6 + $0x10c0] sm:$0xff]  ;;  %v2642_v27 = vld [vmem:[%s6205_s6 + $0x10f0] sm:$0xff] }
 0x337   : > { %3288 = vmatmul.mubr.f32.vlgmr.msra.gmra.mrb[6].mxu1 %v7264_v20  ;;  %4954 = vmatpush1.bf16.msra.mxu0 %v4953_v42  ;;  %v4971_v42 = vpack.c.bf16 %v2791_v38, %v2785_v9  ;;  %v2601_v9 = vld [vmem:[%s6205_s6 + $0xfa8] sm:$0xff] }
 0x338   : > { %5130 = vmatpush1.bf16.msra.mxu1 %v5129_v43  ;;  %3358 = vmatprep.mubr.f32.mxu1 %v7270_v37  ;;  %v2784_v43 = vld [vmem:[%s6205_s6 + $0x1560] sm:$0xff] }
 0x339   : > { %5132 = vmatprep.subr.bf16.mxu1 %v5131_v46  ;;  %4956 = vmatprep.subr.bf16.mxu0 %v4955_v14  ;;  %v2797_v46 = vld [vmem:[%s6205_s6 + $0x15c8] sm:$0xff]  ;;  %v2559_v14 = vld [vmem:[%s6205_s6 + $0xe58] sm:$0xff]  ;;  %v4973_v50 = vpack.c.bf16 %v2790_v33, %v2784_v43  ;;  %v2600_v43 = vld [vmem:[%s6205_s6 + $0xfa0] sm:$0xff] }
 0x33a   : > { %v2845_v33 = vld [vmem:[%s6205_s6 + $0x1748] sm:$0xff] }
 0x33b   : > { %4958 = vmatpush1.bf16.msra.mxu0 %v4957_v53  ;;  %v4975_v53 = vpack.c.bf16 %v2803_v7, %v2797_v46  ;;  %v2613_v46 = vld [vmem:[%s6205_s6 + $0x1008] sm:$0xff] }
 0x33c   : > { %5134 = vmatpush1.bf16.msra.mxu1 %v5133_v54  ;;  %4960 = vmatprep.subr.bf16.mxu0 %v4959_v60  ;;  %v2796_v54 = vld [vmem:[%s6205_s6 + $0x15c0] sm:$0xff]  ;;  %v5151_v60 = vpack.c.bf16 %v2565_v48, %v2559_v14  ;;  %v5165_v14 = vpack.c.bf16 %v2600_v43, %v2594_v40  ;;  %v2606_v48 = vld [vmem:[%s6205_s6 + $0xfd0] sm:$0xff] }
 0x33d   : > { %5136 = vmatprep.subr.bf16.mxu1 %v5135_v63  ;;  %v2815_v63 = vld [vmem:[%s6205_s6 + $0x1658] sm:$0xff]  ;;  %v4977_v8 = vpack.c.bf16 %v2802_v55, %v2796_v54  ;;  %v2612_v54 = vld [vmem:[%s6205_s6 + $0x1000] sm:$0xff]  ;;  %v2857_v55 = vld [vmem:[%s6205_s6 + $0x17a8] sm:$0xff] }
 0x33e   : > { %v2660_v40 = vld [vmem:[%s6205_s6 + $0x1180] sm:$0xff]  ;;  %v2666_v43 = vld [vmem:[%s6205_s6 + $0x11b0] sm:$0xff] }
 0x33f   : > { %4962 = vmatpush1.bf16.msra.mxu0 %v4961_v57  ;;  %v4979_v57 = vpack.c.bf16 %v2815_v63, %v2809_v62  ;;  %v2625_v62 = vld [vmem:[%s6205_s6 + $0x1068] sm:$0xff] }
 0x340   : > { %5138 = vmatpush1.bf16.msra.mxu1 %v5137_v15  ;;  %4964 = vmatprep.subr.bf16.mxu0 %v4963_v18  ;;  %v2808_v15 = vld [vmem:[%s6205_s6 + $0x1620] sm:$0xff]  ;;  %v5155_v18 = vpack.c.bf16 %v2577_v6, %v2571_v0  ;;  %v5169_v0 = vpack.c.bf16 %v2612_v54, %v2606_v48  ;;  %v2618_v6 = vld [vmem:[%s6205_s6 + $0x1030] sm:$0xff] }
 0x341   : > { %5140 = vmatprep.subr.bf16.mxu1 %v5139_v21  ;;  %v2827_v21 = vld [vmem:[%s6205_s6 + $0x16b8] sm:$0xff]  ;;  %v4981_v25 = vpack.c.bf16 %v2814_v16, %v2808_v15  ;;  %v2624_v15 = vld [vmem:[%s6205_s6 + $0x1060] sm:$0xff]  ;;  %v2105_v16 = vld [vmem:[%s6205_s6 + $0x28] sm:$0xff] }
 0x342   : > { %v2684_v48 = vld [vmem:[%s6205_s6 + $0x1240] sm:$0xff]  ;;  %v2690_v54 = vld [vmem:[%s6205_s6 + $0x1270] sm:$0xff] }
 0x343   : > { %4966 = vmatpush1.bf16.msra.mxu0 %v4965_v29  ;;  %v4983_v29 = vpack.c.bf16 %v2827_v21, %v2821_v19  ;;  %v2637_v19 = vld [vmem:[%s6205_s6 + $0x10c8] sm:$0xff] }
 0x344   : > { %5142 = vmatpush1.bf16.msra.mxu1 %v5141_v30  ;;  %4968 = vmatprep.subr.bf16.mxu0 %v4967_v31  ;;  %v2820_v30 = vld [vmem:[%s6205_s6 + $0x1680] sm:$0xff]  ;;  %v5159_v31 = vpack.c.bf16 %v2589_v24, %v2583_v22  ;;  %v5173_v22 = vpack.c.bf16 %v2624_v15, %v2618_v6  ;;  %v2714_v15 = vld [vmem:[%s6205_s6 + $0x1330] sm:$0xff] }
 0x345   : > { %5144 = vmatprep.subr.bf16.mxu1 %v5143_v35  ;;  %v2839_v35 = vld [vmem:[%s6205_s6 + $0x1718] sm:$0xff]  ;;  %v4985_v38 = vpack.c.bf16 %v2826_v58, %v2820_v30  ;;  %v2649_v30 = vld [vmem:[%s6205_s6 + $0x1128] sm:$0xff]  ;;  %v2708_v6 = vld [vmem:[%s6205_s6 + $0x1300] sm:$0xff] }
 0x347   : > { %4970 = vmatpush1.bf16.msra.mxu0 %v4969_v10  ;;  %v4987_v10 = vpack.c.bf16 %v2839_v35, %v2833_v34  ;;  %v2648_v34 = vld [vmem:[%s6205_s6 + $0x1120] sm:$0xff]  ;;  %v2655_v35 = vld [vmem:[%s6205_s6 + $0x1158] sm:$0xff] }
 0x348   : > { %5146 = vmatpush1.bf16.msra.mxu1 %v5145_v2  ;;  %4972 = vmatprep.subr.bf16.mxu0 %v4971_v42  ;;  %v2832_v2 = vld [vmem:[%s6205_s6 + $0x16e0] sm:$0xff]  ;;  %v5163_v42 = vpack.c.bf16 %v2601_v9, %v2595_v36  ;;  %v2661_v36 = vld [vmem:[%s6205_s6 + $0x1188] sm:$0xff]  ;;  %v5181_v9 = vpack.c.bf16 %v2648_v34, %v2642_v27  ;;  %v2751_v34 = vld [vmem:[%s6205_s6 + $0x1458] sm:$0xff] }
 0x349   : > { %5148 = vmatprep.subr.bf16.mxu1 %v5147_v44  ;;  %v2851_v44 = vld [vmem:[%s6205_s6 + $0x1778] sm:$0xff]  ;;  %v4989_v7 = vpack.c.bf16 %v2838_v41, %v2832_v2  ;;  %v2673_v2 = vld [vmem:[%s6205_s6 + $0x11e8] sm:$0xff]  ;;  %v2744_v27 = vld [vmem:[%s6205_s6 + $0x1420] sm:$0xff] }
 0x34b   : > { %4974 = vmatpush1.bf16.msra.mxu0 %v4973_v50  ;;  %v4991_v50 = vpack.c.bf16 %v2851_v44, %v2845_v33  ;;  %v2672_v33 = vld [vmem:[%s6205_s6 + $0x11e0] sm:$0xff]  ;;  %v2679_v44 = vld [vmem:[%s6205_s6 + $0x1218] sm:$0xff] }
 0x34c   : > { %5150 = vmatpush1.bf16.msra.mxu1 %v5149_v51  ;;  %4976 = vmatprep.subr.bf16.mxu0 %v4975_v53  ;;  %v2844_v51 = vld [vmem:[%s6205_s6 + $0x1740] sm:$0xff]  ;;  %v5167_v53 = vpack.c.bf16 %v2613_v46, %v2607_v45  ;;  %v2685_v45 = vld [vmem:[%s6205_s6 + $0x1248] sm:$0xff]  ;;  %v5189_v46 = vpack.c.bf16 %v2672_v33, %v2666_v43 }
 0x34d   : > { %5152 = vmatprep.subr.bf16.mxu1 %v5151_v60  ;;  %v2863_v60 = vld [vmem:[%s6205_s6 + $0x17d8] sm:$0xff]  ;;  %v4993_v63 = vpack.c.bf16 %v2850_v52, %v2844_v51  ;;  %v2697_v51 = vld [vmem:[%s6205_s6 + $0x12a8] sm:$0xff] }
 0x34e   : > { %v2769_v43 = vld [vmem:[%s6205_s6 + $0x14e8] sm:$0xff] }
 0x34f   : > { %4978 = vmatpush1.bf16.msra.mxu0 %v4977_v8  ;;  %v4995_v8 = vpack.c.bf16 %v2863_v60, %v2857_v55  ;;  %v2696_v55 = vld [vmem:[%s6205_s6 + $0x12a0] sm:$0xff]  ;;  %v2703_v60 = vld [vmem:[%s6205_s6 + $0x12d8] sm:$0xff] }
 0x350   : > { %5154 = vmatpush1.bf16.msra.mxu1 %v5153_v11  ;;  %4980 = vmatprep.subr.bf16.mxu0 %v4979_v57  ;;  %v2856_v11 = vld [vmem:[%s6205_s6 + $0x17a0] sm:$0xff]  ;;  %v5171_v57 = vpack.c.bf16 %v2625_v62, %v2619_v61  ;;  %v2709_v61 = vld [vmem:[%s6205_s6 + $0x1308] sm:$0xff]  ;;  %v5197_v62 = vpack.c.bf16 %v2696_v55, %v2690_v54 }
 0x351   : > { %5156 = vmatprep.subr.bf16.mxu1 %v5155_v18  ;;  %v2111_v18 = vld [vmem:[%s6205_s6 + $0x58] sm:$0xff]  ;;  %v4997_v21 = vpack.c.bf16 %v2862_v13, %v2856_v11  ;;  %v2721_v11 = vld [vmem:[%s6205_s6 + $0x1368] sm:$0xff] }
 0x352   : > { %v5255_v24 = vpack.c.bf16 %v2111_v18, %v2105_v16  ;;  %v2720_v16 = vld [vmem:[%s6205_s6 + $0x1360] sm:$0xff]  ;;  %v2727_v18 = vld [vmem:[%s6205_s6 + $0x1398] sm:$0xff] }
 0x353   : > { %4982 = vmatpush1.bf16.msra.mxu0 %v4981_v25  ;;  %v5175_v25 = vpack.c.bf16 %v2637_v19, %v2631_v3  ;;  %v2733_v3 = vld [vmem:[%s6205_s6 + $0x13c8] sm:$0xff]  ;;  %v5205_v19 = vpack.c.bf16 %v2720_v16, %v2714_v15 }
 0x354   : > { %5158 = vmatpush1.bf16.msra.mxu1 %v5157_v26  ;;  %4984 = vmatprep.subr.bf16.mxu0 %v4983_v29  ;;  %v2630_v26 = vld [vmem:[%s6205_s6 + $0x1090] sm:$0xff]  ;;  %v2643_v29 = vld [vmem:[%s6205_s6 + $0x10f8] sm:$0xff] }
 0x355   : > { %5160 = vmatprep.subr.bf16.mxu1 %v5159_v31  ;;  %v5177_v58 = vpack.c.bf16 %v2636_v28, %v2630_v26  ;;  %v5179_v31 = vpack.c.bf16 %v2649_v30, %v2643_v29  ;;  %v2745_v26 = vld [vmem:[%s6205_s6 + $0x1428] sm:$0xff]  ;;  %v1162_v28 = vsub.s32 6, %v6902_v56  ;;  %v1166_v30 = vsub.s32 7, %v6902_v56 }
 0x357   : > { %4986 = vmatpush1.bf16.msra.mxu0 %v4985_v38  ;;  %v5183_v38 = vpack.c.bf16 %v2661_v36, %v2655_v35  ;;  %v2757_v35 = vld [vmem:[%s6205_s6 + $0x1488] sm:$0xff]  ;;  %v5684_v36 = vld [vmem:[%s6203_s7] sm:$0xff] }
 0x358   : > { %5162 = vmatpush1.bf16.msra.mxu1 %v5161_v39  ;;  %4988 = vmatprep.subr.bf16.mxu0 %v4987_v10  ;;  %v2654_v39 = vld [vmem:[%s6205_s6 + $0x1150] sm:$0xff]  ;;  %v2667_v10 = vld [vmem:[%s6205_s6 + $0x11b8] sm:$0xff] }
 0x359   : > { %5164 = vmatprep.subr.bf16.mxu1 %v5163_v42  ;;  %v5185_v41 = vpack.c.bf16 %v2660_v40, %v2654_v39  ;;  %v5187_v42 = vpack.c.bf16 %v2673_v2, %v2667_v10  ;;  %v5215_v40 = vpack.c.bf16 %v2757_v35, %v2751_v34  ;;  %v2750_v10 = vld [vmem:[%s6205_s6 + $0x1450] sm:$0xff]  ;;  %v2756_v2 = vld [vmem:[%s6205_s6 + $0x1480] sm:$0xff] }
 0x35a   : > { %v2810_v34 = vld [vmem:[%s6205_s6 + $0x1630] sm:$0xff]  ;;  %v2816_v35 = vld [vmem:[%s6205_s6 + $0x1660] sm:$0xff] }
 0x35b   : > { %4990 = vmatpush1.bf16.msra.mxu0 %v4989_v7  ;;  %v5191_v7 = vpack.c.bf16 %v2685_v45, %v2679_v44 }
 0x35c   : > { %5166 = vmatpush1.bf16.msra.mxu1 %v5165_v14  ;;  %4992 = vmatprep.subr.bf16.mxu0 %v4991_v50  ;;  %v2678_v14 = vld [vmem:[%s6205_s6 + $0x1210] sm:$0xff]  ;;  %v2691_v50 = vld [vmem:[%s6205_s6 + $0x1278] sm:$0xff] }
 0x35d   : > { %5168 = vmatprep.subr.bf16.mxu1 %v5167_v53  ;;  %v5193_v52 = vpack.c.bf16 %v2684_v48, %v2678_v14  ;;  %v5195_v53 = vpack.c.bf16 %v2697_v51, %v2691_v50  ;;  %v2762_v48 = vld [vmem:[%s6205_s6 + $0x14b0] sm:$0xff]  ;;  %v2768_v50 = vld [vmem:[%s6205_s6 + $0x14e0] sm:$0xff] }
 0x35f   : > { %4994 = vmatpush1.bf16.msra.mxu0 %v4993_v63  ;;  %v5199_v63 = vpack.c.bf16 %v2709_v61, %v2703_v60  ;;  %v5221_v60 = vpack.c.bf16 %v2768_v50, %v2762_v48 }
 0x360   : > { %5170 = vmatpush1.bf16.msra.mxu1 %v5169_v0  ;;  %4996 = vmatprep.subr.bf16.mxu0 %v4995_v8  ;;  %v2702_v0 = vld [vmem:[%s6205_s6 + $0x12d0] sm:$0xff]  ;;  %v2715_v8 = vld [vmem:[%s6205_s6 + $0x1338] sm:$0xff] }
 0x361   : > { %5172 = vmatprep.subr.bf16.mxu1 %v5171_v57  ;;  %v5201_v13 = vpack.c.bf16 %v2708_v6, %v2702_v0  ;;  %v5203_v57 = vpack.c.bf16 %v2721_v11, %v2715_v8  ;;  %v2774_v0 = vld [vmem:[%s6205_s6 + $0x1510] sm:$0xff]  ;;  %v2780_v6 = vld [vmem:[%s6205_s6 + $0x1540] sm:$0xff] }
 0x363   : > { %4998 = vmatpush1.bf16.msra.mxu0 %v4997_v21  ;;  %v5207_v21 = vpack.c.bf16 %v2733_v3, %v2727_v18  ;;  %v5225_v18 = vpack.c.bf16 %v2780_v6, %v2774_v0  ;;  %v2840_v0 = vld [vmem:[%s6205_s6 + $0x1720] sm:$0xff]  ;;  %v2129_v6 = vld [vmem:[%s6205_s6 + $0xe8] sm:$0xff] }
 0x364   : > { %5174 = vmatpush1.bf16.msra.mxu1 %v5173_v22  ;;  %5256 = vmatprep.subr.bf16.mxu0 %v5255_v24  ;;  %v2726_v22 = vld [vmem:[%s6205_s6 + $0x1390] sm:$0xff]  ;;  %v2732_v24 = vld [vmem:[%s6205_s6 + $0x13c0] sm:$0xff] }
 0x365   : > { %5176 = vmatprep.subr.bf16.mxu1 %v5175_v25  ;;  %v2739_v25 = vld [vmem:[%s6205_s6 + $0x13f8] sm:$0xff]  ;;  %v5209_v29 = vpack.c.bf16 %v2732_v24, %v2726_v22  ;;  %v2805_v24 = vld [vmem:[%s6205_s6 + $0x1608] sm:$0xff] }
 0x366   : > { %v2799_v22 = vld [vmem:[%s6205_s6 + $0x15d8] sm:$0xff] }
 0x368   : > { %5178 = vmatpush1.bf16.msra.mxu1 %v5177_v58  ;;  %v5211_v58 = vpack.c.bf16 %v2745_v26, %v2739_v25  ;;  %v5231_v26 = vpack.c.bf16 %v2805_v24, %v2799_v22  ;;  %v2852_v22 = vld [vmem:[%s6205_s6 + $0x1780] sm:$0xff]  ;;  %v2141_v24 = vld [vmem:[%s6205_s6 + $0x148] sm:$0xff] }
 0x369   : > { %5180 = vmatprep.subr.bf16.mxu1 %v5179_v31  ;;  %v2738_v31 = vld [vmem:[%s6205_s6 + $0x13f0] sm:$0xff] }
 0x36a   : > { %v5213_v39 = vpack.c.bf16 %v2744_v27, %v2738_v31 }
 0x36c   : > { %5182 = vmatpush1.bf16.msra.mxu1 %v5181_v9  ;;  %v1163_v9 = vrot.slane %v5684_v36, %v1162_v28  ;;  %v2798_v28 = vld [vmem:[%s6205_s6 + $0x15d0] sm:$0xff] }
 0x36d   : > { %5184 = vmatprep.subr.bf16.mxu1 %v5183_v38  ;;  %v1167_v38 = vrot.slane %v5684_v36, %v1166_v30  ;;  %v2811_v30 = vld [vmem:[%s6205_s6 + $0x1638] sm:$0xff] }
 0x370   : > { %5186 = vmatpush1.bf16.msra.mxu1 %v5185_v41 }
 0x371   : > { %5188 = vmatprep.subr.bf16.mxu1 %v5187_v42  ;;  %v2763_v42 = vld [vmem:[%s6205_s6 + $0x14b8] sm:$0xff] }
 0x372   : > { %v5219_v14 = vpack.c.bf16 %v2769_v43, %v2763_v42  ;;  %v2822_v42 = vld [vmem:[%s6205_s6 + $0x1690] sm:$0xff] }
 0x374   : > { %5190 = vmatpush1.bf16.msra.mxu1 %v5189_v46  ;;  %v5217_v46 = vpack.c.bf16 %v2756_v2, %v2750_v10  ;;  %v5237_v10 = vpack.c.bf16 %v2816_v35, %v2810_v34  ;;  %v2104_v2 = vld [vmem:[%s6205_s6 + $0x20] sm:$0xff] }
 0x375   : > { %5192 = vmatprep.subr.bf16.mxu1 %v5191_v7  ;;  %v2864_v35 = vld [vmem:[%s6205_s6 + $0x17e0] sm:$0xff] }
 0x377   : > { %3359 = vmatmul.mubr.f32.vlgmr.msra.gmra.mrb[6].mxu1 %v7412_v12 }
 0x378   : > { %5194 = vmatpush1.bf16.msra.mxu1 %v5193_v52  ;;  %v2775_v52 = vld [vmem:[%s6205_s6 + $0x1518] sm:$0xff] }
 0x379   : > { %5196 = vmatprep.subr.bf16.mxu1 %v5195_v53  ;;  %v2781_v53 = vld [vmem:[%s6205_s6 + $0x1548] sm:$0xff] }
 0x37c   : > { %5198 = vmatpush1.bf16.msra.mxu1 %v5197_v62 }
 0x37d   : > { %5200 = vmatprep.subr.bf16.mxu1 %v5199_v63  ;;  %v5223_v63 = vpack.c.bf16 %v2781_v53, %v2775_v52  ;;  %v2841_v52 = vld [vmem:[%s6205_s6 + $0x1728] sm:$0xff] }
 0x380   : > { %5202 = vmatpush1.bf16.msra.mxu1 %v5201_v13  ;;  %v2787_v13 = vld [vmem:[%s6205_s6 + $0x1578] sm:$0xff] }
 0x381   : > { %5204 = vmatprep.subr.bf16.mxu1 %v5203_v57  ;;  %v2793_v57 = vld [vmem:[%s6205_s6 + $0x15a8] sm:$0xff] }
 0x382   : > { %v5227_v3 = vpack.c.bf16 %v2793_v57, %v2787_v13  ;;  %v2853_v13 = vld [vmem:[%s6205_s6 + $0x1788] sm:$0xff] }
 0x384   : > { %5206 = vmatpush1.bf16.msra.mxu1 %v5205_v19  ;;  %v2786_v19 = vld [vmem:[%s6205_s6 + $0x1570] sm:$0xff] }
 0x385   : > { %5208 = vmatprep.subr.bf16.mxu1 %v5207_v21  ;;  %v2792_v21 = vld [vmem:[%s6205_s6 + $0x15a0] sm:$0xff] }
 0x386   : > { %v5229_v25 = vpack.c.bf16 %v2792_v21, %v2786_v19  ;;  %v2846_v19 = vld [vmem:[%s6205_s6 + $0x1750] sm:$0xff] }
 0x388   : > { %5210 = vmatpush1.bf16.msra.mxu1 %v5209_v29  ;;  %v2804_v29 = vld [vmem:[%s6205_s6 + $0x1600] sm:$0xff] }
 0x389   : > { %5212 = vmatprep.subr.bf16.mxu1 %v5211_v58  ;;  %v2817_v58 = vld [vmem:[%s6205_s6 + $0x1668] sm:$0xff]  ;;  %v5233_v31 = vpack.c.bf16 %v2804_v29, %v2798_v28  ;;  %v5249_v29 = vpack.c.bf16 %v2852_v22, %v2846_v19  ;;  %v2212_v19 = vld [vmem:[%s6205_s6 + $0x380] sm:$0xff] }
 0x38a   : > { %v2023_v41 = vpop.f32.mrb[4].mxu1  ;;  %v5235_v27 = vpack.c.bf16 %v2817_v58, %v2811_v30  ;;  %v2140_v58 = vld [vmem:[%s6205_s6 + $0x140] sm:$0xff]  ;;  %v2225_v22 = vld [vmem:[%s6205_s6 + $0x3e8] sm:$0xff] }
 0x38b   : > { %v7585_v33 = vadd.f32 %v2023_v41, %v1163_v9  ;;  %v2025_v44 = vpop.f32.mrb[5].mxu1  ;;  %v2823_v9 = vld [vmem:[%s6205_s6 + $0x1698] sm:$0xff]  ;;  %v2110_v41 = vld [vmem:[%s6205_s6 + $0x50] sm:$0xff] }
 0x38c   : > { %v5520_v45 = vadd.f32 %v2025_v44, %v1167_v38  ;;  %5214 = vmatpush1.bf16.msra.mxu1 %v5213_v39  ;;  %v2829_v38 = vld [vmem:[%s6205_s6 + $0x16c8] sm:$0xff] }
 0x38d   : > { %v2050_v7 = vmul.f32 %v7585_v33, %v7585_v33  ;;  %5216 = vmatprep.subr.bf16.mxu1 %v5215_v40  ;;  %v2042_v61 = vmul.f32 0.7978846, %v7585_v33  ;;  %v2034_v48 = vmul.f32 0.5, %v7585_v33  ;;  %v5239_v50 = vpack.c.bf16 %v2829_v38, %v2823_v9  ;;  %v2159_v9 = vld [vmem:[%s6205_s6 + $0x1d8] sm:$0xff] }
 0x38e   : > { %v2051_v51 = vmul.f32 %v5520_v45, %v5520_v45  ;;  %v2043_v8 = vmul.f32 0.7978846, %v5520_v45  ;;  %v2035_v43 = vmul.f32 0.5, %v5520_v45 }
 0x38f   : > { %v2058_v54 = vmul.f32 0.044715, %v2050_v7  ;;  %v2117_v7 = vld [vmem:[%s6205_s6 + $0x88] sm:$0xff] }
 0x390   : > { %v2059_v55 = vmul.f32 0.044715, %v2051_v51  ;;  %5218 = vmatpush1.bf16.msra.mxu1 %v5217_v46  ;;  %v2828_v46 = vld [vmem:[%s6205_s6 + $0x16c0] sm:$0xff]  ;;  %v2835_v51 = vld [vmem:[%s6205_s6 + $0x16f8] sm:$0xff] }
 0x391   : > { %v2066_v62 = vadd.f32 1.0, %v2058_v54  ;;  %5220 = vmatprep.subr.bf16.mxu1 %v5219_v14  ;;  %v2123_v14 = vld [vmem:[%s6205_s6 + $0xb8] sm:$0xff]  ;;  %v5257_v54 = vpack.c.bf16 %v2110_v41, %v2104_v2  ;;  %v5243_v33 = vpack.c.bf16 %v2841_v52, %v2835_v51  ;;  %v2158_v2 = vld [vmem:[%s6205_s6 + $0x1d0] sm:$0xff]  ;;  %v2165_v41 = vld [vmem:[%s6205_s6 + $0x208] sm:$0xff] }
 0x392   : > { %v2067_v11 = vadd.f32 1.0, %v2059_v55  ;;  %v5241_v55 = vpack.c.bf16 %v2828_v46, %v2822_v42  ;;  %v2171_v42 = vld [vmem:[%s6205_s6 + $0x238] sm:$0xff]  ;;  %v2164_v46 = vld [vmem:[%s6205_s6 + $0x200] sm:$0xff] }
 0x393   : > { %v2074_v15 = vmul.f32 %v2066_v62, %v2042_v61  ;;  %v2116_v61 = vld [vmem:[%s6205_s6 + $0x80] sm:$0xff]  ;;  %v2122_v62 = vld [vmem:[%s6205_s6 + $0xb0] sm:$0xff] }
 0x394   : > { %v2075_v16 = vmul.f32 %v2067_v11, %v2043_v8  ;;  %5222 = vmatpush1.bf16.msra.mxu1 %v5221_v60  ;;  %v5259_v60 = vpack.c.bf16 %v2123_v14, %v2117_v7  ;;  %v2135_v8 = vld [vmem:[%s6205_s6 + $0x118] sm:$0xff]  ;;  %v5261_v57 = vpack.c.bf16 %v2122_v62, %v2116_v61  ;;  %v2170_v7 = vld [vmem:[%s6205_s6 + $0x230] sm:$0xff]  ;;  %v2177_v14 = vld [vmem:[%s6205_s6 + $0x268] sm:$0xff] }
 0x395   : > { %5668 = vtanh.f32 %v2074_v15  ;;  %5224 = vmatprep.subr.bf16.mxu1 %v5223_v63  ;;  %v2834_v63 = vld [vmem:[%s6205_s6 + $0x16f0] sm:$0xff]  ;;  %v2847_v11 = vld [vmem:[%s6205_s6 + $0x1758] sm:$0xff]  ;;  %v2176_v52 = vld [vmem:[%s6205_s6 + $0x260] sm:$0xff] }
 0x396   : > { %5670 = vtanh.f32 %v2075_v16  ;;  %v5245_v15 = vpack.c.bf16 %v2840_v0, %v2834_v63  ;;  %v5263_v16 = vpack.c.bf16 %v2135_v8, %v2129_v6  ;;  %v5247_v21 = vpack.c.bf16 %v2853_v13, %v2847_v11  ;;  %v2188_v63 = vld [vmem:[%s6205_s6 + $0x2c0] sm:$0xff]  ;;  %v2201_v0 = vld [vmem:[%s6205_s6 + $0x328] sm:$0xff]  ;;  %v2207_v6 = vld [vmem:[%s6205_s6 + $0x358] sm:$0xff] }
 0x397   : > { %v5287_v11 = vpack.c.bf16 %v2207_v6, %v2201_v0  ;;  %v2200_v13 = vld [vmem:[%s6205_s6 + $0x320] sm:$0xff] }
 0x398   : > { %5226 = vmatpush1.bf16.msra.mxu1 %v5225_v18  ;;  %v2128_v18 = vld [vmem:[%s6205_s6 + $0xe0] sm:$0xff] }
 0x399   : > { %5228 = vmatprep.subr.bf16.mxu1 %v5227_v3  ;;  %v2134_v3 = vld [vmem:[%s6205_s6 + $0x110] sm:$0xff] }
 0x39a   : > { %v5265_v28 = vpack.c.bf16 %v2134_v3, %v2128_v18 }
 0x39c   : > { %5230 = vmatpush1.bf16.msra.mxu1 %v5229_v25  ;;  %v2147_v25 = vld [vmem:[%s6205_s6 + $0x178] sm:$0xff] }
 0x39d   : > { %5232 = vmatprep.subr.bf16.mxu1 %v5231_v26  ;;  %v2865_v26 = vld [vmem:[%s6205_s6 + $0x17e8] sm:$0xff]  ;;  %v5267_v30 = vpack.c.bf16 %v2147_v25, %v2141_v24  ;;  %v2231_v24 = vld [vmem:[%s6205_s6 + $0x418] sm:$0xff] }
 0x39f   : > { %v5669_v36 = vpop.eup %5668 }
 0x3a0   : > { %v5671_v39 = vpop.eup %5670  ;;  %v2090_v40 = vadd.f32 1.0, %v5669_v36  ;;  %5234 = vmatpush1.bf16.msra.mxu1 %v5233_v31  ;;  %v2146_v31 = vld [vmem:[%s6205_s6 + $0x170] sm:$0xff]  ;;  %v2153_v36 = vld [vmem:[%s6205_s6 + $0x1a8] sm:$0xff] }
 0x3a1   : > { %5236 = vmatprep.subr.bf16.mxu1 %v5235_v27  ;;  %v2091_v44 = vadd.f32 1.0, %v5671_v39  ;;  %v2858_v27 = vld [vmem:[%s6205_s6 + $0x17b0] sm:$0xff]  ;;  %v5269_v38 = vpack.c.bf16 %v2146_v31, %v2140_v58 }
 0x3a2   : > { %v7621_v45 = vmul.f32 %v2090_v40, %v2034_v48  ;;  %v5253_v39 = vpack.c.bf16 %v2864_v35, %v2858_v27  ;;  %v5271_v40 = vpack.c.bf16 %v2159_v9, %v2153_v36  ;;  %v2183_v48 = vld [vmem:[%s6205_s6 + $0x298] sm:$0xff]  ;;  %v2236_v27 = vld [vmem:[%s6205_s6 + $0x440] sm:$0xff]  ;;  %v2249_v35 = vld [vmem:[%s6205_s6 + $0x4a8] sm:$0xff] }
 0x3a3   : > { %v7619_v53 = vmul.f32 %v2091_v44, %v2035_v43  ;;  %v5275_v44 = vpack.c.bf16 %v2171_v42, %v2165_v41  ;;  %v5279_v51 = vpack.c.bf16 %v2183_v48, %v2177_v14  ;;  %v2255_v36 = vld [vmem:[%s6205_s6 + $0x4d8] sm:$0xff] }
 0x3a4   : > { %5238 = vmatpush1.bf16.msra.mxu1 %v5237_v10  ;;  %v2152_v10 = vld [vmem:[%s6205_s6 + $0x1a0] sm:$0xff] }
 0x3a5   : > { %3145 = vmatprep.mubr.f32.mxu0 %v7619_v53  ;;  %3429 = vmatprep.mubr.f32.mxu1 %v7619_v53  ;;  %v5273_v43 = vpack.c.bf16 %v2158_v2, %v2152_v10  ;;  %v2261_v10 = vld [vmem:[%s6205_s6 + $0x508] sm:$0xff]  ;;  %v2267_v2 = vld [vmem:[%s6205_s6 + $0x538] sm:$0xff] }
 0x3a6   : > { %3146 = vmatmul.mubr.f32.vlgmr.msra.gmra.mrb[4].mxu0 %v7621_v45  ;;  %5240 = vmatprep.subr.bf16.mxu1 %v5239_v50  ;;  %v5277_v50 = vpack.c.bf16 %v2170_v7, %v2164_v46  ;;  %v5307_v42 = vpack.c.bf16 %v2267_v2, %v2261_v10  ;;  %v2273_v46 = vld [vmem:[%s6205_s6 + $0x568] sm:$0xff]  ;;  %v2279_v7 = vld [vmem:[%s6205_s6 + $0x598] sm:$0xff]  ;;  %v2356_v10 = vld [vmem:[%s6205_s6 + $0x800] sm:$0xff] }
 0x3a7   : > { %5258 = vmatpush1.bf16.msra.mxu0 %v5257_v54  ;;  %3500 = vmatprep.mubr.f32.mxu0 %v6959_v23  ;;  %v2859_v23 = vld [vmem:[%s6205_s6 + $0x17b8] sm:$0xff]  ;;  %v2182_v54 = vld [vmem:[%s6205_s6 + $0x290] sm:$0xff]  ;;  %v5311_v48 = vpack.c.bf16 %v2279_v7, %v2273_v46  ;;  %v2368_v46 = vld [vmem:[%s6205_s6 + $0x860] sm:$0xff] }
 0x3a8   : > { %5242 = vmatpush1.bf16.msra.mxu1 %v5241_v55  ;;  %5260 = vmatprep.subr.bf16.mxu0 %v5259_v60  ;;  %v5251_v34 = vpack.c.bf16 %v2865_v26, %v2859_v23  ;;  %v2189_v55 = vld [vmem:[%s6205_s6 + $0x2c8] sm:$0xff]  ;;  %v2195_v60 = vld [vmem:[%s6205_s6 + $0x2f8] sm:$0xff]  ;;  %v5281_v61 = vpack.c.bf16 %v2182_v54, %v2176_v52  ;;  %v5295_v23 = vpack.c.bf16 %v2231_v24, %v2225_v22  ;;  %v2224_v26 = vld [vmem:[%s6205_s6 + $0x3e0] sm:$0xff] }
 0x3a9   : > { %5244 = vmatprep.subr.bf16.mxu1 %v5243_v33  ;;  %v5283_v62 = vpack.c.bf16 %v2195_v60, %v2189_v55  ;;  %v2194_v33 = vld [vmem:[%s6205_s6 + $0x2f0] sm:$0xff]  ;;  %v2285_v52 = vld [vmem:[%s6205_s6 + $0x5c8] sm:$0xff]  ;;  %v2291_v54 = vld [vmem:[%s6205_s6 + $0x5f8] sm:$0xff] }
 0x3aa   : > { %v5285_v8 = vpack.c.bf16 %v2194_v33, %v2188_v63  ;;  %v5315_v60 = vpack.c.bf16 %v2291_v54, %v2285_v52  ;;  %v2297_v63 = vld [vmem:[%s6205_s6 + $0x628] sm:$0xff]  ;;  %v2303_v33 = vld [vmem:[%s6205_s6 + $0x658] sm:$0xff]  ;;  %v2362_v2 = vld [vmem:[%s6205_s6 + $0x830] sm:$0xff] }
 0x3ab   : > { %5262 = vmatpush1.bf16.msra.mxu0 %v5261_v57  ;;  %v2206_v57 = vld [vmem:[%s6205_s6 + $0x350] sm:$0xff]  ;;  %v5319_v6 = vpack.c.bf16 %v2303_v33, %v2297_v63  ;;  %v2380_v52 = vld [vmem:[%s6205_s6 + $0x8c0] sm:$0xff] }
 0x3ac   : > { %5246 = vmatpush1.bf16.msra.mxu1 %v5245_v15  ;;  %5264 = vmatprep.subr.bf16.mxu0 %v5263_v16  ;;  %v2213_v15 = vld [vmem:[%s6205_s6 + $0x388] sm:$0xff]  ;;  %v2219_v16 = vld [vmem:[%s6205_s6 + $0x3b8] sm:$0xff]  ;;  %v5289_v18 = vpack.c.bf16 %v2206_v57, %v2200_v13  ;;  %v2374_v7 = vld [vmem:[%s6205_s6 + $0x890] sm:$0xff] }
 0x3ad   : > { %5248 = vmatprep.subr.bf16.mxu1 %v5247_v21  ;;  %v5291_v3 = vpack.c.bf16 %v2219_v16, %v2213_v15  ;;  %v2218_v21 = vld [vmem:[%s6205_s6 + $0x3b0] sm:$0xff]  ;;  %v2309_v13 = vld [vmem:[%s6205_s6 + $0x688] sm:$0xff]  ;;  %v2315_v57 = vld [vmem:[%s6205_s6 + $0x6b8] sm:$0xff] }
 0x3ae   : > { %v5293_v25 = vpack.c.bf16 %v2218_v21, %v2212_v19  ;;  %v5323_v16 = vpack.c.bf16 %v2315_v57, %v2309_v13  ;;  %v2321_v19 = vld [vmem:[%s6205_s6 + $0x6e8] sm:$0xff]  ;;  %v2327_v21 = vld [vmem:[%s6205_s6 + $0x718] sm:$0xff]  ;;  %v2386_v54 = vld [vmem:[%s6205_s6 + $0x8f0] sm:$0xff] }
 0x3af   : > { %5266 = vmatpush1.bf16.msra.mxu0 %v5265_v28  ;;  %v2230_v28 = vld [vmem:[%s6205_s6 + $0x410] sm:$0xff]  ;;  %v5327_v24 = vpack.c.bf16 %v2327_v21, %v2321_v19  ;;  %v2392_v63 = vld [vmem:[%s6205_s6 + $0x920] sm:$0xff] }
 0x3b0   : > { %5250 = vmatpush1.bf16.msra.mxu1 %v5249_v29  ;;  %5268 = vmatprep.subr.bf16.mxu0 %v5267_v30  ;;  %v2237_v29 = vld [vmem:[%s6205_s6 + $0x448] sm:$0xff]  ;;  %v2243_v30 = vld [vmem:[%s6205_s6 + $0x478] sm:$0xff]  ;;  %v5297_v58 = vpack.c.bf16 %v2230_v28, %v2224_v26  ;;  %v2398_v33 = vld [vmem:[%s6205_s6 + $0x950] sm:$0xff] }
 0x3b1   : > { %5252 = vmatprep.subr.bf16.mxu1 %v5251_v34  ;;  %v5299_v31 = vpack.c.bf16 %v2243_v30, %v2237_v29  ;;  %v2242_v34 = vld [vmem:[%s6205_s6 + $0x470] sm:$0xff]  ;;  %v2333_v26 = vld [vmem:[%s6205_s6 + $0x748] sm:$0xff]  ;;  %v2339_v28 = vld [vmem:[%s6205_s6 + $0x778] sm:$0xff] }
 0x3b2   : > { %v5301_v9 = vpack.c.bf16 %v2242_v34, %v2236_v27  ;;  %v2332_v30 = vld [vmem:[%s6205_s6 + $0x740] sm:$0xff]  ;;  %v2410_v57 = vld [vmem:[%s6205_s6 + $0x9b0] sm:$0xff] }
 0x3b3   : > { %5270 = vmatpush1.bf16.msra.mxu0 %v5269_v38  ;;  %v5303_v38 = vpack.c.bf16 %v2255_v36, %v2249_v35  ;;  %v2344_v35 = vld [vmem:[%s6205_s6 + $0x7a0] sm:$0xff]  ;;  %v2350_v36 = vld [vmem:[%s6205_s6 + $0x7d0] sm:$0xff] }
 0x3b4   : > { %5254 = vmatpush1.bf16.msra.mxu1 %v5253_v39  ;;  %5272 = vmatprep.subr.bf16.mxu0 %v5271_v40  ;;  %v2248_v39 = vld [vmem:[%s6205_s6 + $0x4a0] sm:$0xff]  ;;  %v2254_v40 = vld [vmem:[%s6205_s6 + $0x4d0] sm:$0xff] }
 0x3b5   : > { %v5305_v41 = vpack.c.bf16 %v2254_v40, %v2248_v39  ;;  %v5337_v39 = vpack.c.bf16 %v2350_v36, %v2344_v35  ;;  %v2404_v13 = vld [vmem:[%s6205_s6 + $0x980] sm:$0xff]  ;;  %v2422_v21 = vld [vmem:[%s6205_s6 + $0xa10] sm:$0xff] }
 0x3b6   : > { %v2416_v19 = vld [vmem:[%s6205_s6 + $0x9e0] sm:$0xff] }
 0x3b7   : > { %5274 = vmatpush1.bf16.msra.mxu0 %v5273_v43  ;;  %3430 = vmatmul.mubr.f32.vlgmr.msra.gmra.mrb[6].mxu1 %v7621_v45  ;;  %v2260_v43 = vld [vmem:[%s6205_s6 + $0x500] sm:$0xff] }
 0x3b8   : > { %5276 = vmatprep.subr.bf16.mxu0 %v5275_v44  ;;  %v2266_v44 = vld [vmem:[%s6205_s6 + $0x530] sm:$0xff] }
 0x3b9   : > { %v5309_v14 = vpack.c.bf16 %v2266_v44, %v2260_v43  ;;  %v5341_v43 = vpack.c.bf16 %v2362_v2, %v2356_v10 }
 0x3bb   : > { %5278 = vmatpush1.bf16.msra.mxu0 %v5277_v50  ;;  %v2272_v50 = vld [vmem:[%s6205_s6 + $0x560] sm:$0xff] }
 0x3bc   : > { %5280 = vmatprep.subr.bf16.mxu0 %v5279_v51  ;;  %v2278_v51 = vld [vmem:[%s6205_s6 + $0x590] sm:$0xff] }
 0x3bd   : > { %v5313_v55 = vpack.c.bf16 %v2278_v51, %v2272_v50  ;;  %v5345_v50 = vpack.c.bf16 %v2374_v7, %v2368_v46 }
 0x3bf   : > { %5282 = vmatpush1.bf16.msra.mxu0 %v5281_v61  ;;  %v2284_v61 = vld [vmem:[%s6205_s6 + $0x5c0] sm:$0xff] }
 0x3c0   : > { %5284 = vmatprep.subr.bf16.mxu0 %v5283_v62  ;;  %v2290_v62 = vld [vmem:[%s6205_s6 + $0x5f0] sm:$0xff] }
 0x3c1   : > { %v5317_v0 = vpack.c.bf16 %v2290_v62, %v2284_v61  ;;  %v5349_v61 = vpack.c.bf16 %v2386_v54, %v2380_v52 }
 0x3c3   : > { %5286 = vmatpush1.bf16.msra.mxu0 %v5285_v8  ;;  %v2296_v8 = vld [vmem:[%s6205_s6 + $0x620] sm:$0xff] }
 0x3c4   : > { %5288 = vmatprep.subr.bf16.mxu0 %v5287_v11  ;;  %v2302_v11 = vld [vmem:[%s6205_s6 + $0x650] sm:$0xff] }
 0x3c5   : > { %v5321_v15 = vpack.c.bf16 %v2302_v11, %v2296_v8  ;;  %v5353_v8 = vpack.c.bf16 %v2398_v33, %v2392_v63 }
 0x3c7   : > { %5290 = vmatpush1.bf16.msra.mxu0 %v5289_v18  ;;  %v2308_v18 = vld [vmem:[%s6205_s6 + $0x680] sm:$0xff] }
 0x3c8   : > { %5292 = vmatprep.subr.bf16.mxu0 %v5291_v3  ;;  %v2314_v3 = vld [vmem:[%s6205_s6 + $0x6b0] sm:$0xff] }
 0x3c9   : > { %v5325_v22 = vpack.c.bf16 %v2314_v3, %v2308_v18  ;;  %v5357_v18 = vpack.c.bf16 %v2410_v57, %v2404_v13 }
 0x3cb   : > { %5294 = vmatpush1.bf16.msra.mxu0 %v5293_v25  ;;  %v2320_v25 = vld [vmem:[%s6205_s6 + $0x6e0] sm:$0xff] }
 0x3cc   : > { %5296 = vmatprep.subr.bf16.mxu0 %v5295_v23  ;;  %v2326_v23 = vld [vmem:[%s6205_s6 + $0x710] sm:$0xff] }
 0x3cd   : > { %v5329_v29 = vpack.c.bf16 %v2326_v23, %v2320_v25  ;;  %v5361_v25 = vpack.c.bf16 %v2422_v21, %v2416_v19  ;;  %v2524_v21 = vld [vmem:[%s6205_s6 + $0xd40] sm:$0xff] }
 0x3cf   : > { %5298 = vmatpush1.bf16.msra.mxu0 %v5297_v58  ;;  %v2338_v58 = vld [vmem:[%s6205_s6 + $0x770] sm:$0xff] }
 0x3d0   : > { %5300 = vmatprep.subr.bf16.mxu0 %v5299_v31  ;;  %v2351_v31 = vld [vmem:[%s6205_s6 + $0x7d8] sm:$0xff]  ;;  %v5333_v27 = vpack.c.bf16 %v2338_v58, %v2332_v30 }
 0x3d3   : > { %5302 = vmatpush1.bf16.msra.mxu0 %v5301_v9  ;;  %v2357_v9 = vld [vmem:[%s6205_s6 + $0x808] sm:$0xff] }
 0x3d4   : > { %5304 = vmatprep.subr.bf16.mxu0 %v5303_v38  ;;  %v2363_v38 = vld [vmem:[%s6205_s6 + $0x838] sm:$0xff] }
 0x3d5   : > { %v5339_v40 = vpack.c.bf16 %v2363_v38, %v2357_v9  ;;  %v2452_v9 = vld [vmem:[%s6205_s6 + $0xb00] sm:$0xff]  ;;  %v2458_v38 = vld [vmem:[%s6205_s6 + $0xb30] sm:$0xff] }
 0x3d6   : > { %v5373_v10 = vpack.c.bf16 %v2458_v38, %v2452_v9  ;;  %v2560_v9 = vld [vmem:[%s6205_s6 + $0xe60] sm:$0xff]  ;;  %v2566_v38 = vld [vmem:[%s6205_s6 + $0xe90] sm:$0xff] }
 0x3d7   : > { %5306 = vmatpush1.bf16.msra.mxu0 %v5305_v41  ;;  %v2369_v41 = vld [vmem:[%s6205_s6 + $0x868] sm:$0xff] }
 0x3d8   : > { %5308 = vmatprep.subr.bf16.mxu0 %v5307_v42  ;;  %v2375_v42 = vld [vmem:[%s6205_s6 + $0x898] sm:$0xff] }
 0x3d9   : > { %v5343_v44 = vpack.c.bf16 %v2375_v42, %v2369_v41  ;;  %v2464_v41 = vld [vmem:[%s6205_s6 + $0xb60] sm:$0xff]  ;;  %v2470_v42 = vld [vmem:[%s6205_s6 + $0xb90] sm:$0xff] }
 0x3da   : > { %v5377_v46 = vpack.c.bf16 %v2470_v42, %v2464_v41  ;;  %v2572_v41 = vld [vmem:[%s6205_s6 + $0xec0] sm:$0xff]  ;;  %v2578_v42 = vld [vmem:[%s6205_s6 + $0xef0] sm:$0xff] }
 0x3db   : > { %5310 = vmatpush1.bf16.msra.mxu0 %v5309_v14  ;;  %v2381_v14 = vld [vmem:[%s6205_s6 + $0x8c8] sm:$0xff] }
 0x3dc   : > { %5312 = vmatprep.subr.bf16.mxu0 %v5311_v48  ;;  %v2387_v48 = vld [vmem:[%s6205_s6 + $0x8f8] sm:$0xff] }
 0x3dd   : > { %v5347_v51 = vpack.c.bf16 %v2387_v48, %v2381_v14  ;;  %v2476_v14 = vld [vmem:[%s6205_s6 + $0xbc0] sm:$0xff]  ;;  %v2482_v48 = vld [vmem:[%s6205_s6 + $0xbf0] sm:$0xff] }
 0x3de   : > { %v5381_v52 = vpack.c.bf16 %v2482_v48, %v2476_v14  ;;  %v2584_v14 = vld [vmem:[%s6205_s6 + $0xf20] sm:$0xff]  ;;  %v2590_v48 = vld [vmem:[%s6205_s6 + $0xf50] sm:$0xff] }
 0x3df   : > { %5314 = vmatpush1.bf16.msra.mxu0 %v5313_v55  ;;  %v2393_v55 = vld [vmem:[%s6205_s6 + $0x928] sm:$0xff] }
 0x3e0   : > { %5316 = vmatprep.subr.bf16.mxu0 %v5315_v60  ;;  %v2399_v60 = vld [vmem:[%s6205_s6 + $0x958] sm:$0xff] }
 0x3e1   : > { %v5351_v62 = vpack.c.bf16 %v2399_v60, %v2393_v55  ;;  %v2488_v55 = vld [vmem:[%s6205_s6 + $0xc20] sm:$0xff]  ;;  %v2494_v60 = vld [vmem:[%s6205_s6 + $0xc50] sm:$0xff] }
 0x3e2   : > { %v5385_v63 = vpack.c.bf16 %v2494_v60, %v2488_v55  ;;  %v2596_v55 = vld [vmem:[%s6205_s6 + $0xf80] sm:$0xff]  ;;  %v2602_v60 = vld [vmem:[%s6205_s6 + $0xfb0] sm:$0xff] }
 0x3e3   : > { %5318 = vmatpush1.bf16.msra.mxu0 %v5317_v0  ;;  %v2405_v0 = vld [vmem:[%s6205_s6 + $0x988] sm:$0xff] }
 0x3e4   : > { %5320 = vmatprep.subr.bf16.mxu0 %v5319_v6  ;;  %v2411_v6 = vld [vmem:[%s6205_s6 + $0x9b8] sm:$0xff] }
 0x3e5   : > { %v5355_v11 = vpack.c.bf16 %v2411_v6, %v2405_v0  ;;  %v2500_v0 = vld [vmem:[%s6205_s6 + $0xc80] sm:$0xff]  ;;  %v2506_v6 = vld [vmem:[%s6205_s6 + $0xcb0] sm:$0xff] }
 0x3e6   : > { %3501 = vmatmul.mubr.f32.vlgmr.msra.gmra.mrb[6].mxu0 %v6964_v32  ;;  %v5331_v32 = vpack.c.bf16 %v2339_v28, %v2333_v26  ;;  %v2428_v26 = vld [vmem:[%s6205_s6 + $0xa40] sm:$0xff]  ;;  %v2434_v28 = vld [vmem:[%s6205_s6 + $0xa70] sm:$0xff]  ;;  %v5389_v13 = vpack.c.bf16 %v2506_v6, %v2500_v0 }
 0x3e7   : > { %5322 = vmatpush1.bf16.msra.mxu0 %v5321_v15  ;;  %3571 = vmatprep.mubr.f32.mxu0 %v7262_v47  ;;  %v2345_v47 = vld [vmem:[%s6205_s6 + $0x7a8] sm:$0xff]  ;;  %v5365_v30 = vpack.c.bf16 %v2434_v28, %v2428_v26  ;;  %v2536_v26 = vld [vmem:[%s6205_s6 + $0xda0] sm:$0xff]  ;;  %v2542_v28 = vld [vmem:[%s6205_s6 + $0xdd0] sm:$0xff] }
 0x3e8   : > { %5324 = vmatprep.subr.bf16.mxu0 %v5323_v16  ;;  %v5335_v34 = vpack.c.bf16 %v2351_v31, %v2345_v47  ;;  %v2417_v15 = vld [vmem:[%s6205_s6 + $0x9e8] sm:$0xff]  ;;  %v2423_v16 = vld [vmem:[%s6205_s6 + $0xa18] sm:$0xff]  ;;  %v2440_v47 = vld [vmem:[%s6205_s6 + $0xaa0] sm:$0xff] }
 0x3e9   : > { %v5359_v3 = vpack.c.bf16 %v2423_v16, %v2417_v15  ;;  %v2446_v31 = vld [vmem:[%s6205_s6 + $0xad0] sm:$0xff]  ;;  %v2512_v15 = vld [vmem:[%s6205_s6 + $0xce0] sm:$0xff] }
 0x3ea   : > { %v5369_v35 = vpack.c.bf16 %v2446_v31, %v2440_v47  ;;  %v2518_v16 = vld [vmem:[%s6205_s6 + $0xd10] sm:$0xff]  ;;  %v2548_v47 = vld [vmem:[%s6205_s6 + $0xe00] sm:$0xff] }
 0x3eb   : > { %5326 = vmatpush1.bf16.msra.mxu0 %v5325_v22  ;;  %v2429_v22 = vld [vmem:[%s6205_s6 + $0xa48] sm:$0xff]  ;;  %v5393_v19 = vpack.c.bf16 %v2518_v16, %v2512_v15  ;;  %v2554_v31 = vld [vmem:[%s6205_s6 + $0xe30] sm:$0xff]  ;;  %v2608_v0 = vld [vmem:[%s6205_s6 + $0xfe0] sm:$0xff] }
 0x3ec   : > { %5328 = vmatprep.subr.bf16.mxu0 %v5327_v24  ;;  %v2435_v24 = vld [vmem:[%s6205_s6 + $0xa78] sm:$0xff]  ;;  %v2614_v6 = vld [vmem:[%s6205_s6 + $0x1010] sm:$0xff]  ;;  %v2620_v15 = vld [vmem:[%s6205_s6 + $0x1040] sm:$0xff] }
 0x3ed   : > { %v5363_v23 = vpack.c.bf16 %v2435_v24, %v2429_v22  ;;  %v2530_v22 = vld [vmem:[%s6205_s6 + $0xd70] sm:$0xff]  ;;  %v2543_v24 = vld [vmem:[%s6205_s6 + $0xdd8] sm:$0xff] }
 0x3ee   : > { %v2626_v16 = vld [vmem:[%s6205_s6 + $0x1070] sm:$0xff] }
 0x3ef   : > { %5330 = vmatpush1.bf16.msra.mxu0 %v5329_v29  ;;  %v2441_v29 = vld [vmem:[%s6205_s6 + $0xaa8] sm:$0xff] }
 0x3f0   : > { %5332 = vmatprep.subr.bf16.mxu0 %v5331_v32  ;;  %v2447_v32 = vld [vmem:[%s6205_s6 + $0xad8] sm:$0xff] }
 0x3f1   : > { %v5367_v58 = vpack.c.bf16 %v2447_v32, %v2441_v29  ;;  %v2549_v29 = vld [vmem:[%s6205_s6 + $0xe08] sm:$0xff]  ;;  %v2555_v32 = vld [vmem:[%s6205_s6 + $0xe38] sm:$0xff] }
 0x3f3   : > { %5334 = vmatpush1.bf16.msra.mxu0 %v5333_v27  ;;  %v2453_v27 = vld [vmem:[%s6205_s6 + $0xb08] sm:$0xff] }
 0x3f4   : > { %5336 = vmatprep.subr.bf16.mxu0 %v5335_v34  ;;  %v2459_v34 = vld [vmem:[%s6205_s6 + $0xb38] sm:$0xff] }
 0x3f5   : > { %v5371_v36 = vpack.c.bf16 %v2459_v34, %v2453_v27  ;;  %v2561_v27 = vld [vmem:[%s6205_s6 + $0xe68] sm:$0xff]  ;;  %v2567_v34 = vld [vmem:[%s6205_s6 + $0xe98] sm:$0xff] }
 0x3f7   : > { %5338 = vmatpush1.bf16.msra.mxu0 %v5337_v39  ;;  %v2465_v39 = vld [vmem:[%s6205_s6 + $0xb68] sm:$0xff] }
 0x3f8   : > { %5340 = vmatprep.subr.bf16.mxu0 %v5339_v40  ;;  %v2471_v40 = vld [vmem:[%s6205_s6 + $0xb98] sm:$0xff] }
 0x3f9   : > { %v5375_v2 = vpack.c.bf16 %v2471_v40, %v2465_v39  ;;  %v2573_v39 = vld [vmem:[%s6205_s6 + $0xec8] sm:$0xff]  ;;  %v2579_v40 = vld [vmem:[%s6205_s6 + $0xef8] sm:$0xff] }
 0x3fb   : > { %5342 = vmatpush1.bf16.msra.mxu0 %v5341_v43  ;;  %v2477_v43 = vld [vmem:[%s6205_s6 + $0xbc8] sm:$0xff] }
 0x3fc   : > { %5344 = vmatprep.subr.bf16.mxu0 %v5343_v44  ;;  %v2483_v44 = vld [vmem:[%s6205_s6 + $0xbf8] sm:$0xff] }
 0x3fd   : > { %v5379_v7 = vpack.c.bf16 %v2483_v44, %v2477_v43  ;;  %v2585_v43 = vld [vmem:[%s6205_s6 + $0xf28] sm:$0xff]  ;;  %v2591_v44 = vld [vmem:[%s6205_s6 + $0xf58] sm:$0xff] }
 0x3ff   : > { %5346 = vmatpush1.bf16.msra.mxu0 %v5345_v50  ;;  %v2489_v50 = vld [vmem:[%s6205_s6 + $0xc28] sm:$0xff] }
 0x400   : > { %5348 = vmatprep.subr.bf16.mxu0 %v5347_v51  ;;  %v2495_v51 = vld [vmem:[%s6205_s6 + $0xc58] sm:$0xff] }
 0x401   : > { %v5383_v54 = vpack.c.bf16 %v2495_v51, %v2489_v50  ;;  %v2597_v50 = vld [vmem:[%s6205_s6 + $0xf88] sm:$0xff]  ;;  %v2603_v51 = vld [vmem:[%s6205_s6 + $0xfb8] sm:$0xff] }
 0x403   : > { %5350 = vmatpush1.bf16.msra.mxu0 %v5349_v61  ;;  %v2501_v61 = vld [vmem:[%s6205_s6 + $0xc88] sm:$0xff] }
 0x404   : > { %5352 = vmatprep.subr.bf16.mxu0 %v5351_v62  ;;  %v2507_v62 = vld [vmem:[%s6205_s6 + $0xcb8] sm:$0xff] }
 0x405   : > { %v5387_v33 = vpack.c.bf16 %v2507_v62, %v2501_v61  ;;  %v2609_v61 = vld [vmem:[%s6205_s6 + $0xfe8] sm:$0xff]  ;;  %v2615_v62 = vld [vmem:[%s6205_s6 + $0x1018] sm:$0xff] }
 0x407   : > { %5354 = vmatpush1.bf16.msra.mxu0 %v5353_v8  ;;  %v2513_v8 = vld [vmem:[%s6205_s6 + $0xce8] sm:$0xff] }
 0x408   : > { %5356 = vmatprep.subr.bf16.mxu0 %v5355_v11  ;;  %v2519_v11 = vld [vmem:[%s6205_s6 + $0xd18] sm:$0xff] }
 0x409   : > { %v5391_v57 = vpack.c.bf16 %v2519_v11, %v2513_v8  ;;  %v2621_v8 = vld [vmem:[%s6205_s6 + $0x1048] sm:$0xff]  ;;  %v2627_v11 = vld [vmem:[%s6205_s6 + $0x1078] sm:$0xff] }
 0x40b   : > { %5358 = vmatpush1.bf16.msra.mxu0 %v5357_v18  ;;  %v2525_v18 = vld [vmem:[%s6205_s6 + $0xd48] sm:$0xff] }
 0x40c   : > { %5360 = vmatprep.subr.bf16.mxu0 %v5359_v3  ;;  %v2531_v3 = vld [vmem:[%s6205_s6 + $0xd78] sm:$0xff] }
 0x40f   : > { %5362 = vmatpush1.bf16.msra.mxu0 %v5361_v25  ;;  %v5397_v25 = vpack.c.bf16 %v2530_v22, %v2524_v21  ;;  %v2632_v21 = vld [vmem:[%s6205_s6 + $0x10a0] sm:$0xff]  ;;  %v2638_v22 = vld [vmem:[%s6205_s6 + $0x10d0] sm:$0xff] }
 0x410   : > { %5364 = vmatprep.subr.bf16.mxu0 %v5363_v23 }
 0x413   : > { %5366 = vmatpush1.bf16.msra.mxu0 %v5365_v30  ;;  %v5401_v30 = vpack.c.bf16 %v2542_v28, %v2536_v26  ;;  %v2644_v26 = vld [vmem:[%s6205_s6 + $0x1100] sm:$0xff]  ;;  %v2650_v28 = vld [vmem:[%s6205_s6 + $0x1130] sm:$0xff] }
 0x414   : > { %5368 = vmatprep.subr.bf16.mxu0 %v5367_v58  ;;  %v5403_v58 = vpack.c.bf16 %v2555_v32, %v2549_v29  ;;  %v2657_v29 = vld [vmem:[%s6205_s6 + $0x1168] sm:$0xff]  ;;  %v2663_v32 = vld [vmem:[%s6205_s6 + $0x1198] sm:$0xff] }
 0x417   : > { %5370 = vmatpush1.bf16.msra.mxu0 %v5369_v35  ;;  %v5405_v35 = vpack.c.bf16 %v2554_v31, %v2548_v47  ;;  %v2656_v47 = vld [vmem:[%s6205_s6 + $0x1160] sm:$0xff]  ;;  %v2662_v31 = vld [vmem:[%s6205_s6 + $0x1190] sm:$0xff] }
 0x418   : > { %5372 = vmatprep.subr.bf16.mxu0 %v5371_v36  ;;  %v5407_v36 = vpack.c.bf16 %v2567_v34, %v2561_v27  ;;  %v2669_v27 = vld [vmem:[%s6205_s6 + $0x11c8] sm:$0xff]  ;;  %v2675_v34 = vld [vmem:[%s6205_s6 + $0x11f8] sm:$0xff] }
 0x41b   : > { %5374 = vmatpush1.bf16.msra.mxu0 %v5373_v10  ;;  %v5409_v10 = vpack.c.bf16 %v2566_v38, %v2560_v9  ;;  %v2668_v9 = vld [vmem:[%s6205_s6 + $0x11c0] sm:$0xff]  ;;  %v2674_v38 = vld [vmem:[%s6205_s6 + $0x11f0] sm:$0xff] }
 0x41c   : > { %5376 = vmatprep.subr.bf16.mxu0 %v5375_v2  ;;  %v5411_v2 = vpack.c.bf16 %v2579_v40, %v2573_v39  ;;  %v2681_v39 = vld [vmem:[%s6205_s6 + $0x1228] sm:$0xff]  ;;  %v2687_v40 = vld [vmem:[%s6205_s6 + $0x1258] sm:$0xff] }
 0x41f   : > { %5378 = vmatpush1.bf16.msra.mxu0 %v5377_v46  ;;  %v5413_v46 = vpack.c.bf16 %v2578_v42, %v2572_v41  ;;  %v2680_v41 = vld [vmem:[%s6205_s6 + $0x1220] sm:$0xff]  ;;  %v2686_v42 = vld [vmem:[%s6205_s6 + $0x1250] sm:$0xff] }
 0x420   : > { %5380 = vmatprep.subr.bf16.mxu0 %v5379_v7  ;;  %v5415_v7 = vpack.c.bf16 %v2591_v44, %v2585_v43  ;;  %v2693_v43 = vld [vmem:[%s6205_s6 + $0x1288] sm:$0xff]  ;;  %v2699_v44 = vld [vmem:[%s6205_s6 + $0x12b8] sm:$0xff] }
 0x423   : > { %5382 = vmatpush1.bf16.msra.mxu0 %v5381_v52  ;;  %v5417_v52 = vpack.c.bf16 %v2590_v48, %v2584_v14  ;;  %v2692_v14 = vld [vmem:[%s6205_s6 + $0x1280] sm:$0xff]  ;;  %v2698_v48 = vld [vmem:[%s6205_s6 + $0x12b0] sm:$0xff] }
 0x424   : > { %5384 = vmatprep.subr.bf16.mxu0 %v5383_v54  ;;  %v5419_v54 = vpack.c.bf16 %v2603_v51, %v2597_v50  ;;  %v2705_v50 = vld [vmem:[%s6205_s6 + $0x12e8] sm:$0xff]  ;;  %v2711_v51 = vld [vmem:[%s6205_s6 + $0x1318] sm:$0xff] }
 0x426   : > { %3572 = vmatmul.mubr.f32.vlgmr.msra.gmra.mrb[6].mxu0 %v7264_v20  ;;  %v5395_v20 = vpack.c.bf16 %v2531_v3, %v2525_v18  ;;  %v2633_v18 = vld [vmem:[%s6205_s6 + $0x10a8] sm:$0xff]  ;;  %v2639_v3 = vld [vmem:[%s6205_s6 + $0x10d8] sm:$0xff] }
 0x427   : > { %5386 = vmatpush1.bf16.msra.mxu0 %v5385_v63  ;;  %3642 = vmatprep.mubr.f32.mxu0 %v7270_v37  ;;  %v2537_v37 = vld [vmem:[%s6205_s6 + $0xda8] sm:$0xff]  ;;  %v5421_v63 = vpack.c.bf16 %v2602_v60, %v2596_v55  ;;  %v2704_v55 = vld [vmem:[%s6205_s6 + $0x12e0] sm:$0xff]  ;;  %v2710_v60 = vld [vmem:[%s6205_s6 + $0x1310] sm:$0xff] }
 0x428   : > { %5388 = vmatprep.subr.bf16.mxu0 %v5387_v33  ;;  %v5399_v23 = vpack.c.bf16 %v2543_v24, %v2537_v37  ;;  %v5423_v33 = vpack.c.bf16 %v2615_v62, %v2609_v61  ;;  %v2645_v37 = vld [vmem:[%s6205_s6 + $0x1108] sm:$0xff]  ;;  %v2651_v24 = vld [vmem:[%s6205_s6 + $0x1138] sm:$0xff] }
 0x429   : > { %v2717_v61 = vld [vmem:[%s6205_s6 + $0x1348] sm:$0xff]  ;;  %v2723_v62 = vld [vmem:[%s6205_s6 + $0x1378] sm:$0xff] }
 0x42b   : > { %5390 = vmatpush1.bf16.msra.mxu0 %v5389_v13  ;;  %v5425_v13 = vpack.c.bf16 %v2614_v6, %v2608_v0  ;;  %v2722_v0 = vld [vmem:[%s6205_s6 + $0x1370] sm:$0xff]  ;;  %v2735_v6 = vld [vmem:[%s6205_s6 + $0x13d8] sm:$0xff] }
 0x42c   : > { %5392 = vmatprep.subr.bf16.mxu0 %v5391_v57  ;;  %v5427_v57 = vpack.c.bf16 %v2627_v11, %v2621_v8 }
 0x42f   : > { %5394 = vmatpush1.bf16.msra.mxu0 %v5393_v19  ;;  %v5429_v19 = vpack.c.bf16 %v2626_v16, %v2620_v15  ;;  %v2741_v15 = vld [vmem:[%s6205_s6 + $0x1408] sm:$0xff]  ;;  %v2747_v16 = vld [vmem:[%s6205_s6 + $0x1438] sm:$0xff] }
 0x430   : > { %5396 = vmatprep.subr.bf16.mxu0 %v5395_v20  ;;  %v5431_v20 = vpack.c.bf16 %v2639_v3, %v2633_v18  ;;  %v5467_v3 = vpack.c.bf16 %v2747_v16, %v2741_v15  ;;  %v2836_v15 = vld [vmem:[%s6205_s6 + $0x1700] sm:$0xff]  ;;  %v2842_v16 = vld [vmem:[%s6205_s6 + $0x1730] sm:$0xff] }
 0x433   : > { %5398 = vmatpush1.bf16.msra.mxu0 %v5397_v25  ;;  %v5433_v25 = vpack.c.bf16 %v2638_v22, %v2632_v21  ;;  %v2753_v21 = vld [vmem:[%s6205_s6 + $0x1468] sm:$0xff]  ;;  %v2759_v22 = vld [vmem:[%s6205_s6 + $0x1498] sm:$0xff] }
 0x434   : > { %5400 = vmatprep.subr.bf16.mxu0 %v5399_v23  ;;  %v5435_v23 = vpack.c.bf16 %v2651_v24, %v2645_v37  ;;  %v5471_v24 = vpack.c.bf16 %v2759_v22, %v2753_v21  ;;  %v2848_v21 = vld [vmem:[%s6205_s6 + $0x1760] sm:$0xff]  ;;  %v2854_v22 = vld [vmem:[%s6205_s6 + $0x1790] sm:$0xff] }
 0x437   : > { %5402 = vmatpush1.bf16.msra.mxu0 %v5401_v30  ;;  %v5437_v30 = vpack.c.bf16 %v2650_v28, %v2644_v26  ;;  %v2765_v28 = vld [vmem:[%s6205_s6 + $0x14c8] sm:$0xff] }
 0x438   : > { %5404 = vmatprep.subr.bf16.mxu0 %v5403_v58  ;;  %v5439_v58 = vpack.c.bf16 %v2663_v32, %v2657_v29  ;;  %v2771_v29 = vld [vmem:[%s6205_s6 + $0x14f8] sm:$0xff] }
 0x43b   : > { %5406 = vmatpush1.bf16.msra.mxu0 %v5405_v35  ;;  %v5441_v35 = vpack.c.bf16 %v2662_v31, %v2656_v47  ;;  %v2764_v47 = vld [vmem:[%s6205_s6 + $0x14c0] sm:$0xff]  ;;  %v2770_v31 = vld [vmem:[%s6205_s6 + $0x14f0] sm:$0xff] }
 0x43c   : > { %5408 = vmatprep.subr.bf16.mxu0 %v5407_v36  ;;  %v5443_v36 = vpack.c.bf16 %v2675_v34, %v2669_v27  ;;  %v2777_v27 = vld [vmem:[%s6205_s6 + $0x1528] sm:$0xff]  ;;  %v2783_v34 = vld [vmem:[%s6205_s6 + $0x1558] sm:$0xff] }
 0x43f   : > { %5410 = vmatpush1.bf16.msra.mxu0 %v5409_v10  ;;  %v5445_v10 = vpack.c.bf16 %v2674_v38, %v2668_v9  ;;  %v2776_v9 = vld [vmem:[%s6205_s6 + $0x1520] sm:$0xff]  ;;  %v2782_v38 = vld [vmem:[%s6205_s6 + $0x1550] sm:$0xff] }
 0x440   : > { %5412 = vmatprep.subr.bf16.mxu0 %v5411_v2  ;;  %v5447_v2 = vpack.c.bf16 %v2687_v40, %v2681_v39  ;;  %v2789_v39 = vld [vmem:[%s6205_s6 + $0x1588] sm:$0xff]  ;;  %v2795_v40 = vld [vmem:[%s6205_s6 + $0x15b8] sm:$0xff] }
 0x443   : > { %5414 = vmatpush1.bf16.msra.mxu0 %v5413_v46  ;;  %v5449_v46 = vpack.c.bf16 %v2686_v42, %v2680_v41  ;;  %v2788_v41 = vld [vmem:[%s6205_s6 + $0x1580] sm:$0xff]  ;;  %v2794_v42 = vld [vmem:[%s6205_s6 + $0x15b0] sm:$0xff] }
 0x444   : > { %5416 = vmatprep.subr.bf16.mxu0 %v5415_v7  ;;  %v5451_v7 = vpack.c.bf16 %v2699_v44, %v2693_v43  ;;  %v2801_v43 = vld [vmem:[%s6205_s6 + $0x15e8] sm:$0xff]  ;;  %v2807_v44 = vld [vmem:[%s6205_s6 + $0x1618] sm:$0xff] }
 0x447   : > { %5418 = vmatpush1.bf16.msra.mxu0 %v5417_v52  ;;  %v5453_v52 = vpack.c.bf16 %v2698_v48, %v2692_v14  ;;  %v2800_v14 = vld [vmem:[%s6205_s6 + $0x15e0] sm:$0xff]  ;;  %v2806_v48 = vld [vmem:[%s6205_s6 + $0x1610] sm:$0xff] }
 0x448   : > { %5420 = vmatprep.subr.bf16.mxu0 %v5419_v54  ;;  %v5455_v54 = vpack.c.bf16 %v2711_v51, %v2705_v50  ;;  %v2813_v50 = vld [vmem:[%s6205_s6 + $0x1648] sm:$0xff]  ;;  %v2819_v51 = vld [vmem:[%s6205_s6 + $0x1678] sm:$0xff] }
 0x44b   : > { %5422 = vmatpush1.bf16.msra.mxu0 %v5421_v63  ;;  %v5457_v63 = vpack.c.bf16 %v2710_v60, %v2704_v55  ;;  %v5489_v55 = vpack.c.bf16 %v2806_v48, %v2800_v14  ;;  %v5491_v60 = vpack.c.bf16 %v2819_v51, %v2813_v50 }
 0x44c   : > { %5424 = vmatprep.subr.bf16.mxu0 %v5423_v33  ;;  %v2716_v33 = vld [vmem:[%s6205_s6 + $0x1340] sm:$0xff] }
 0x44d   : > { %v5461_v8 = vpack.c.bf16 %v2722_v0, %v2716_v33 }
 0x44f   : > { %5426 = vmatpush1.bf16.msra.mxu0 %v5425_v13  ;;  %v2728_v13 = vld [vmem:[%s6205_s6 + $0x13a0] sm:$0xff] }
 0x450   : > { %5428 = vmatprep.subr.bf16.mxu0 %v5427_v57  ;;  %v2734_v57 = vld [vmem:[%s6205_s6 + $0x13d0] sm:$0xff] }
 0x451   : > { %v5465_v18 = vpack.c.bf16 %v2734_v57, %v2728_v13 }
 0x453   : > { %5430 = vmatpush1.bf16.msra.mxu0 %v5429_v19  ;;  %v2740_v19 = vld [vmem:[%s6205_s6 + $0x1400] sm:$0xff] }
 0x454   : > { %5432 = vmatprep.subr.bf16.mxu0 %v5431_v20  ;;  %v2746_v20 = vld [vmem:[%s6205_s6 + $0x1430] sm:$0xff] }
 0x455   : > { %v5469_v37 = vpack.c.bf16 %v2746_v20, %v2740_v19  ;;  %v5501_v19 = vpack.c.bf16 %v2842_v16, %v2836_v15 }
 0x457   : > { %5434 = vmatpush1.bf16.msra.mxu0 %v5433_v25  ;;  %v2752_v25 = vld [vmem:[%s6205_s6 + $0x1460] sm:$0xff] }
 0x458   : > { %5436 = vmatprep.subr.bf16.mxu0 %v5435_v23  ;;  %v2758_v23 = vld [vmem:[%s6205_s6 + $0x1490] sm:$0xff] }
 0x45b   : > { %5438 = vmatpush1.bf16.msra.mxu0 %v5437_v30  ;;  %v5473_v30 = vpack.c.bf16 %v2758_v23, %v2752_v25  ;;  %v5505_v25 = vpack.c.bf16 %v2854_v22, %v2848_v21 }
 0x45c   : > { %5440 = vmatprep.subr.bf16.mxu0 %v5439_v58  ;;  %v5475_v58 = vpack.c.bf16 %v2771_v29, %v2765_v28  ;;  %v2860_v28 = vld [vmem:[%s6205_s6 + $0x17c0] sm:$0xff]  ;;  %v2866_v29 = vld [vmem:[%s6205_s6 + $0x17f0] sm:$0xff] }
 0x45f   : > { %5442 = vmatpush1.bf16.msra.mxu0 %v5441_v35  ;;  %v5477_v35 = vpack.c.bf16 %v2770_v31, %v2764_v47  ;;  %v5935_v31 = vmov (!%p3966_p2), 0.0  }
 0x460   : > { %5444 = vmatprep.subr.bf16.mxu0 %v5443_v36  ;;  %v5479_v36 = vpack.c.bf16 %v2783_v34, %v2777_v27  ;;  %3724 = vst [vmem:[#allocation2] sm:$0xff] (!%p3966_p2), %v5935_v31  ;;  %3725 = vst [vmem:[#allocation2 + $0x8] sm:$0xff] (!%p3966_p2), %v5935_v31 }
 0x461   : > { %3726 = vst [vmem:[#allocation2 + $0x10] sm:$0xff] (!%p3966_p2), %v5935_v31  ;;  %3727 = vst [vmem:[#allocation2 + $0x18] sm:$0xff] (!%p3966_p2), %v5935_v31 }
 0x462   : > { %3728 = vst [vmem:[#allocation2 + $0x20] sm:$0xff] (!%p3966_p2), %v5935_v31  ;;  %3729 = vst [vmem:[#allocation2 + $0x28] sm:$0xff] (!%p3966_p2), %v5935_v31 }
 0x463   : > { %5446 = vmatpush1.bf16.msra.mxu0 %v5445_v10  ;;  %v5481_v10 = vpack.c.bf16 %v2782_v38, %v2776_v9 }
 0x464   : > { %5448 = vmatprep.subr.bf16.mxu0 %v5447_v2  ;;  %v5483_v2 = vpack.c.bf16 %v2795_v40, %v2789_v39 }
 0x466   : > { %3643 = vmatmul.mubr.f32.vlgmr.msra.gmra.mrb[6].mxu0 %v7412_v12  ;;  %v5459_v12 = vpack.c.bf16 %v2723_v62, %v2717_v61  ;;  %v2812_v61 = vld [vmem:[%s6205_s6 + $0x1640] sm:$0xff]  ;;  %v2818_v62 = vld [vmem:[%s6205_s6 + $0x1670] sm:$0xff] }
 0x467   : > { %5450 = vmatpush1.bf16.msra.mxu0 %v5449_v46  ;;  %3713 = vmatprep.mubr.f32.mxu0 %v7619_v53  ;;  %v2729_v53 = vld [vmem:[%s6205_s6 + $0x13a8] sm:$0xff]  ;;  %v5485_v46 = vpack.c.bf16 %v2794_v42, %v2788_v41  ;;  %v5493_v33 = vpack.c.bf16 %v2818_v62, %v2812_v61 }
 0x468   : > { %5452 = vmatprep.subr.bf16.mxu0 %v5451_v7  ;;  %v5463_v11 = vpack.c.bf16 %v2735_v6, %v2729_v53  ;;  %v5487_v7 = vpack.c.bf16 %v2807_v44, %v2801_v43  ;;  %v2824_v53 = vld [vmem:[%s6205_s6 + $0x16a0] sm:$0xff]  ;;  %v2830_v6 = vld [vmem:[%s6205_s6 + $0x16d0] sm:$0xff] }
 0x469   : > { %v5497_v13 = vpack.c.bf16 %v2830_v6, %v2824_v53 }
 0x46b   : > { %5454 = vmatpush1.bf16.msra.mxu0 %v5453_v52 }
 0x46c   : > { %5456 = vmatprep.subr.bf16.mxu0 %v5455_v54 }
 0x46f   : > { %5458 = vmatpush1.bf16.msra.mxu0 %v5457_v63  ;;  %v2825_v63 = vld [vmem:[%s6205_s6 + $0x16a8] sm:$0xff] }
 0x470   : > { %5460 = vmatprep.subr.bf16.mxu0 %v5459_v12  ;;  %v2831_v12 = vld [vmem:[%s6205_s6 + $0x16d8] sm:$0xff] }
 0x471   : > { %v5495_v0 = vpack.c.bf16 %v2831_v12, %v2825_v63 }
 0x473   : > { %5462 = vmatpush1.bf16.msra.mxu0 %v5461_v8  ;;  %v2837_v8 = vld [vmem:[%s6205_s6 + $0x1708] sm:$0xff] }
 0x474   : > { %5464 = vmatprep.subr.bf16.mxu0 %v5463_v11  ;;  %v2843_v11 = vld [vmem:[%s6205_s6 + $0x1738] sm:$0xff] }
 0x475   : > { %v5499_v57 = vpack.c.bf16 %v2843_v11, %v2837_v8 }
 0x477   : > { %5466 = vmatpush1.bf16.msra.mxu0 %v5465_v18  ;;  %v2849_v18 = vld [vmem:[%s6205_s6 + $0x1768] sm:$0xff] }
 0x478   : > { %5468 = vmatprep.subr.bf16.mxu0 %v5467_v3  ;;  %v2855_v3 = vld [vmem:[%s6205_s6 + $0x1798] sm:$0xff] }
 0x479   : > { %v7858_v26 = vpop.f32.mrb[4].mxu0  ;;  %v5503_v20 = vpack.c.bf16 %v2855_v3, %v2849_v18 }
 0x47a   : > { %v7862_v32 = vpop.f32.mrb[5].mxu0 }
 0x47b   : > { %5470 = vmatpush1.bf16.msra.mxu0 %v5469_v37  ;;  %v2861_v37 = vld [vmem:[%s6205_s6 + $0x17c8] sm:$0xff] }
 0x47c   : > { %5472 = vmatprep.subr.bf16.mxu0 %v5471_v24  ;;  %v2867_v24 = vld [vmem:[%s6205_s6 + $0x17f8] sm:$0xff] }
 0x47d   : > { %v5507_v23 = vpack.c.bf16 %v2867_v24, %v2861_v37 }
 0x47f   : > { %5474 = vmatpush1.bf16.msra.mxu0 %v5473_v30  ;;  %v5509_v30 = vpack.c.bf16 %v2866_v29, %v2860_v28 }
 0x480   : > { %5476 = vmatprep.subr.bf16.mxu0 %v5475_v58 }
 0x483   : > { %5478 = vmatpush1.bf16.msra.mxu0 %v5477_v35 }
 0x484   : > { %5480 = vmatprep.subr.bf16.mxu0 %v5479_v36 }
 0x487   : > { %5482 = vmatpush1.bf16.msra.mxu0 %v5481_v10 }
 0x488   : > { %5484 = vmatprep.subr.bf16.mxu0 %v5483_v2 }
 0x48a   : > { %v7880_v52 = vpop.f32.mrb[6].mxu1 }
 0x48b   : > { %5486 = vmatpush1.bf16.msra.mxu0 %v5485_v46  ;;  %v7882_v54 = vpop.f32.mrb[7].mxu1 }
 0x48c   : > { %5488 = vmatprep.subr.bf16.mxu0 %v5487_v7 }
 0x48f   : > { %5490 = vmatpush1.bf16.msra.mxu0 %v5489_v55 }
 0x490   : > { %5492 = vmatprep.subr.bf16.mxu0 %v5491_v60 }
 0x493   : > { %5494 = vmatpush1.bf16.msra.mxu0 %v5493_v33 }
 0x494   : > { %5496 = vmatprep.subr.bf16.mxu0 %v5495_v0 }
 0x497   : > { %5498 = vmatpush1.bf16.msra.mxu0 %v5497_v13 }
 0x498   : > { %5500 = vmatprep.subr.bf16.mxu0 %v5499_v57 }
 0x49b   : > { %5502 = vmatpush1.bf16.msra.mxu0 %v5501_v19 }
 0x49c   : > { %5504 = vmatprep.subr.bf16.mxu0 %v5503_v20 }
 0x49f   : > { %5506 = vmatpush1.bf16.msra.mxu0 %v5505_v25 }
 0x4a0   : > { %5508 = vmatprep.subr.bf16.mxu0 %v5507_v23 }
 0x4a3   : > { %5510 = vmatpush1.bf16.msra.mxu0 %v5509_v30 }
 0x4a6   : > { %3714 = vmatmul.mubr.f32.vlgmr.msra.gmra.mrb[6].mxu0 %v7621_v45 }
 0x574   : > { %3723 = sbr.rel (%p3966_p2) target bundleno = 1403 (0x57b), region = 64 }
 0x579   : > { %v3715_v58 = vpop.f32.mrb[6].mxu0 }
 0x57a   : > { %v3717_v47 = vpop.f32.mrb[7].mxu0 }
 0x57b PF: > { %s8015_s29 = sld [smem:[#allocation18_spill]] }
 0x581   : > { %p3967_p12 = scmp.ge.s32.totalorder %s8015_s29, 2 }
 0x582   : > { %v3734_v27 = vld [vmem:[#allocation2] sm:$0xff] (!%p3967_p12)  ;;  %v3735_v34 = vld [vmem:[#allocation2 + $0x8] sm:$0xff] (!%p3967_p12)  ;;  %v3736_v35 = vld [vmem:[#allocation2 + $0x10] sm:$0xff] (!%p3967_p12) }
 0x583   : > { %3733 = sbr.rel (%p3967_p12) target bundleno = 1418 (0x58a), region = 68  ;;  %v3740_v45 = vadd.f32 (!%p3967_p12), %v3734_v27, %v7858_v26  ;;  %v3741_v36 = vadd.f32 (!%p3967_p12), %v3735_v34, %v7862_v32  ;;  %v3742_v9 = vadd.f32 (!%p3967_p12), %v3736_v35, %v7880_v52  ;;  %v3737_v38 = vld [vmem:[#allocation2 + $0x18] sm:$0xff] (!%p3967_p12)  ;;  %v3738_v39 = vld [vmem:[#allocation2 + $0x20] sm:$0xff] (!%p3967_p12)  ;;  %v3739_v40 = vld [vmem:[#allocation2 + $0x28] sm:$0xff] (!%p3967_p12) }
 0x584   : > { %v3743_v10 = vadd.f32 (!%p3967_p12), %v3737_v38, %v7882_v54  ;;  %v3744_v2 = vadd.f32 (!%p3967_p12), %v3738_v39, %v3715_v58  ;;  %v3745_v41 = vadd.f32 (!%p3967_p12), %v3739_v40, %v3717_v47 }
 0x585   : > { %3746 = vst [vmem:[#allocation2] sm:$0xff] (!%p3967_p12), %v3740_v45  ;;  %3747 = vst [vmem:[#allocation2 + $0x8] sm:$0xff] (!%p3967_p12), %v3741_v36 }
 0x586   : > { %3748 = vst [vmem:[#allocation2 + $0x10] sm:$0xff] (!%p3967_p12), %v3742_v9  ;;  %3749 = vst [vmem:[#allocation2 + $0x18] sm:$0xff] (!%p3967_p12), %v3743_v10 }
 0x587   : > { %3750 = vst [vmem:[#allocation2 + $0x20] sm:$0xff] (!%p3967_p12), %v3744_v2  ;;  %3751 = vst [vmem:[#allocation2 + $0x28] sm:$0xff] (!%p3967_p12), %v3745_v41 }
 0x58a PF: > { %s8016_s13 = sld [smem:[#allocation18_spill]] }
 0x590   : > { %p3968_p11 = scmp.ne.s32.totalorder %s8016_s13, 2 }
 0x591   : > { %v3756_v42 = vld [vmem:[#allocation2] sm:$0xff] (!%p3968_p11)  ;;  %v3768_v43 = vld [vmem:[#allocation11] sm:$0x3f] (!%p3968_p11)  ;;  %v3757_v44 = vld [vmem:[#allocation2 + $0x8] sm:$0xff] (!%p3968_p11) }
 0x592   : > { %3755 = sbr.rel (%p3968_p11) target bundleno = 1434 (0x59a), region = 72  ;;  %v3762_v46 = vadd.f32 (!%p3968_p11), %v3756_v42, %v7858_v26  ;;  %v3773_v7 = vrot.slane (!%p3968_p11), %v3768_v43, %v1138_v1  ;;  %v3763_v14 = vadd.f32 (!%p3968_p11), %v3757_v44, %v7862_v32  ;;  %v3777_v48 = vrot.slane (!%p3968_p11), %v3768_v43, %v1142_v5  ;;  %v3758_v50 = vld [vmem:[#allocation2 + $0x10] sm:$0xff] (!%p3968_p11)  ;;  %v3759_v51 = vld [vmem:[#allocation2 + $0x18] sm:$0xff] (!%p3968_p11)  ;;  %v3760_v55 = vld [vmem:[#allocation2 + $0x20] sm:$0xff] (!%p3968_p11) }
 0x593   : > { %v3764_v60 = vadd.f32 (!%p3968_p11), %v3758_v50, %v7880_v52  ;;  %v3781_v61 = vrot.slane (!%p3968_p11), %v3768_v43, %v1146_v17  ;;  %v3765_v62 = vadd.f32 (!%p3968_p11), %v3759_v51, %v7882_v54  ;;  %v3785_v26 = vrot.slane (!%p3968_p11), %v3768_v43, %v1150_v4  ;;  %v3761_v63 = vld [vmem:[#allocation2 + $0x28] sm:$0xff] (!%p3968_p11) }
 0x594   : > { %v3800_v1 = vadd.f32 (!%p3968_p11), %v3773_v7, %v3762_v46  ;;  %v3801_v12 = vadd.f32 (!%p3968_p11), %v3777_v48, %v3763_v14  ;;  %v3766_v32 = vadd.f32 (!%p3968_p11), %v3760_v55, %v3715_v58  ;;  %v3789_v5 = vrot.slane (!%p3968_p11), %v3768_v43, %v1154_v59 }
 0x595   : > { %v3802_v33 = vadd.f32 (!%p3968_p11), %v3781_v61, %v3764_v60  ;;  %v3803_v0 = vadd.f32 (!%p3968_p11), %v3785_v26, %v3765_v62  ;;  %v3767_v53 = vadd.f32 (!%p3968_p11), %v3761_v63, %v3717_v47  ;;  %v3793_v52 = vrot.slane (!%p3968_p11), %v3768_v43, %v1158_v49 }
 0x596   : > { %3806 = vst [vmem:[#allocation12] sm:$0xff] (!%p3968_p11), %v3800_v1  ;;  %3807 = vst [vmem:[#allocation12 + $0x8] sm:$0xff] (!%p3968_p11), %v3801_v12  ;;  %v3804_v17 = vadd.f32 (!%p3968_p11), %v3789_v5, %v3766_v32 }
 0x597   : > { %3808 = vst [vmem:[#allocation12 + $0x10] sm:$0xff] (!%p3968_p11), %v3802_v33  ;;  %3809 = vst [vmem:[#allocation12 + $0x18] sm:$0xff] (!%p3968_p11), %v3803_v0  ;;  %v3805_v54 = vadd.f32 (!%p3968_p11), %v3793_v52, %v3767_v53 }
 0x598   : > { %3810 = vst [vmem:[#allocation12 + $0x20] sm:$0xff] (!%p3968_p11), %v3804_v17 }
 0x599   : > { %3811 = vst [vmem:[#allocation12 + $0x28] sm:$0xff] %v3805_v54 }
 0x59a PF: > { %p5597_p0 = scmp.eq.s32.totalorder %s5996_s24, 2  ;;  %s5936_s8 = smov [#allocation12]  }
 0x59b   : > { %s3822_s16 = sshll.u32 %s5936_s8, 4  ;;  %s3823_s16 = int_to_ptr.vmem [resolvable:$true] %s3822_s16 }
 0x59c   : > { %s5831_s12 = scalar_lea.vmem %s3823_s16, 768  ;;  %p5838_p8 = scmp.lt.s32.totalorder %s3823_s16, %s3823_s16 }
 0x59d   : > { %p5832_p7 = scmp.ne.s32.totalorder %s3823_s16, %s5831_s12  ;;  %p5839_p13 = scmp.lt.s32.totalorder %s5831_s12, %s5831_s12 }
 0x59f   : > { %p5833_p10 = pnand %p5832_p7, %p5597_p0  ;;  %p5840_p3 = por %p5839_p13, %p5838_p8 }
 0x5a1   : > { %p5834_p6 = pneg %p5833_p10 }
 0x5a3   : > { %p5841_p1 = pnand %p5840_p3, %p5834_p6 }
 0x5a5   : > { %5844 = shalt.err (!%p5841_p1)
}
 0x5a6   : > { %s8017_s30 = sld [smem:[#allocation23_spill]] }
 0x5ac   : > { %s5845_s11 = scalar_lea.hbm %s8017_s30, 768 }
 0x5ad   : > { %p5846_p4 = scmp.ne.s32.totalorder %s8017_s30, %s5845_s11  ;;  %p5851_p2 = scmp.lt.u32.totalorder %s5845_s11, %s8017_s30 }
 0x5af   : > { %p5847_p9 = pnand %p5846_p4, %p5597_p0 }
 0x5b1   : > { %p5848_p5 = pneg %p5847_p9 }
 0x5b3   : > { %p5853_p12 = pnand %p5851_p2, %p5848_p5 }
 0x5b5   : > { %5856 = shalt.err (!%p5853_p12)
}
 0x5b6   : > { %5572 = dma.vmem_to_hbm [thread:$0]  (%p5597_p0), %s3823_s16, 768, %s8017_s30, [#allocation5]  }
 0x5b7   : > { %5898 = dma.done.wait (%p5597_p0), [#allocation5], 768  }
 0x5b8   : > { %5900 = vsyncadd (%p5597_p0), [#allocation5], 4294966528 }
 0x5b9 PF: > { %s23_s23 = sadd.s32 1, %s5923_s23   ;;  %s8018_s21 = sld [smem:[#allocation20_spill]] }
 0x5ba   : > { %p20_p11 = scmp.ge.s32.totalorder %s23_s23, 5   ;;  %s8019_s14 = sld [smem:[#allocation19_spill]] }
 0x5bb   : > { %s8020_s18 = smov %s5907_s19  ;;  %s8021_s19 = smov %s5911_s20 }
 0x5bc   :  { %22 = sbr.rel (!%p20_p11) target bundleno = 12 (0xc), region = 124 }
 0x5bf   : > { %s8022_s20 = smov %s8018_s21  ;;  %s8023_s21 = smov %s5919_s22 }
 0x5c0   : > { %s8024_s22 = smov %s8019_s14 }
 0x5c3   :  { %3835 = vsyncpa [#allocation4], 1 }
 0x5c4   :  { %3837 = vsyncpa [#allocation4 + $0x1], 1 }
 0x5c5   :  { %3838 = vsyncpa [#allocation7], 1 }
 0x5c6   :  { %3840 = vsyncpa [#allocation7 + $0x1], 1 }
 0x5c7   :  { %3841 = vsyncpa [#allocation10], 1 }
 0x5c8   :  { %3843 = vsyncpa [#allocation10 + $0x1], 1 }
 0x5c9   :  { %3844 = vsyncpa [#allocation5], 1 }
 0x5ca   :  { %3846 = vsyncpa [#allocation5 + $0x1], 1 }

</bundles_post_ra>
